<compile_context>
chip_gen: v6e
topology: v6e:2x2x1
jax: 0.10.0
libtpu: 0.0.40
codegen_flags: <defaults>
</compile_context>

<pallas_src>
import functools

import jax
import jax.numpy as jnp
from jax.experimental import pallas as pl
from jax.experimental.pallas import tpu as pltpu

EPS = 1e-5                      # torch.nn.InstanceNorm2d default eps
MXU_DTYPE = jnp.bfloat16        # conv-input dtype (f32 accumulation regardless)


# ----------------------------------------------------------------------------
# Fused kernel: one grid step = B images, stacked along the lane axis.
#
# Layout: per image the zero-padded flat grid has row stride Wp=W+2 and length
# P=(H+2)*Wp; image b occupies padded columns [b*P, (b+1)*P).  A conv output
# pixel (y,x) of image b lives at working column gq = b*P + y*Wp + x, and the
# 3x3 tap (dy,dx) is the lane slice [t : t+QB] with t = dy*Wp + dx, where
# QB = (B-1)*P + Q and Q = (H-1)*Wp + W.  Columns that are not real pixels
# (x>=W rows tails, rows>=H, inter-image gaps) are junk and are masked out of
# the InstanceNorm statistics / re-embedding via the selector matrices S, S^T.
# ----------------------------------------------------------------------------
def _out_fused_kernel(x_ref, s_ref, sb_ref, w1_ref, b1_ref, w2_ref, b2_ref,
                      w3_ref, b3_ref, w4_ref, b4_ref, o_ref, pad_ref,
                      *, H, W, C, B, alpha):
    Wp = W + 2
    P = (H + 2) * Wp
    Q = (H - 1) * Wp + W
    QB = (B - 1) * P + Q
    BP = B * P
    off = Wp + 1                                # re-embed lane offset
    inv_hw = 1.0 / float(H * W)
    taps = [dy * Wp + dx for dy in range(3) for dx in range(3)]

    S = s_ref[...]       # (QB, B) f32: 1 at (column, owning image) for real pixels
    Sb = sb_ref[...]     # (B, QB) f32: its transpose (lane broadcast-back matrix)

    def conv_norm(src, w_ref, b_ref):
        # im2col: 9 lane-offset tap slices of the bf16 padded buffer, one wide
        # MXU matmul with f32 accumulation.
        patch = jnp.concatenate([src[:, t:t + QB] for t in taps], axis=0)
        y = jnp.dot(w_ref[...], patch, preferred_element_type=jnp.float32)
        y = jnp.maximum(y + b_ref[...], 0.0)                        # bias+ReLU
        # Per-image InstanceNorm stats as ONE segment matmul (MXU is idle):
        # rows [0:C] -> masked sums, rows [C:2C] -> masked sums of squares.
        yy = jnp.concatenate([y, y * y], axis=0)                    # (2C, QB)
        stats = jnp.dot(yy, S, preferred_element_type=jnp.float32)  # (2C, B)
        mean = stats[:C] * inv_hw
        var = stats[C:] * inv_hw - mean * mean        # biased, E[y^2]-mean^2
        scale = jax.lax.rsqrt(var + EPS)              # (C, B)
        shift = mean * scale
        # Broadcast per-image scale/shift back onto lanes.  Sb is zero at all
        # halo / gap columns, so the output is already masked to zero there.
        ss_q = jnp.dot(jnp.concatenate([scale, shift], axis=0), Sb,
                       preferred_element_type=jnp.float32)          # (2C, QB)
        return y * ss_q[:C] - ss_q[C:]                              # (C, QB)

    # Only the edge bands of the activation scratch are never overwritten by
    # the re-embed below; zero them every step (two tiny stores) so the conv
    # halo reads as zero with no dependence on scratch init / core assignment.
    pad_ref[:, 0:off] = jnp.zeros((C, off), pad_ref.dtype)
    pad_ref[:, off + QB:BP] = jnp.zeros((C, BP - off - QB), pad_ref.dtype)

    # Layer 1 reads straight from the wrapper-padded bf16 input block.
    conv1 = conv_norm(x_ref[0], w1_ref, b1_ref)                     # (C, QB)
    pad_ref[:, off:off + QB] = conv1.astype(pad_ref.dtype)          # re-embed
    skip1 = conv_norm(pad_ref[...], w2_ref, b2_ref)
    pad_ref[:, off:off + QB] = skip1.astype(pad_ref.dtype)
    skip2 = conv_norm(pad_ref[...], w3_ref, b3_ref)

    # Head: skip-add, 1x1 conv as a C-wide channel (sublane) reduce, sigmoid.
    add1 = conv1 + skip2                                            # (C, QB)
    z = jnp.sum(add1 * w4_ref[...], axis=0, keepdims=True) + b4_ref[...]
    o_ref[0] = jax.nn.sigmoid(z - alpha)                            # (1, QB)


# ----------------------------------------------------------------------------
# Full module forward.  Accepts NCHW input, returns (N, 1, H, W) like PyTorch.
# ----------------------------------------------------------------------------
def out_forward(x_nchw, params, alpha, batch_block=4):
    N, Cin, H, W = x_nchw.shape
    C = params["b1"].shape[0]
    Wp = W + 2
    P = (H + 2) * Wp
    Q = (H - 1) * Wp + W
    # Images per grid step: amortize per-step overhead, but keep >= 2 grid
    # steps whenever N >= 2 so v7x's two TensorCores both get work.
    B = max(1, min(batch_block, (N + 1) // 2))
    G = -(-N // B)
    N2 = G * B
    QB = (B - 1) * P + Q
    CK = max(Cin, C)            # layer-1 input channels (padded for alignment)

    # ---- wrapper-side plumbing (tiny arrays, overlapped with compute) ----
    # Zero-pad halo / dummy channels / batch remainder, flatten, cast once to
    # bf16, and lay B images side by side along the lane axis with stride P.
    x_pad = jnp.pad(x_nchw, ((0, N2 - N), (0, CK - Cin), (1, 1), (1, 1)))
    x_pad = (x_pad.reshape(G, B, CK, P).transpose(0, 2, 1, 3)
             .reshape(G, CK, B * P).astype(MXU_DTYPE))

    def conv3x3_matrix(w_hwio, cin_pad):
        # (3,3,cin,C) -> (C, 9*cin_pad), tap-major / channel-minor columns.
        w = jnp.pad(w_hwio, ((0, 0), (0, 0), (0, cin_pad - w_hwio.shape[2]),
                             (0, 0)))
        return jnp.transpose(w, (3, 0, 1, 2)).reshape(C, 9 * cin_pad).astype(MXU_DTYPE)

    w1m = conv3x3_matrix(params["w1"], CK)
    w2m = conv3x3_matrix(params["w2"], C)
    w3m = conv3x3_matrix(params["w3"], C)
    b1c = params["b1"].reshape(C, 1).astype(jnp.float32)
    b2c = params["b2"].reshape(C, 1).astype(jnp.float32)
    b3c = params["b3"].reshape(C, 1).astype(jnp.float32)
    w4c = params["w4"].reshape(C, 1).astype(jnp.float32)
    b4c = params["b4"].reshape(1, 1).astype(jnp.float32)

    # Per-image real-pixel selector over the lane-stacked working columns:
    # S[gq, b] = 1 iff working column gq belongs to image b AND is a real
    # output pixel (not a halo / row-tail / inter-image gap column).
    gq = jnp.arange(QB)
    lq = gq % P
    valid = ((lq // Wp) < H) & ((lq % Wp) < W)
    S = (valid[:, None] & ((gq // P)[:, None] == jnp.arange(B)[None, :])
         ).astype(jnp.float32)                                      # (QB, B)
    Sb = S.T                                                        # (B, QB)

    def cspec(shape):
        zeros = (0,) * len(shape)
        return pl.BlockSpec(shape, lambda g: zeros)

    kern = functools.partial(_out_fused_kernel, H=H, W=W, C=C, B=B,
                             alpha=float(alpha))
    y_flat = pl.pallas_call(
        kern,
        out_shape=jax.ShapeDtypeStruct((G, 1, QB), jnp.float32),
        grid=(G,),
        in_specs=[
            pl.BlockSpec((1, CK, B * P), lambda g: (g, 0, 0)),      # B images
            cspec((QB, B)), cspec((B, QB)),                         # S, S^T
            cspec((C, 9 * CK)), cspec((C, 1)),                      # layer 1
            cspec((C, 9 * C)), cspec((C, 1)),                       # layer 2
            cspec((C, 9 * C)), cspec((C, 1)),                       # layer 3
            cspec((C, 1)), cspec((1, 1)),                           # 1x1 head
        ],
        out_specs=pl.BlockSpec((1, 1, QB), lambda g: (g, 0, 0)),
        scratch_shapes=[pltpu.VMEM((C, B * P), MXU_DTYPE)],
        compiler_params=pltpu.CompilerParams(
            dimension_semantics=("parallel",)),     # v7x: split steps over TCs
    )(x_pad, S, Sb, w1m, b1c, w2m, b2c, w3m, b3c, w4c, b4c)

    # Unflatten: working column b*P + y*Wp + x -> pixel (y, x) of image b.
    y2 = jnp.pad(y_flat[:, 0, :], ((0, 0), (0, B * P - QB)))        # (G, B*P)
    y2 = y2.reshape(N2, P)[:N, :H * Wp].reshape(N, H, Wp)[:, :, :W]
    return y2.reshape(N, 1, H, W)


# ----------------------------------------------------------------------------
# Deterministic parameter init (PyTorch Conv2d-style uniform bounds), HWIO.
# ----------------------------------------------------------------------------
def init_conv(key, cin, cout, ksize):
    kw, kb = jax.random.split(key)
    bound = 1.0 / float(cin * ksize * ksize) ** 0.5
    w = jax.random.uniform(kw, (ksize, ksize, cin, cout), jnp.float32,
                           -bound, bound)
    b = jax.random.uniform(kb, (cout,), jnp.float32, -bound, bound)
    return w, b


if __name__ == "__main__":
    key = jax.random.PRNGKey(0)
    N, Cin, Cout, H, W = 8, 4, 8, 16, 16
    alpha = 0.25

    keys = jax.random.split(key, 5)
    w1, b1 = init_conv(keys[0], Cin, Cout, 3)
    w2, b2 = init_conv(keys[1], Cout, Cout, 3)
    w3, b3 = init_conv(keys[2], Cout, Cout, 3)
    w4, b4 = init_conv(keys[3], Cout, 1, 1)                 # 1x1 conv
    params = {
        "w1": w1, "b1": b1,
        "w2": w2, "b2": b2,
        "w3": w3, "b3": b3,
        "w4": w4.reshape(Cout, 1), "b4": b4,
    }

    x = jax.random.normal(keys[4], (N, Cin, H, W), jnp.float32)

    y = jax.jit(functools.partial(out_forward, alpha=alpha))(x, params)
    jax.block_until_ready(y)
    assert y.shape == (N, 1, H, W), y.shape
    print("KERNEL_OK")
</pallas_src>

<mosaic_0001>
module attributes {stable_mosaic.version = 11 : i64} {
  func.func @_out_fused_kernel(%arg0: i32, %arg1: memref<1x8x1296xbf16, #tpu.memory_space<vmem>>, %arg2: memref<1258x4xf32, #tpu.memory_space<vmem>>, %arg3: memref<4x1258xf32, #tpu.memory_space<vmem>>, %arg4: memref<8x72xbf16, #tpu.memory_space<vmem>>, %arg5: memref<8x1xf32, #tpu.memory_space<vmem>>, %arg6: memref<8x72xbf16, #tpu.memory_space<vmem>>, %arg7: memref<8x1xf32, #tpu.memory_space<vmem>>, %arg8: memref<8x72xbf16, #tpu.memory_space<vmem>>, %arg9: memref<8x1xf32, #tpu.memory_space<vmem>>, %arg10: memref<8x1xf32, #tpu.memory_space<vmem>>, %arg11: memref<1x1xf32, #tpu.memory_space<vmem>>, %arg12: memref<1x1x1258xf32, #tpu.memory_space<vmem>>, %arg13: memref<8x1296xbf16, #tpu.memory_space<vmem>>) attributes {dimension_semantics = [#tpu.dimension_semantics<parallel>], iteration_bounds = array<i64: 2>, scalar_prefetch = 0 : i64, scratch_operands = 1 : i64, tpu.core_type = #tpu.core_type<tc>, window_params = [{transform_indices = @transform_0, window_bounds = array<i64: 1, 8, 1296>}, {pipeline_mode = #tpu.pipeline_mode<synchronous>, transform_indices = @transform_1, window_bounds = array<i64: 1258, 4>}, {pipeline_mode = #tpu.pipeline_mode<synchronous>, transform_indices = @transform_2, window_bounds = array<i64: 4, 1258>}, {pipeline_mode = #tpu.pipeline_mode<synchronous>, transform_indices = @transform_3, window_bounds = array<i64: 8, 72>}, {pipeline_mode = #tpu.pipeline_mode<synchronous>, transform_indices = @transform_4, window_bounds = array<i64: 8, 1>}, {pipeline_mode = #tpu.pipeline_mode<synchronous>, transform_indices = @transform_5, window_bounds = array<i64: 8, 72>}, {pipeline_mode = #tpu.pipeline_mode<synchronous>, transform_indices = @transform_6, window_bounds = array<i64: 8, 1>}, {pipeline_mode = #tpu.pipeline_mode<synchronous>, transform_indices = @transform_7, window_bounds = array<i64: 8, 72>}, {pipeline_mode = #tpu.pipeline_mode<synchronous>, transform_indices = @transform_8, window_bounds = array<i64: 8, 1>}, {pipeline_mode = #tpu.pipeline_mode<synchronous>, transform_indices = @transform_9, window_bounds = array<i64: 8, 1>}, {pipeline_mode = #tpu.pipeline_mode<synchronous>, transform_indices = @transform_10, window_bounds = array<i64: 1, 1>}, {transform_indices = @transform_11, window_bounds = array<i64: 1, 1, 1258>}]} {
    %c0 = arith.constant 0 : index
    %c0_0 = arith.constant 0 : index
    %0 = vector.load %arg2[%c0, %c0_0] : memref<1258x4xf32, #tpu.memory_space<vmem>>, vector<1258x4xf32>
    %c0_1 = arith.constant 0 : index
    %c0_2 = arith.constant 0 : index
    %1 = vector.load %arg3[%c0_1, %c0_2] : memref<4x1258xf32, #tpu.memory_space<vmem>>, vector<4x1258xf32>
    %cst = arith.constant 0.000000e+00 : bf16
    %2 = vector.broadcast %cst : bf16 to vector<8x19xbf16>
    %c0_3 = arith.constant 0 : index
    %c0_4 = arith.constant 0 : index
    %3 = vector.load %arg13[%c0_3, %c0_4] : memref<8x1296xbf16, #tpu.memory_space<vmem>>, vector<8x19xbf16>
    tpu.vector_store %arg13[%c0_3, %c0_4], %2 {strides = array<i32>} : memref<8x1296xbf16, #tpu.memory_space<vmem>>, vector<8x19xbf16>,
    %cst_5 = arith.constant 0.000000e+00 : bf16
    %4 = vector.broadcast %cst_5 : bf16 to vector<8x19xbf16>
    %c0_6 = arith.constant 0 : index
    %c1277 = arith.constant 1277 : index
    %5 = vector.load %arg13[%c0_6, %c1277] : memref<8x1296xbf16, #tpu.memory_space<vmem>>, vector<8x19xbf16>
    tpu.vector_store %arg13[%c0_6, %c1277], %4 {strides = array<i32>} : memref<8x1296xbf16, #tpu.memory_space<vmem>>, vector<8x19xbf16>,
    %c0_7 = arith.constant 0 : index
    %c0_8 = arith.constant 0 : index
    %c0_9 = arith.constant 0 : index
    %6 = vector.load %arg1[%c0_7, %c0_8, %c0_9] : memref<1x8x1296xbf16, #tpu.memory_space<vmem>>, vector<1x8x1296xbf16>
    %7 = vector.shape_cast %6 : vector<1x8x1296xbf16> to vector<8x1296xbf16>
    %8 = vector.extract_strided_slice %7 {offsets = [0, 0], sizes = [8, 1258], strides = [1, 1]} : vector<8x1296xbf16> to vector<8x1258xbf16>
    %9 = vector.extract_strided_slice %7 {offsets = [0, 1], sizes = [8, 1258], strides = [1, 1]} : vector<8x1296xbf16> to vector<8x1258xbf16>
    %10 = vector.extract_strided_slice %7 {offsets = [0, 2], sizes = [8, 1258], strides = [1, 1]} : vector<8x1296xbf16> to vector<8x1258xbf16>
    %11 = vector.extract_strided_slice %7 {offsets = [0, 18], sizes = [8, 1258], strides = [1, 1]} : vector<8x1296xbf16> to vector<8x1258xbf16>
    %12 = vector.extract_strided_slice %7 {offsets = [0, 19], sizes = [8, 1258], strides = [1, 1]} : vector<8x1296xbf16> to vector<8x1258xbf16>
    %13 = vector.extract_strided_slice %7 {offsets = [0, 20], sizes = [8, 1258], strides = [1, 1]} : vector<8x1296xbf16> to vector<8x1258xbf16>
    %14 = vector.extract_strided_slice %7 {offsets = [0, 36], sizes = [8, 1258], strides = [1, 1]} : vector<8x1296xbf16> to vector<8x1258xbf16>
    %15 = vector.extract_strided_slice %7 {offsets = [0, 37], sizes = [8, 1258], strides = [1, 1]} : vector<8x1296xbf16> to vector<8x1258xbf16>
    %16 = vector.extract_strided_slice %7 {offsets = [0, 38], sizes = [8, 1258], strides = [1, 1]} : vector<8x1296xbf16> to vector<8x1258xbf16>
    %17 = tpu.concatenate %8, %9, %10, %11, %12, %13, %14, %15, %16 in 0 : vector<8x1258xbf16>, vector<8x1258xbf16>, vector<8x1258xbf16>, vector<8x1258xbf16>, vector<8x1258xbf16>, vector<8x1258xbf16>, vector<8x1258xbf16>, vector<8x1258xbf16>, vector<8x1258xbf16> -> vector<72x1258xbf16>
    %c0_10 = arith.constant 0 : index
    %c0_11 = arith.constant 0 : index
    %18 = vector.load %arg4[%c0_10, %c0_11] : memref<8x72xbf16, #tpu.memory_space<vmem>>, vector<8x72xbf16>
    %cst_12 = arith.constant dense<0.000000e+00> : vector<8x1258xf32>
    %19 = tpu.matmul %18, %17, %cst_12 {dimension_numbers = #tpu.dot_dimension_numbers<[1], [0], [0], [1], [0, 0, 1, 1], [], []>} : vector<8x72xbf16>, vector<72x1258xbf16>, vector<8x1258xf32> -> vector<8x1258xf32>
    %c0_13 = arith.constant 0 : index
    %c0_14 = arith.constant 0 : index
    %20 = vector.load %arg5[%c0_13, %c0_14] : memref<8x1xf32, #tpu.memory_space<vmem>>, vector<8x1xf32>
    %21 = vector.broadcast %20 : vector<8x1xf32> to vector<8x1258xf32>
    %22 = arith.addf %19, %21 : vector<8x1258xf32>
    %cst_15 = arith.constant 0.000000e+00 : f32
    %23 = vector.broadcast %cst_15 : f32 to vector<8x1258xf32>
    %24 = arith.maximumf %22, %23 : vector<8x1258xf32>
    %25 = arith.mulf %24, %24 : vector<8x1258xf32>
    %26 = tpu.concatenate %24, %25 in 0 : vector<8x1258xf32>, vector<8x1258xf32> -> vector<16x1258xf32>
    %cst_16 = arith.constant dense<0.000000e+00> : vector<16x4xf32>
    %27 = tpu.matmul %26, %0, %cst_16 {dimension_numbers = #tpu.dot_dimension_numbers<[1], [0], [0], [1], [0, 0, 1, 1], [], []>} : vector<16x1258xf32>, vector<1258x4xf32>, vector<16x4xf32> -> vector<16x4xf32>
    %28 = vector.extract_strided_slice %27 {offsets = [0, 0], sizes = [8, 4], strides = [1, 1]} : vector<16x4xf32> to vector<8x4xf32>
    %cst_17 = arith.constant 3.906250e-03 : f32
    %29 = vector.broadcast %cst_17 : f32 to vector<8x4xf32>
    %30 = arith.mulf %28, %29 : vector<8x4xf32>
    %31 = vector.extract_strided_slice %27 {offsets = [8, 0], sizes = [8, 4], strides = [1, 1]} : vector<16x4xf32> to vector<8x4xf32>
    %cst_18 = arith.constant 3.906250e-03 : f32
    %32 = vector.broadcast %cst_18 : f32 to vector<8x4xf32>
    %33 = arith.mulf %31, %32 : vector<8x4xf32>
    %34 = arith.mulf %30, %30 : vector<8x4xf32>
    %35 = arith.subf %33, %34 : vector<8x4xf32>
    %cst_19 = arith.constant 9.99999974E-6 : f32
    %36 = vector.broadcast %cst_19 : f32 to vector<8x4xf32>
    %37 = arith.addf %35, %36 : vector<8x4xf32>
    %38 = math.rsqrt %37 : vector<8x4xf32>
    %39 = arith.mulf %30, %38 : vector<8x4xf32>
    %40 = tpu.concatenate %38, %39 in 0 : vector<8x4xf32>, vector<8x4xf32> -> vector<16x4xf32>
    %cst_20 = arith.constant dense<0.000000e+00> : vector<16x1258xf32>
    %41 = tpu.matmul %40, %1, %cst_20 {dimension_numbers = #tpu.dot_dimension_numbers<[1], [0], [0], [1], [0, 0, 1, 1], [], []>} : vector<16x4xf32>, vector<4x1258xf32>, vector<16x1258xf32> -> vector<16x1258xf32>
    %42 = vector.extract_strided_slice %41 {offsets = [0, 0], sizes = [8, 1258], strides = [1, 1]} : vector<16x1258xf32> to vector<8x1258xf32>
    %43 = arith.mulf %24, %42 : vector<8x1258xf32>
    %44 = vector.extract_strided_slice %41 {offsets = [8, 0], sizes = [8, 1258], strides = [1, 1]} : vector<16x1258xf32> to vector<8x1258xf32>
    %45 = arith.subf %43, %44 : vector<8x1258xf32>
    %46 = arith.truncf %45 : vector<8x1258xf32> to vector<8x1258xbf16>
    %c0_21 = arith.constant 0 : index
    %c19 = arith.constant 19 : index
    %47 = vector.load %arg13[%c0_21, %c19] : memref<8x1296xbf16, #tpu.memory_space<vmem>>, vector<8x1258xbf16>
    tpu.vector_store %arg13[%c0_21, %c19], %46 {strides = array<i32>} : memref<8x1296xbf16, #tpu.memory_space<vmem>>, vector<8x1258xbf16>,
    %c0_22 = arith.constant 0 : index
    %c0_23 = arith.constant 0 : index
    %48 = vector.load %arg13[%c0_22, %c0_23] : memref<8x1296xbf16, #tpu.memory_space<vmem>>, vector<8x1296xbf16>
    %49 = vector.extract_strided_slice %48 {offsets = [0, 0], sizes = [8, 1258], strides = [1, 1]} : vector<8x1296xbf16> to vector<8x1258xbf16>
    %50 = vector.extract_strided_slice %48 {offsets = [0, 1], sizes = [8, 1258], strides = [1, 1]} : vector<8x1296xbf16> to vector<8x1258xbf16>
    %51 = vector.extract_strided_slice %48 {offsets = [0, 2], sizes = [8, 1258], strides = [1, 1]} : vector<8x1296xbf16> to vector<8x1258xbf16>
    %52 = vector.extract_strided_slice %48 {offsets = [0, 18], sizes = [8, 1258], strides = [1, 1]} : vector<8x1296xbf16> to vector<8x1258xbf16>
    %53 = vector.extract_strided_slice %48 {offsets = [0, 19], sizes = [8, 1258], strides = [1, 1]} : vector<8x1296xbf16> to vector<8x1258xbf16>
    %54 = vector.extract_strided_slice %48 {offsets = [0, 20], sizes = [8, 1258], strides = [1, 1]} : vector<8x1296xbf16> to vector<8x1258xbf16>
    %55 = vector.extract_strided_slice %48 {offsets = [0, 36], sizes = [8, 1258], strides = [1, 1]} : vector<8x1296xbf16> to vector<8x1258xbf16>
    %56 = vector.extract_strided_slice %48 {offsets = [0, 37], sizes = [8, 1258], strides = [1, 1]} : vector<8x1296xbf16> to vector<8x1258xbf16>
    %57 = vector.extract_strided_slice %48 {offsets = [0, 38], sizes = [8, 1258], strides = [1, 1]} : vector<8x1296xbf16> to vector<8x1258xbf16>
    %58 = tpu.concatenate %49, %50, %51, %52, %53, %54, %55, %56, %57 in 0 : vector<8x1258xbf16>, vector<8x1258xbf16>, vector<8x1258xbf16>, vector<8x1258xbf16>, vector<8x1258xbf16>, vector<8x1258xbf16>, vector<8x1258xbf16>, vector<8x1258xbf16>, vector<8x1258xbf16> -> vector<72x1258xbf16>
    %c0_24 = arith.constant 0 : index
    %c0_25 = arith.constant 0 : index
    %59 = vector.load %arg6[%c0_24, %c0_25] : memref<8x72xbf16, #tpu.memory_space<vmem>>, vector<8x72xbf16>
    %cst_26 = arith.constant dense<0.000000e+00> : vector<8x1258xf32>
    %60 = tpu.matmul %59, %58, %cst_26 {dimension_numbers = #tpu.dot_dimension_numbers<[1], [0], [0], [1], [0, 0, 1, 1], [], []>} : vector<8x72xbf16>, vector<72x1258xbf16>, vector<8x1258xf32> -> vector<8x1258xf32>
    %c0_27 = arith.constant 0 : index
    %c0_28 = arith.constant 0 : index
    %61 = vector.load %arg7[%c0_27, %c0_28] : memref<8x1xf32, #tpu.memory_space<vmem>>, vector<8x1xf32>
    %62 = vector.broadcast %61 : vector<8x1xf32> to vector<8x1258xf32>
    %63 = arith.addf %60, %62 : vector<8x1258xf32>
    %cst_29 = arith.constant 0.000000e+00 : f32
    %64 = vector.broadcast %cst_29 : f32 to vector<8x1258xf32>
    %65 = arith.maximumf %63, %64 : vector<8x1258xf32>
    %66 = arith.mulf %65, %65 : vector<8x1258xf32>
    %67 = tpu.concatenate %65, %66 in 0 : vector<8x1258xf32>, vector<8x1258xf32> -> vector<16x1258xf32>
    %cst_30 = arith.constant dense<0.000000e+00> : vector<16x4xf32>
    %68 = tpu.matmul %67, %0, %cst_30 {dimension_numbers = #tpu.dot_dimension_numbers<[1], [0], [0], [1], [0, 0, 1, 1], [], []>} : vector<16x1258xf32>, vector<1258x4xf32>, vector<16x4xf32> -> vector<16x4xf32>
    %69 = vector.extract_strided_slice %68 {offsets = [0, 0], sizes = [8, 4], strides = [1, 1]} : vector<16x4xf32> to vector<8x4xf32>
    %cst_31 = arith.constant 3.906250e-03 : f32
    %70 = vector.broadcast %cst_31 : f32 to vector<8x4xf32>
    %71 = arith.mulf %69, %70 : vector<8x4xf32>
    %72 = vector.extract_strided_slice %68 {offsets = [8, 0], sizes = [8, 4], strides = [1, 1]} : vector<16x4xf32> to vector<8x4xf32>
    %cst_32 = arith.constant 3.906250e-03 : f32
    %73 = vector.broadcast %cst_32 : f32 to vector<8x4xf32>
    %74 = arith.mulf %72, %73 : vector<8x4xf32>
    %75 = arith.mulf %71, %71 : vector<8x4xf32>
    %76 = arith.subf %74, %75 : vector<8x4xf32>
    %cst_33 = arith.constant 9.99999974E-6 : f32
    %77 = vector.broadcast %cst_33 : f32 to vector<8x4xf32>
    %78 = arith.addf %76, %77 : vector<8x4xf32>
    %79 = math.rsqrt %78 : vector<8x4xf32>
    %80 = arith.mulf %71, %79 : vector<8x4xf32>
    %81 = tpu.concatenate %79, %80 in 0 : vector<8x4xf32>, vector<8x4xf32> -> vector<16x4xf32>
    %cst_34 = arith.constant dense<0.000000e+00> : vector<16x1258xf32>
    %82 = tpu.matmul %81, %1, %cst_34 {dimension_numbers = #tpu.dot_dimension_numbers<[1], [0], [0], [1], [0, 0, 1, 1], [], []>} : vector<16x4xf32>, vector<4x1258xf32>, vector<16x1258xf32> -> vector<16x1258xf32>
    %83 = vector.extract_strided_slice %82 {offsets = [0, 0], sizes = [8, 1258], strides = [1, 1]} : vector<16x1258xf32> to vector<8x1258xf32>
    %84 = arith.mulf %65, %83 : vector<8x1258xf32>
    %85 = vector.extract_strided_slice %82 {offsets = [8, 0], sizes = [8, 1258], strides = [1, 1]} : vector<16x1258xf32> to vector<8x1258xf32>
    %86 = arith.subf %84, %85 : vector<8x1258xf32>
    %87 = arith.truncf %86 : vector<8x1258xf32> to vector<8x1258xbf16>
    %c0_35 = arith.constant 0 : index
    %c19_36 = arith.constant 19 : index
    %88 = vector.load %arg13[%c0_35, %c19_36] : memref<8x1296xbf16, #tpu.memory_space<vmem>>, vector<8x1258xbf16>
    tpu.vector_store %arg13[%c0_35, %c19_36], %87 {strides = array<i32>} : memref<8x1296xbf16, #tpu.memory_space<vmem>>, vector<8x1258xbf16>,
    %c0_37 = arith.constant 0 : index
    %c0_38 = arith.constant 0 : index
    %89 = vector.load %arg13[%c0_37, %c0_38] : memref<8x1296xbf16, #tpu.memory_space<vmem>>, vector<8x1296xbf16>
    %90 = vector.extract_strided_slice %89 {offsets = [0, 0], sizes = [8, 1258], strides = [1, 1]} : vector<8x1296xbf16> to vector<8x1258xbf16>
    %91 = vector.extract_strided_slice %89 {offsets = [0, 1], sizes = [8, 1258], strides = [1, 1]} : vector<8x1296xbf16> to vector<8x1258xbf16>
    %92 = vector.extract_strided_slice %89 {offsets = [0, 2], sizes = [8, 1258], strides = [1, 1]} : vector<8x1296xbf16> to vector<8x1258xbf16>
    %93 = vector.extract_strided_slice %89 {offsets = [0, 18], sizes = [8, 1258], strides = [1, 1]} : vector<8x1296xbf16> to vector<8x1258xbf16>
    %94 = vector.extract_strided_slice %89 {offsets = [0, 19], sizes = [8, 1258], strides = [1, 1]} : vector<8x1296xbf16> to vector<8x1258xbf16>
    %95 = vector.extract_strided_slice %89 {offsets = [0, 20], sizes = [8, 1258], strides = [1, 1]} : vector<8x1296xbf16> to vector<8x1258xbf16>
    %96 = vector.extract_strided_slice %89 {offsets = [0, 36], sizes = [8, 1258], strides = [1, 1]} : vector<8x1296xbf16> to vector<8x1258xbf16>
    %97 = vector.extract_strided_slice %89 {offsets = [0, 37], sizes = [8, 1258], strides = [1, 1]} : vector<8x1296xbf16> to vector<8x1258xbf16>
    %98 = vector.extract_strided_slice %89 {offsets = [0, 38], sizes = [8, 1258], strides = [1, 1]} : vector<8x1296xbf16> to vector<8x1258xbf16>
    %99 = tpu.concatenate %90, %91, %92, %93, %94, %95, %96, %97, %98 in 0 : vector<8x1258xbf16>, vector<8x1258xbf16>, vector<8x1258xbf16>, vector<8x1258xbf16>, vector<8x1258xbf16>, vector<8x1258xbf16>, vector<8x1258xbf16>, vector<8x1258xbf16>, vector<8x1258xbf16> -> vector<72x1258xbf16>
    %c0_39 = arith.constant 0 : index
    %c0_40 = arith.constant 0 : index
    %100 = vector.load %arg8[%c0_39, %c0_40] : memref<8x72xbf16, #tpu.memory_space<vmem>>, vector<8x72xbf16>
    %cst_41 = arith.constant dense<0.000000e+00> : vector<8x1258xf32>
    %101 = tpu.matmul %100, %99, %cst_41 {dimension_numbers = #tpu.dot_dimension_numbers<[1], [0], [0], [1], [0, 0, 1, 1], [], []>} : vector<8x72xbf16>, vector<72x1258xbf16>, vector<8x1258xf32> -> vector<8x1258xf32>
    %c0_42 = arith.constant 0 : index
    %c0_43 = arith.constant 0 : index
    %102 = vector.load %arg9[%c0_42, %c0_43] : memref<8x1xf32, #tpu.memory_space<vmem>>, vector<8x1xf32>
    %103 = vector.broadcast %102 : vector<8x1xf32> to vector<8x1258xf32>
    %104 = arith.addf %101, %103 : vector<8x1258xf32>
    %cst_44 = arith.constant 0.000000e+00 : f32
    %105 = vector.broadcast %cst_44 : f32 to vector<8x1258xf32>
    %106 = arith.maximumf %104, %105 : vector<8x1258xf32>
    %107 = arith.mulf %106, %106 : vector<8x1258xf32>
    %108 = tpu.concatenate %106, %107 in 0 : vector<8x1258xf32>, vector<8x1258xf32> -> vector<16x1258xf32>
    %cst_45 = arith.constant dense<0.000000e+00> : vector<16x4xf32>
    %109 = tpu.matmul %108, %0, %cst_45 {dimension_numbers = #tpu.dot_dimension_numbers<[1], [0], [0], [1], [0, 0, 1, 1], [], []>} : vector<16x1258xf32>, vector<1258x4xf32>, vector<16x4xf32> -> vector<16x4xf32>
    %110 = vector.extract_strided_slice %109 {offsets = [0, 0], sizes = [8, 4], strides = [1, 1]} : vector<16x4xf32> to vector<8x4xf32>
    %cst_46 = arith.constant 3.906250e-03 : f32
    %111 = vector.broadcast %cst_46 : f32 to vector<8x4xf32>
    %112 = arith.mulf %110, %111 : vector<8x4xf32>
    %113 = vector.extract_strided_slice %109 {offsets = [8, 0], sizes = [8, 4], strides = [1, 1]} : vector<16x4xf32> to vector<8x4xf32>
    %cst_47 = arith.constant 3.906250e-03 : f32
    %114 = vector.broadcast %cst_47 : f32 to vector<8x4xf32>
    %115 = arith.mulf %113, %114 : vector<8x4xf32>
    %116 = arith.mulf %112, %112 : vector<8x4xf32>
    %117 = arith.subf %115, %116 : vector<8x4xf32>
    %cst_48 = arith.constant 9.99999974E-6 : f32
    %118 = vector.broadcast %cst_48 : f32 to vector<8x4xf32>
    %119 = arith.addf %117, %118 : vector<8x4xf32>
    %120 = math.rsqrt %119 : vector<8x4xf32>
    %121 = arith.mulf %112, %120 : vector<8x4xf32>
    %122 = tpu.concatenate %120, %121 in 0 : vector<8x4xf32>, vector<8x4xf32> -> vector<16x4xf32>
    %cst_49 = arith.constant dense<0.000000e+00> : vector<16x1258xf32>
    %123 = tpu.matmul %122, %1, %cst_49 {dimension_numbers = #tpu.dot_dimension_numbers<[1], [0], [0], [1], [0, 0, 1, 1], [], []>} : vector<16x4xf32>, vector<4x1258xf32>, vector<16x1258xf32> -> vector<16x1258xf32>
    %124 = vector.extract_strided_slice %123 {offsets = [0, 0], sizes = [8, 1258], strides = [1, 1]} : vector<16x1258xf32> to vector<8x1258xf32>
    %125 = arith.mulf %106, %124 : vector<8x1258xf32>
    %126 = vector.extract_strided_slice %123 {offsets = [8, 0], sizes = [8, 1258], strides = [1, 1]} : vector<16x1258xf32> to vector<8x1258xf32>
    %127 = arith.subf %125, %126 : vector<8x1258xf32>
    %128 = arith.addf %45, %127 : vector<8x1258xf32>
    %c0_50 = arith.constant 0 : index
    %c0_51 = arith.constant 0 : index
    %129 = vector.load %arg10[%c0_50, %c0_51] : memref<8x1xf32, #tpu.memory_space<vmem>>, vector<8x1xf32>
    %130 = vector.broadcast %129 : vector<8x1xf32> to vector<8x1258xf32>
    %131 = arith.mulf %128, %130 : vector<8x1258xf32>
    %cst_52 = arith.constant dense<0.000000e+00> : vector<1258xf32>
    %132 = vector.multi_reduction <add>, %131, %cst_52 [0] : vector<8x1258xf32> to vector<1258xf32>
    %133 = vector.shape_cast %132 : vector<1258xf32> to vector<1x1258xf32>
    %c0_53 = arith.constant 0 : index
    %c0_54 = arith.constant 0 : index
    %134 = vector.load %arg11[%c0_53, %c0_54] : memref<1x1xf32, #tpu.memory_space<vmem>>, vector<1x1xf32>
    %135 = vector.broadcast %134 : vector<1x1xf32> to vector<1x1258xf32>
    %136 = arith.addf %133, %135 : vector<1x1258xf32>
    %cst_55 = arith.constant 2.500000e-01 : f32
    %137 = vector.broadcast %cst_55 : f32 to vector<1x1258xf32>
    %138 = arith.subf %136, %137 : vector<1x1258xf32>
    %139 = arith.negf %138 : vector<1x1258xf32>
    %140 = math.exp %139 : vector<1x1258xf32>
    %cst_56 = arith.constant 1.000000e+00 : f32
    %141 = vector.broadcast %cst_56 : f32 to vector<1x1258xf32>
    %142 = arith.addf %141, %140 : vector<1x1258xf32>
    %143 = arith.divf %141, %142 : vector<1x1258xf32>
    %c0_57 = arith.constant 0 : index
    %c0_58 = arith.constant 0 : index
    %c0_59 = arith.constant 0 : index
    %144 = vector.load %arg12[%c0_57, %c0_58, %c0_59] : memref<1x1x1258xf32, #tpu.memory_space<vmem>>, vector<1x1x1258xf32>
    %145 = vector.shape_cast %144 : vector<1x1x1258xf32> to vector<1x1258xf32>
    %146 = vector.shape_cast %143 : vector<1x1258xf32> to vector<1x1x1258xf32>
    tpu.vector_store %arg12[%c0_57, %c0_58, %c0_59], %146 {strides = array<i32>} : memref<1x1x1258xf32, #tpu.memory_space<vmem>>, vector<1x1x1258xf32>,
    return
  }
  func.func @transform_0(%arg0: i32) -> (i32, i32, i32) {
    %c0_i32 = arith.constant 0 : i32
    %c0_i32_0 = arith.constant 0 : i32
    %c0_i32_1 = arith.constant 0 : i32
    return %arg0, %c0_i32, %c0_i32_0 : i32, i32, i32
  }
  func.func @transform_1(%arg0: i32) -> (i32, i32) {
    %c0_i32 = arith.constant 0 : i32
    %c0_i32_0 = arith.constant 0 : i32
    %c0_i32_1 = arith.constant 0 : i32
    return %c0_i32, %c0_i32_0 : i32, i32
  }
  func.func @transform_2(%arg0: i32) -> (i32, i32) {
    %c0_i32 = arith.constant 0 : i32
    %c0_i32_0 = arith.constant 0 : i32
    %c0_i32_1 = arith.constant 0 : i32
    return %c0_i32, %c0_i32_0 : i32, i32
  }
  func.func @transform_3(%arg0: i32) -> (i32, i32) {
    %c0_i32 = arith.constant 0 : i32
    %c0_i32_0 = arith.constant 0 : i32
    %c0_i32_1 = arith.constant 0 : i32
    return %c0_i32, %c0_i32_0 : i32, i32
  }
  func.func @transform_4(%arg0: i32) -> (i32, i32) {
    %c0_i32 = arith.constant 0 : i32
    %c0_i32_0 = arith.constant 0 : i32
    %c0_i32_1 = arith.constant 0 : i32
    return %c0_i32, %c0_i32_0 : i32, i32
  }
  func.func @transform_5(%arg0: i32) -> (i32, i32) {
    %c0_i32 = arith.constant 0 : i32
    %c0_i32_0 = arith.constant 0 : i32
    %c0_i32_1 = arith.constant 0 : i32
    return %c0_i32, %c0_i32_0 : i32, i32
  }
  func.func @transform_6(%arg0: i32) -> (i32, i32) {
    %c0_i32 = arith.constant 0 : i32
    %c0_i32_0 = arith.constant 0 : i32
    %c0_i32_1 = arith.constant 0 : i32
    return %c0_i32, %c0_i32_0 : i32, i32
  }
  func.func @transform_7(%arg0: i32) -> (i32, i32) {
    %c0_i32 = arith.constant 0 : i32
    %c0_i32_0 = arith.constant 0 : i32
    %c0_i32_1 = arith.constant 0 : i32
    return %c0_i32, %c0_i32_0 : i32, i32
  }
  func.func @transform_8(%arg0: i32) -> (i32, i32) {
    %c0_i32 = arith.constant 0 : i32
    %c0_i32_0 = arith.constant 0 : i32
    %c0_i32_1 = arith.constant 0 : i32
    return %c0_i32, %c0_i32_0 : i32, i32
  }
  func.func @transform_9(%arg0: i32) -> (i32, i32) {
    %c0_i32 = arith.constant 0 : i32
    %c0_i32_0 = arith.constant 0 : i32
    %c0_i32_1 = arith.constant 0 : i32
    return %c0_i32, %c0_i32_0 : i32, i32
  }
  func.func @transform_10(%arg0: i32) -> (i32, i32) {
    %c0_i32 = arith.constant 0 : i32
    %c0_i32_0 = arith.constant 0 : i32
    %c0_i32_1 = arith.constant 0 : i32
    return %c0_i32, %c0_i32_0 : i32, i32
  }
  func.func @transform_11(%arg0: i32) -> (i32, i32, i32) {
    %c0_i32 = arith.constant 0 : i32
    %c0_i32_0 = arith.constant 0 : i32
    %c0_i32_1 = arith.constant 0 : i32
    return %arg0, %c0_i32, %c0_i32_0 : i32, i32, i32
  }
}

</mosaic_0001>

<bundles_post_ra>
// kernel: out_forward.1
= control target key start
LH: loop header
LB: loop body
LE: loop exit
PB: predicated region body
PF: predicated region fallthrough
CT: control target
= control target key end

     0   :  { %s6698_s19 = smov 0   ;;  %s10012_s0 = inlined_call_operand.vmem [shape: bf16[2,8,1296], index: 0, kind: input, shape index: {}]   ;;  %s10013_s1 = inlined_call_operand.vmem [shape: f32[1258,4], index: 1, kind: input, shape index: {}]   ;;  %s10014_s2 = inlined_call_operand.vmem [shape: f32[4,1258], index: 2, kind: input, shape index: {}]   ;;  %s10015_s3 = inlined_call_operand.vmem [shape: bf16[8,72], index: 3, kind: input, shape index: {}]   ;;  %s10016_s4 = inlined_call_operand.vmem [shape: f32[8,1], index: 4, kind: input, shape index: {}]   ;;  %s10017_s5 = inlined_call_operand.vmem [shape: bf16[8,72], index: 5, kind: input, shape index: {}]   ;;  %s10018_s6 = inlined_call_operand.vmem [shape: f32[8,1], index: 6, kind: input, shape index: {}]   ;;  %s10019_s7 = inlined_call_operand.vmem [shape: bf16[8,72], index: 7, kind: input, shape index: {}]   ;;  %s10020_s8 = inlined_call_operand.vmem [shape: f32[8,1], index: 8, kind: input, shape index: {}]   ;;  %s10021_s9 = inlined_call_operand.vmem [shape: f32[8,1], index: 9, kind: input, shape index: {}]   ;;  %s10022_s10 = inlined_call_operand.<no memory space> [shape: f32[1,1], index: 10, kind: input, shape index: {}]   ;;  %s10023_s11 = inlined_call_operand.vmem [shape: f32[2,1,1258], index: 11, kind: output, shape index: {}]  }
   0x1   :  { %v16_v0 = vstv %s10022_s10 }
   0x2   :  { %17 = vst [vmem:[#allocation3] sm:$0x1] %v16_v0 }
   0x3 LB: > { %s5557_s20 = sadd.s32 4294967295, %s6621_s19   ;;  %p5561_p0 = scmp.ge.s32.totalorder %s6621_s19, 1  ;;  %s6621_s19 = sphi %s6698_s19, %s23_s19  }
   0x4   : > { %p339_p1 = scmp.lt.s32.totalorder %s6621_s19, 3 }
   0x6   : > { %p340_p2 = pnand %p5561_p0, %p339_p1 }
   0x7   : > { %p378_p3 = scmp.lt.s32.totalorder (!%p340_p2), %s5557_s20, 1  ;;  %s6623_s24 = smov (!%p340_p2), 90  }
   0x8   : > { %343 = sbr.rel (%p340_p2) target bundleno = 3095 (0xc17), region = 64  ;;  %s6624_s25 = smov (!%p340_p2), 92  }
   0x9   : > { %s6625_s26 = smov (!%p340_p2), 91   ;;  %s6626_s27 = smov (!%p340_p2), 109  }
   0xa   : > { %s6627_s28 = smov (!%p340_p2), 108   ;;  %s10025_s29 = smov (!%p340_p2), 126  }
   0xb   : > { %s6629_s30 = smov (!%p340_p2), 110   ;;  %s6631_s12 = smov (!%p340_p2), 127  }
   0xc   : > { %s6633_s13 = smov (!%p340_p2), 19  }
   0xd   : > { %s10064_s20 = smov (!%p378_p3, %s5557_s20), 1  ;;  %v6630_v6 = vmov 0   ;;  %vm829_vm0 = vcmask 736256   ;;  %vm840_vm1 = vcmask 1043456   ;;  %vm763_vm2 = vcmask 752640  }
   0xe   : > { %s6193_s10 = smul.u32 44, %s10064_s20  ;;  %1074 = vmatprep.mubr.bf16.mxu0 %v6630_v6  ;;  %1115 = vmatprep.mubr.bf16.mxu1 %v6630_v6  ;;  %vm796_vm3 = vcmask 744448   ;;  %vm698_vm4 = vcmask 891904   ;;  %vm728_vm5 = vcmask 883712   ;;  %vm638_vm6 = vcmask 1031168  }
   0xf   : > { %6215 = vset.pattern.permute.xlu1 %v6630_v6  ;;  %6216 = vset.pattern.permute.xlu0 %v6630_v6  ;;  %vm668_vm7 = vcmask 900096   ;;  %vm608_vm8 = vcmask 1039360   ;;  %vm10029_vm9 = vcmask 588800   ;;  %vm10028_vm10 = vcmask 1041408   ;;  %s6194_s17 = smul.u32 10, %s10064_s20 }
  0x10   : > { %s6712_s23 = scalar_lea.vmem %s10012_s0, %s6193_s10  ;;  %vm10027_vm11 = vcmask 867328   ;;  %vm10024_vm12 = vcmask 31744   ;;  %vm551_vm13 = vcmask 150528   ;;  %vm553_vm14 = vcmask 1044456  }
  0x11   : > { %v6715_v1 = vld [vmem:[%s6712_s23 + $0x8] sm:$0xff]  ;;  %v557_v2 = vld [vmem:[%s6712_s23] sm:$0xff]  ;;  %v559_v7 = vld [vmem:[%s6712_s23 + $0x10] sm:$0xff]  ;;  %552 = vst.msk [vmem:[#allocation2] sm:$0xf] %vm551_vm13, %v6630_v6  ;;  %vm554_vm15 = vcmask 130052   ;;  %s386_s21 = scalar_lea.vmem %s10023_s11, %s6194_s17 }
  0x12   : > { %v6720_v3 = vcombine.low %v6715_v1, %v6715_v1  ;;  %v6722_v4 = vcombine.low %v557_v2, %v557_v2  ;;  %v6728_v5 = vcombine.high %v557_v2, %v557_v2  ;;  %v6779_v8 = vcombine.high %v559_v7, %v559_v7  ;;  %v560_v10 = vld [vmem:[%s6712_s23 + $0x18] sm:$0xff]  ;;  %v561_v13 = vld [vmem:[%s6712_s23 + $0x20] sm:$0xff]  ;;  %v6226_v23 = vld [vmem:[%s6712_s23 + $0x28] ss:$0 sps:$4 sm:$0xff]  }
  0x13   : > { %v6781_v9 = vcombine.low %v559_v7, %v559_v7  ;;  %v6788_v11 = vcombine.low %v560_v10, %v560_v10  ;;  %v6836_v12 = vcombine.high %v6715_v1, %v6715_v1  ;;  %v6855_v14 = vcombine.low %v561_v13, %v561_v13  ;;  %v1002_v7 = vld [vmem:[%s10016_s4] sm:$0xff]  ;;  %vm555_vm13 = vmor %vm554_vm15, %vm553_vm14 }
  0x14   : > { %811 = vrot.lane.b32.xlu1 %v6720_v3, %s6623_s24  ;;  %807 = vrot.lane.b32.xlu0 %v6722_v4, %s6623_s24  ;;  %v6857_v15 = vcombine.high %v560_v10, %v560_v10  ;;  %v6878_v24 = vcombine.high %v561_v13, %v561_v13  ;;  %556 = vst.msk [vmem:[#allocation2 + $0x24] sm:$0xff] %vm555_vm13, %v6630_v6  ;;  %vm2168_vm14 = vcmask 1043608   ;;  %vm2169_vm15 = vcmask 1047556  }
  0x15   : > { %vm2152_vm13 = vcmask 154624  }
  0x18   : > { %743 = vrot.lane.b32.xlu1 %v6728_v5, %s6624_s25  ;;  %809 = vrot.lane.b32.xlu0 %v6728_v5, %s6623_s24 }
  0x1c   : > { %776 = vrot.lane.b32.xlu1 %v6728_v5, %s6625_s26  ;;  %745 = vrot.lane.b32.xlu0 %v6720_v3, %s6624_s25 }
  0x20   : > { %741 = vrot.lane.b32.xlu1 %v6722_v4, %s6624_s25  ;;  %778 = vrot.lane.b32.xlu0 %v6720_v3, %s6625_s26 }
  0x24   : > { %680 = vrot.lane.b32.xlu1 %v6728_v5, %s6626_s27  ;;  %774 = vrot.lane.b32.xlu0 %v6722_v4, %s6625_s26 }
  0x28   : > { %710 = vrot.lane.b32.xlu1 %v6728_v5, %s6627_s28  ;;  %682 = vrot.lane.b32.xlu0 %v6720_v3, %s6626_s27 }
  0x2c   : > { %678 = vrot.lane.b32.xlu1 %v6722_v4, %s6626_s27  ;;  %712 = vrot.lane.b32.xlu0 %v6720_v3, %s6627_s28 }
  0x30   : > { %620 = vrot.lane.b32.xlu1 %v6728_v5, %s10025_s29  ;;  %708 = vrot.lane.b32.xlu0 %v6722_v4, %s6627_s28 }
  0x34   : > { %650 = vrot.lane.b32.xlu1 %v6728_v5, %s6629_s30  ;;  %622 = vrot.lane.b32.xlu0 %v6720_v3, %s10025_s29 }
  0x38   : > { %618 = vrot.lane.b32.xlu1 %v6722_v4, %s10025_s29  ;;  %652 = vrot.lane.b32.xlu0 %v6720_v3, %s6629_s30 }
  0x3c   : > { %590 = vrot.lane.b32.xlu1 %v6728_v5, %s6631_s12  ;;  %648 = vrot.lane.b32.xlu0 %v6722_v4, %s6629_s30 }
  0x40   : > { %588 = vrot.lane.b32.xlu1 %v6722_v4, %s6631_s12  ;;  %592 = vrot.lane.b32.xlu0 %v6720_v3, %s6631_s12 }
  0x44   : > { %817 = vrot.lane.b32.xlu1 %v6779_v8, %s6623_s24  ;;  %815 = vrot.lane.b32.xlu0 %v6781_v9, %s6623_s24 }
  0x48   : > { %751 = vrot.lane.b32.xlu1 %v6779_v8, %s6624_s25  ;;  %819 = vrot.lane.b32.xlu0 %v6788_v11, %s6623_s24 }
  0x4c   : > { %784 = vrot.lane.b32.xlu1 %v6779_v8, %s6625_s26  ;;  %753 = vrot.lane.b32.xlu0 %v6788_v11, %s6624_s25 }
  0x50   : > { %749 = vrot.lane.b32.xlu1 %v6781_v9, %s6624_s25  ;;  %786 = vrot.lane.b32.xlu0 %v6788_v11, %s6625_s26 }
  0x54   : > { %688 = vrot.lane.b32.xlu1 %v6779_v8, %s6626_s27  ;;  %782 = vrot.lane.b32.xlu0 %v6781_v9, %s6625_s26 }
  0x58   : > { %718 = vrot.lane.b32.xlu1 %v6779_v8, %s6627_s28  ;;  %690 = vrot.lane.b32.xlu0 %v6788_v11, %s6626_s27 }
  0x5c   : > { %686 = vrot.lane.b32.xlu1 %v6781_v9, %s6626_s27  ;;  %720 = vrot.lane.b32.xlu0 %v6788_v11, %s6627_s28 }
  0x60   : > { %628 = vrot.lane.b32.xlu1 %v6779_v8, %s10025_s29  ;;  %716 = vrot.lane.b32.xlu0 %v6781_v9, %s6627_s28 }
  0x64   : > { %658 = vrot.lane.b32.xlu1 %v6779_v8, %s6629_s30  ;;  %630 = vrot.lane.b32.xlu0 %v6788_v11, %s10025_s29 }
  0x68   : > { %626 = vrot.lane.b32.xlu1 %v6781_v9, %s10025_s29  ;;  %660 = vrot.lane.b32.xlu0 %v6788_v11, %s6629_s30 }
  0x6c   : > { %598 = vrot.lane.b32.xlu1 %v6779_v8, %s6631_s12  ;;  %656 = vrot.lane.b32.xlu0 %v6781_v9, %s6629_s30 }
  0x70   : > { %596 = vrot.lane.b32.xlu1 %v6781_v9, %s6631_s12  ;;  %600 = vrot.lane.b32.xlu0 %v6788_v11, %s6631_s12 }
  0x74   : > { %747 = vrot.lane.b32.xlu1 %v6836_v12, %s6624_s25  ;;  %813 = vrot.lane.b32.xlu0 %v6836_v12, %s6623_s24 }
  0x78   : > { %684 = vrot.lane.b32.xlu1 %v6836_v12, %s6626_s27  ;;  %780 = vrot.lane.b32.xlu0 %v6836_v12, %s6625_s26 }
  0x7c   : > { %624 = vrot.lane.b32.xlu1 %v6836_v12, %s10025_s29  ;;  %714 = vrot.lane.b32.xlu0 %v6836_v12, %s6627_s28 }
  0x80   : > { %594 = vrot.lane.b32.xlu1 %v6836_v12, %s6631_s12  ;;  %654 = vrot.lane.b32.xlu0 %v6836_v12, %s6629_s30 }
  0x84   : > { %823 = vrot.lane.b32.xlu1 %v6855_v14, %s6623_s24  ;;  %821 = vrot.lane.b32.xlu0 %v6857_v15, %s6623_s24 }
  0x86   : > { %v6863_v16 = vpop.permute.xlu1 %811  ;;  %v808_v17 = vpop.permute.xlu0 %807 }
  0x88   : > { %757 = vrot.lane.b32.xlu1 %v6855_v14, %s6624_s25  ;;  %755 = vrot.lane.b32.xlu0 %v6857_v15, %s6624_s25 }
  0x8a   : > { %v744_v18 = vpop.permute.xlu1 %743  ;;  %v810_v19 = vpop.permute.xlu0 %809 }
  0x8b   : > { %v831_v20 = vsel %vm829_vm0, %v810_v19, %v6863_v16  ;;  %v830_v21 = vsel %vm829_vm0, %v808_v17, %v810_v19  ;;  %v6971_v17 = vld [vmem:[%s10015_s3] sm:$0xf] }
  0x8c   : > { %790 = vrot.lane.b32.xlu1 %v6855_v14, %s6625_s26  ;;  %788 = vrot.lane.b32.xlu0 %v6857_v15, %s6625_s26  ;;  %v1013_v22 = vsel %vm840_vm1, %v830_v21, 0 }
  0x8d   : > { %5574 = vmatprep.subr.msk.bf16.mxu0 %vm840_vm1, %v831_v20 }
  0x8e   : > { %1049 = vmatpush1.bf16.msra.mxu0 %v1013_v22  ;;  %v777_v25 = vpop.permute.xlu1 %776  ;;  %v6881_v26 = vpop.permute.xlu0 %745 }
  0x8f   : > { %v765_v29 = vsel %vm763_vm2, %v744_v18, %v6881_v26 }
  0x90   : > { %827 = vrot.lane.b32.xlu1 %v6226_v23, %s6623_s24  ;;  %825 = vrot.lane.b32.xlu0 %v6878_v24, %s6623_s24 }
  0x92   : > { %v742_v27 = vpop.permute.xlu1 %741  ;;  %v6886_v28 = vpop.permute.xlu0 %778 }
  0x93   : > { %v798_v30 = vsel %vm796_vm3, %v777_v25, %v6886_v28  ;;  %v764_v34 = vsel %vm763_vm2, %v742_v27, %v744_v18 }
  0x94   : > { %694 = vrot.lane.b32.xlu1 %v6855_v14, %s6626_s27  ;;  %692 = vrot.lane.b32.xlu0 %v6857_v15, %s6626_s27  ;;  %v967_v31 = vsel %vm840_vm1, %v765_v29, %v798_v30 }
  0x95   : > { %1050 = vmatprep.subr.bf16.mxu0 %v967_v31 }
  0x96   : > { %v681_v32 = vpop.permute.xlu1 %680  ;;  %v775_v33 = vpop.permute.xlu0 %774 }
  0x97   : > { %v797_v35 = vsel %vm796_vm3, %v775_v33, %v777_v25 }
  0x98   : > { %724 = vrot.lane.b32.xlu1 %v6855_v14, %s6627_s28  ;;  %722 = vrot.lane.b32.xlu0 %v6857_v15, %s6627_s28  ;;  %v963_v36 = vsel %vm840_vm1, %v764_v34, %v797_v35 }
  0x99   : > { %1051 = vmatpush1.bf16.msra.mxu0 %v963_v36 }
  0x9a   : > { %v711_v37 = vpop.permute.xlu1 %710  ;;  %v6904_v38 = vpop.permute.xlu0 %682 }
  0x9b   : > { %v700_v41 = vsel %vm698_vm4, %v681_v32, %v6904_v38 }
  0x9c   : > { %761 = vrot.lane.b32.xlu1 %v6226_v23, %s6624_s25  ;;  %759 = vrot.lane.b32.xlu0 %v6878_v24, %s6624_s25 }
  0x9e   : > { %v679_v39 = vpop.permute.xlu1 %678  ;;  %v6909_v40 = vpop.permute.xlu0 %712 }
  0x9f   : > { %v730_v42 = vsel %vm728_vm5, %v711_v37, %v6909_v40  ;;  %v699_v46 = vsel %vm698_vm4, %v679_v39, %v681_v32 }
  0xa0   : > { %794 = vrot.lane.b32.xlu1 %v6226_v23, %s6625_s26  ;;  %792 = vrot.lane.b32.xlu0 %v6878_v24, %s6625_s26  ;;  %v927_v43 = vsel %vm840_vm1, %v700_v41, %v730_v42 }
  0xa1   : > { %1052 = vmatprep.subr.bf16.mxu0 %v927_v43 }
  0xa2   : > { %v621_v44 = vpop.permute.xlu1 %620  ;;  %v709_v45 = vpop.permute.xlu0 %708 }
  0xa3   : > { %v729_v47 = vsel %vm728_vm5, %v709_v45, %v711_v37 }
  0xa4   : > { %634 = vrot.lane.b32.xlu1 %v6855_v14, %s10025_s29  ;;  %632 = vrot.lane.b32.xlu0 %v6857_v15, %s10025_s29  ;;  %v923_v48 = vsel %vm840_vm1, %v699_v46, %v729_v47 }
  0xa5   : > { %1053 = vmatpush1.bf16.msra.mxu0 %v923_v48 }
  0xa6   : > { %v651_v49 = vpop.permute.xlu1 %650  ;;  %v6926_v50 = vpop.permute.xlu0 %622 }
  0xa7   : > { %v640_v53 = vsel %vm638_vm6, %v621_v44, %v6926_v50 }
  0xa8   : > { %664 = vrot.lane.b32.xlu1 %v6855_v14, %s6629_s30  ;;  %662 = vrot.lane.b32.xlu0 %v6857_v15, %s6629_s30 }
  0xaa   : > { %v619_v51 = vpop.permute.xlu1 %618  ;;  %v6932_v52 = vpop.permute.xlu0 %652 }
  0xab   : > { %v670_v54 = vsel %vm668_vm7, %v651_v49, %v6932_v52  ;;  %v639_v58 = vsel %vm638_vm6, %v619_v51, %v621_v44 }
  0xac   : > { %726 = vrot.lane.b32.xlu1 %v6878_v24, %s6627_s28  ;;  %696 = vrot.lane.b32.xlu0 %v6878_v24, %s6626_s27  ;;  %v887_v55 = vsel %vm840_vm1, %v640_v53, %v670_v54 }
  0xad   : > { %1054 = vmatprep.subr.bf16.mxu0 %v887_v55 }
  0xae   : > { %v591_v56 = vpop.permute.xlu1 %590  ;;  %v649_v57 = vpop.permute.xlu0 %648 }
  0xaf   : > { %v669_v59 = vsel %vm668_vm7, %v649_v57, %v651_v49 }
  0xb0   : > { %604 = vrot.lane.b32.xlu1 %v6855_v14, %s6631_s12  ;;  %602 = vrot.lane.b32.xlu0 %v6857_v15, %s6631_s12  ;;  %v883_v60 = vsel %vm840_vm1, %v639_v58, %v669_v59 }
  0xb1   : > { %1055 = vmatpush1.bf16.msra.mxu0 %v883_v60 }
  0xb2   : > { %v589_v61 = vpop.permute.xlu1 %588  ;;  %v6950_v62 = vpop.permute.xlu0 %592 }
  0xb3   : > { %v609_v63 = vsel %vm608_vm8, %v589_v61, %v591_v56  ;;  %v610_v0 = vsel %vm608_vm8, %v591_v56, %v6950_v62 }
  0xb4   : > { %666 = vrot.lane.b32.xlu1 %v6878_v24, %s6629_s30  ;;  %636 = vrot.lane.b32.xlu0 %v6878_v24, %s10025_s29  ;;  %v847_v1 = vsel %vm840_vm1, %v6728_v5, %v610_v0  ;;  %v843_v2 = vsel %vm840_vm1, %v6722_v4, %v609_v63 }
  0xb5   : > { %1056 = vmatprep.subr.bf16.mxu0 %v847_v1 }
  0xb6   : > { %v818_v10 = vpop.permute.xlu1 %817  ;;  %1057 = vmatpush1.bf16.msra.mxu0 %v843_v2  ;;  %v6966_v13 = vpop.permute.xlu0 %815 }
  0xb7   : > { %v834_v4 = vsel %vm829_vm0, %v6966_v13, %v818_v10 }
  0xb8   : > { %606 = vrot.lane.b32.xlu0 %v6878_v24, %s6631_s12  ;;  %1005 = vperm.xlu1 %6215, %v1002_v7   ;;  %v1025_v20 = vsel %vm840_vm1, %v834_v4, 0 }
  0xb9   : > { %5575 = vmatmul.mubr.msk.bf16.vlgmr.msra.gmra.mxu0 %vm10029_vm9, %v6971_v17 }
  0xba   : > { %v752_v5 = vpop.permute.xlu1 %751  ;;  %v6979_v18 = vpop.permute.xlu0 %819  ;;  %1156 = vmatprep.mubr.bf16.mxu0 %v6630_v6 }
  0xbb   : > { %v835_v19 = vsel %vm829_vm0, %v818_v10, %v6979_v18 }
  0xbc   : > { %5578 = vmatprep.subr.msk.bf16.mxu0 %vm840_vm1, %v835_v19 }
  0xbd   : > { %1131 = vmatpush1.bf16.msra.mxu0 %v1025_v20 }
  0xbe   : > { %v785_v21 = vpop.permute.xlu1 %784  ;;  %v6986_v22 = vpop.permute.xlu0 %753 }
  0xbf   : > { %v769_v27 = vsel %vm763_vm2, %v752_v5, %v6986_v22 }
  0xc2   : > { %v750_v23 = vpop.permute.xlu1 %749  ;;  %v6988_v25 = vpop.permute.xlu0 %786 }
  0xc3   : > { %v802_v29 = vsel %vm796_vm3, %v785_v21, %v6988_v25  ;;  %v768_v33 = vsel %vm763_vm2, %v750_v23, %v752_v5 }
  0xc4   : > { %v983_v30 = vsel %vm840_vm1, %v769_v27, %v802_v29 }
  0xc5   : > { %1132 = vmatprep.subr.bf16.mxu0 %v983_v30 }
  0xc6   : > { %v689_v31 = vpop.permute.xlu1 %688  ;;  %v783_v32 = vpop.permute.xlu0 %782 }
  0xc7   : > { %v801_v34 = vsel %vm796_vm3, %v783_v32, %v785_v21 }
  0xc8   : > { %v979_v35 = vsel %vm840_vm1, %v768_v33, %v801_v34 }
  0xc9   : > { %1133 = vmatpush1.bf16.msra.mxu0 %v979_v35 }
  0xca   : > { %v719_v36 = vpop.permute.xlu1 %718  ;;  %v6998_v37 = vpop.permute.xlu0 %690 }
  0xcb   : > { %v704_v42 = vsel %vm698_vm4, %v689_v31, %v6998_v37 }
  0xce   : > { %v687_v39 = vpop.permute.xlu1 %686  ;;  %v7000_v41 = vpop.permute.xlu0 %720 }
  0xcf   : > { %v734_v43 = vsel %vm728_vm5, %v719_v36, %v7000_v41  ;;  %v703_v47 = vsel %vm698_vm4, %v687_v39, %v689_v31 }
  0xd0   : > { %v943_v44 = vsel %vm840_vm1, %v704_v42, %v734_v43 }
  0xd1   : > { %1134 = vmatprep.subr.bf16.mxu0 %v943_v44 }
  0xd2   : > { %v629_v45 = vpop.permute.xlu1 %628  ;;  %v717_v46 = vpop.permute.xlu0 %716 }
  0xd3   : > { %v733_v48 = vsel %vm728_vm5, %v717_v46, %v719_v36 }
  0xd4   : > { %v939_v49 = vsel %vm840_vm1, %v703_v47, %v733_v48 }
  0xd5   : > { %1135 = vmatpush1.bf16.msra.mxu0 %v939_v49 }
  0xd6   : > { %v659_v51 = vpop.permute.xlu1 %658  ;;  %v7010_v53 = vpop.permute.xlu0 %630 }
  0xd7   : > { %v644_v56 = vsel %vm638_vm6, %v629_v45, %v7010_v53 }
  0xda   : > { %v627_v54 = vpop.permute.xlu1 %626  ;;  %v7012_v55 = vpop.permute.xlu0 %660 }
  0xdb   : > { %v674_v57 = vsel %vm668_vm7, %v659_v51, %v7012_v55  ;;  %v643_v61 = vsel %vm638_vm6, %v627_v54, %v629_v45 }
  0xdc   : > { %v903_v58 = vsel %vm840_vm1, %v644_v56, %v674_v57 }
  0xdd   : > { %1136 = vmatprep.subr.bf16.mxu0 %v903_v58 }
  0xde   : > { %v599_v59 = vpop.permute.xlu1 %598  ;;  %v657_v60 = vpop.permute.xlu0 %656 }
  0xdf   : > { %v673_v63 = vsel %vm668_vm7, %v657_v60, %v659_v51 }
  0xe0   : > { %v899_v0 = vsel %vm840_vm1, %v643_v61, %v673_v63 }
  0xe1   : > { %1137 = vmatpush1.bf16.msra.mxu0 %v899_v0 }
  0xe2   : > { %v597_v1 = vpop.permute.xlu1 %596  ;;  %v7022_v2 = vpop.permute.xlu0 %600 }
  0xe3   : > { %v613_v7 = vsel %vm608_vm8, %v597_v1, %v599_v59  ;;  %v614_v10 = vsel %vm608_vm8, %v599_v59, %v7022_v2 }
  0xe4   : > { %v863_v4 = vsel %vm840_vm1, %v6779_v8, %v614_v10  ;;  %v859_v5 = vsel %vm840_vm1, %v6781_v9, %v613_v7 }
  0xe5   : > { %1138 = vmatprep.subr.bf16.mxu0 %v863_v4 }
  0xe6   : > { %v748_v19 = vpop.permute.xlu1 %747  ;;  %1139 = vmatpush1.bf16.msra.mxu0 %v859_v5  ;;  %v814_v20 = vpop.permute.xlu0 %813 }
  0xe7   : > { %v833_v21 = vsel %vm829_vm0, %v814_v20, %v6966_v13  ;;  %v832_v27 = vsel %vm829_vm0, %v6863_v16, %v814_v20  ;;  %v766_v30 = vsel %vm763_vm2, %v6881_v26, %v748_v19  ;;  %v767_v13 = vsel %vm763_vm2, %v748_v19, %v750_v23 }
  0xe8   : > { %5576 = vmatprep.subr.msk.bf16.mxu1 %vm840_vm1, %v833_v21  ;;  %v1019_v29 = vsel %vm840_vm1, %v832_v27, 0 }
  0xe9   : > { %1090 = vmatpush1.bf16.msra.mxu1 %v1019_v29  ;;  %5579 = vmatmul.mubr.msk.bf16.vlgmr.msra.gmra.mxu0 %vm10029_vm9, %v6971_v17 }
  0xea   : > { %v685_v8 = vpop.permute.xlu1 %684  ;;  %v781_v9 = vpop.permute.xlu0 %780  ;;  %1238 = vmatprep.mubr.bf16.mxu0 %v6630_v6 }
  0xeb   : > { %v799_v16 = vsel %vm796_vm3, %v6886_v28, %v781_v9  ;;  %v800_v31 = vsel %vm796_vm3, %v781_v9, %v783_v32  ;;  %v701_v42 = vsel %vm698_vm4, %v6904_v38, %v685_v8  ;;  %v702_v26 = vsel %vm698_vm4, %v685_v8, %v687_v39 }
  0xec   : > { %v975_v33 = vsel %vm840_vm1, %v767_v13, %v800_v31  ;;  %v971_v34 = vsel %vm840_vm1, %v766_v30, %v799_v16 }
  0xed   : > { %1091 = vmatprep.subr.bf16.mxu1 %v975_v33 }
  0xee   : > { %v625_v35 = vpop.permute.xlu1 %624  ;;  %1092 = vmatpush1.bf16.msra.mxu1 %v971_v34  ;;  %v715_v36 = vpop.permute.xlu0 %714 }
  0xef   : > { %v731_v23 = vsel %vm728_vm5, %v6909_v40, %v715_v36  ;;  %v732_v28 = vsel %vm728_vm5, %v715_v36, %v717_v46  ;;  %v641_v44 = vsel %vm638_vm6, %v6926_v50, %v625_v35  ;;  %v642_v38 = vsel %vm638_vm6, %v625_v35, %v627_v54 }
  0xf0   : > { %v935_v32 = vsel %vm840_vm1, %v702_v26, %v732_v28  ;;  %v931_v43 = vsel %vm840_vm1, %v701_v42, %v731_v23 }
  0xf1   : > { %1093 = vmatprep.subr.bf16.mxu1 %v935_v32 }
  0xf2   : > { %v595_v45 = vpop.permute.xlu1 %594  ;;  %1094 = vmatpush1.bf16.msra.mxu1 %v931_v43  ;;  %v655_v47 = vpop.permute.xlu0 %654 }
  0xf3   : > { %v612_v39 = vsel %vm608_vm8, %v595_v45, %v597_v1  ;;  %v671_v40 = vsel %vm668_vm7, %v6932_v52, %v655_v47  ;;  %v672_v46 = vsel %vm668_vm7, %v655_v47, %v657_v60  ;;  %v611_v50 = vsel %vm608_vm8, %v6950_v62, %v595_v45 }
  0xf4   : > { %v895_v48 = vsel %vm840_vm1, %v642_v38, %v672_v46  ;;  %v891_v49 = vsel %vm840_vm1, %v641_v44, %v671_v40  ;;  %v855_v54 = vsel %vm840_vm1, %v6836_v12, %v612_v39  ;;  %v851_v52 = vsel %vm840_vm1, %v6720_v3, %v611_v50 }
  0xf5   : > { %1095 = vmatprep.subr.bf16.mxu1 %v895_v48 }
  0xf6   : > { %v824_v51 = vpop.permute.xlu1 %823  ;;  %1096 = vmatpush1.bf16.msra.mxu1 %v891_v49  ;;  %v822_v56 = vpop.permute.xlu0 %821 }
  0xf7   : > { %1097 = vmatprep.subr.bf16.mxu1 %v855_v54  ;;  %v836_v57 = vsel %vm829_vm0, %v6979_v18, %v822_v56  ;;  %v837_v60 = vsel %vm829_vm0, %v822_v56, %v824_v51 }
  0xf8   : > { %v1031_v62 = vsel %vm840_vm1, %v836_v57, 0 }
  0xfa   : > { %v758_v58 = vpop.permute.xlu1 %757  ;;  %1098 = vmatpush1.bf16.msra.mxu1 %v851_v52  ;;  %v756_v59 = vpop.permute.xlu0 %755 }
  0xfb   : > { %5580 = vmatprep.subr.msk.bf16.mxu1 %vm840_vm1, %v837_v60  ;;  %v770_v3 = vsel %vm763_vm2, %v6986_v22, %v756_v59  ;;  %v771_v18 = vsel %vm763_vm2, %v756_v59, %v758_v58  ;;  %v419_v60 = vld [vmem:[%s10013_s1 + $0xf8] sm:$0xff] }
  0xfd   : > { %5577 = vmatmul.mubr.msk.bf16.vlgmr.msra.gmra.mxu1 %vm10029_vm9, %v6971_v17 }
  0xfe   : > { %v791_v12 = vpop.permute.xlu1 %790  ;;  %1172 = vmatpush1.bf16.msra.mxu1 %v1031_v62  ;;  %v789_v61 = vpop.permute.xlu0 %788  ;;  %1197 = vmatprep.mubr.bf16.mxu1 %v6630_v6 }
  0xff   : > { %v803_v63 = vsel %vm796_vm3, %v6988_v25, %v789_v61  ;;  %v804_v0 = vsel %vm796_vm3, %v789_v61, %v791_v12 }
 0x100   : > { %v991_v1 = vsel %vm840_vm1, %v771_v18, %v804_v0  ;;  %v987_v7 = vsel %vm840_vm1, %v770_v3, %v803_v63  ;;  %v418_v18 = vld [vmem:[%s10013_s1 + $0xf0] sm:$0xff] }
 0x101   : > { %1173 = vmatprep.subr.bf16.mxu1 %v991_v1  ;;  %v402_v63 = vld [vmem:[%s10013_s1 + $0x70] sm:$0xff]  ;;  %v417_v1 = vld [vmem:[%s10013_s1 + $0xe8] sm:$0xff] }
 0x102   : > { %v828_v10 = vpop.permute.xlu1 %827  ;;  %1174 = vmatpush1.bf16.msra.mxu1 %v987_v7  ;;  %v826_v4 = vpop.permute.xlu0 %825 }
 0x103   : > { %v838_v5 = vsel %vm829_vm0, %v824_v51, %v826_v4  ;;  %v839_v19 = vsel %vm829_vm0, %v826_v4, %v828_v10  ;;  %v401_v4 = vld [vmem:[%s10013_s1 + $0x68] sm:$0xff] }
 0x104   : > { %5582 = vmatprep.subr.msk.bf16.mxu0 %vm840_vm1, %v839_v19  ;;  %v1037_v22 = vsel %vm840_vm1, %v838_v5, 0  ;;  %v451_v5 = vld [vmem:[%s10013_s1 + $0x1f8] sm:$0xff] }
 0x105   : > { %1213 = vmatpush1.bf16.msra.mxu0 %v1037_v22  ;;  %v416_v22 = vld [vmem:[%s10013_s1 + $0xe0] sm:$0xff] }
 0x106   : > { %v695_v25 = vpop.permute.xlu1 %694  ;;  %v693_v20 = vpop.permute.xlu0 %692 }
 0x107   : > { %v705_v29 = vsel %vm698_vm4, %v6998_v37, %v693_v20  ;;  %v706_v8 = vsel %vm698_vm4, %v693_v20, %v695_v25  ;;  %v399_v20 = vld [vmem:[%s10013_s1 + $0x58] sm:$0xff] }
 0x10a   : > { %v725_v21 = vpop.permute.xlu1 %724  ;;  %v723_v27 = vpop.permute.xlu0 %722 }
 0x10b   : > { %v735_v9 = vsel %vm728_vm5, %v7000_v41, %v723_v27  ;;  %v736_v30 = vsel %vm728_vm5, %v723_v27, %v725_v21  ;;  %v414_v27 = vld [vmem:[%s10013_s1 + $0xd0] sm:$0xff] }
 0x10c   : > { %v951_v13 = vsel %vm840_vm1, %v706_v8, %v736_v30  ;;  %v947_v16 = vsel %vm840_vm1, %v705_v29, %v735_v9  ;;  %v434_v29 = vld [vmem:[%s10013_s1 + $0x170] sm:$0xff]  ;;  %v449_v9 = vld [vmem:[%s10013_s1 + $0x1e8] sm:$0xff] }
 0x10d   : > { %1175 = vmatprep.subr.bf16.mxu1 %v951_v13  ;;  %v398_v8 = vld [vmem:[%s10013_s1 + $0x50] sm:$0xff]  ;;  %v433_v30 = vld [vmem:[%s10013_s1 + $0x168] sm:$0xff] }
 0x10e   : > { %v762_v31 = vpop.permute.xlu1 %761  ;;  %1176 = vmatpush1.bf16.msra.mxu1 %v947_v16  ;;  %v760_v33 = vpop.permute.xlu0 %759  ;;  %v397_v13 = vld [vmem:[%s10013_s1 + $0x48] sm:$0xff]  ;;  %v448_v16 = vld [vmem:[%s10013_s1 + $0x1e0] sm:$0xff] }
 0x10f   : > { %v772_v36 = vsel %vm763_vm2, %v758_v58, %v760_v33  ;;  %v773_v37 = vsel %vm763_vm2, %v760_v33, %v762_v31  ;;  %v412_v31 = vld [vmem:[%s10013_s1 + $0xc0] sm:$0xff] }
 0x110   : > { %v432_v33 = vld [vmem:[%s10013_s1 + $0x160] sm:$0xff] }
 0x112   : > { %v795_v34 = vpop.permute.xlu1 %794  ;;  %v793_v35 = vpop.permute.xlu0 %792 }
 0x113   : > { %v805_v42 = vsel %vm796_vm3, %v791_v12, %v793_v35  ;;  %v806_v41 = vsel %vm796_vm3, %v793_v35, %v795_v34  ;;  %v396_v34 = vld [vmem:[%s10013_s1 + $0x40] sm:$0xff]  ;;  %v447_v35 = vld [vmem:[%s10013_s1 + $0x1d8] sm:$0xff] }
 0x114   : > { %v999_v26 = vsel %vm840_vm1, %v773_v37, %v806_v41  ;;  %v995_v23 = vsel %vm840_vm1, %v772_v36, %v805_v42  ;;  %v411_v36 = vld [vmem:[%s10013_s1 + $0xb8] sm:$0xff]  ;;  %v446_v41 = vld [vmem:[%s10013_s1 + $0x1d0] sm:$0xff] }
 0x115   : > { %1214 = vmatprep.subr.bf16.mxu0 %v999_v26  ;;  %v431_v37 = vld [vmem:[%s10013_s1 + $0x158] sm:$0xff]  ;;  %v410_v26 = vld [vmem:[%s10013_s1 + $0xb0] sm:$0xff] }
 0x116   : > { %v635_v28 = vpop.permute.xlu1 %634  ;;  %1215 = vmatpush1.bf16.msra.mxu0 %v995_v23  ;;  %v633_v32 = vpop.permute.xlu0 %632  ;;  %v395_v42 = vld [vmem:[%s10013_s1 + $0x38] sm:$0xff]  ;;  %v430_v23 = vld [vmem:[%s10013_s1 + $0x150] sm:$0xff] }
 0x117   : > { %v645_v45 = vsel %vm638_vm6, %v7010_v53, %v633_v32  ;;  %v646_v47 = vsel %vm638_vm6, %v633_v32, %v635_v28  ;;  %v445_v32 = vld [vmem:[%s10013_s1 + $0x1c8] sm:$0xff] }
 0x11a   : > { %v665_v43 = vpop.permute.xlu1 %664  ;;  %v663_v44 = vpop.permute.xlu0 %662 }
 0x11b   : > { %v675_v38 = vsel %vm668_vm7, %v7012_v55, %v663_v44  ;;  %v676_v39 = vsel %vm668_vm7, %v663_v44, %v665_v43  ;;  %v429_v44 = vld [vmem:[%s10013_s1 + $0x148] sm:$0xff] }
 0x11c   : > { %v911_v40 = vsel %vm840_vm1, %v646_v47, %v676_v39  ;;  %v907_v46 = vsel %vm840_vm1, %v645_v45, %v675_v38  ;;  %v393_v45 = vld [vmem:[%s10013_s1 + $0x28] sm:$0xff]  ;;  %v444_v47 = vld [vmem:[%s10013_s1 + $0x1c0] sm:$0xff] }
 0x11d   : > { %1177 = vmatprep.subr.bf16.mxu1 %v911_v40  ;;  %v408_v38 = vld [vmem:[%s10013_s1 + $0xa0] sm:$0xff] }
 0x11e   : > { %v727_v48 = vpop.permute.xlu1 %726  ;;  %1178 = vmatpush1.bf16.msra.mxu1 %v907_v46  ;;  %v697_v49 = vpop.permute.xlu0 %696  ;;  %v428_v39 = vld [vmem:[%s10013_s1 + $0x140] sm:$0xff]  ;;  %v443_v46 = vld [vmem:[%s10013_s1 + $0x1b8] sm:$0xff] }
 0x11f   : > { %v737_v50 = vsel %vm728_vm5, %v725_v21, %v727_v48  ;;  %v707_v51 = vsel %vm698_vm4, %v695_v25, %v697_v49  ;;  %v959_v53 = vsel %vm840_vm1, %v697_v49, %v727_v48  ;;  %v415_v25 = vld [vmem:[%s10013_s1 + $0xd8] sm:$0xff]  ;;  %v450_v21 = vld [vmem:[%s10013_s1 + $0x1f0] sm:$0xff]  ;;  %v392_v40 = vld [vmem:[%s10013_s1 + $0x20] sm:$0xff] }
 0x120   : > { %1216 = vmatprep.subr.bf16.mxu0 %v959_v53  ;;  %v955_v56 = vsel %vm840_vm1, %v707_v51, %v737_v50  ;;  %v407_v48 = vld [vmem:[%s10013_s1 + $0x98] sm:$0xff]  ;;  %v442_v51 = vld [vmem:[%s10013_s1 + $0x1b0] sm:$0xff] }
 0x121   : > { %1217 = vmatpush1.bf16.msra.mxu0 %v955_v56  ;;  %v427_v49 = vld [vmem:[%s10013_s1 + $0x138] sm:$0xff]  ;;  %v406_v53 = vld [vmem:[%s10013_s1 + $0x90] sm:$0xff] }
 0x122   : > { %v605_v55 = vpop.permute.xlu1 %604  ;;  %v603_v54 = vpop.permute.xlu0 %602  ;;  %v391_v50 = vld [vmem:[%s10013_s1 + $0x18] sm:$0xff]  ;;  %v426_v56 = vld [vmem:[%s10013_s1 + $0x130] sm:$0xff] }
 0x123   : > { %v615_v52 = vsel %vm608_vm8, %v7022_v2, %v603_v54  ;;  %v616_v57 = vsel %vm608_vm8, %v603_v54, %v605_v55  ;;  %v441_v54 = vld [vmem:[%s10013_s1 + $0x1a8] sm:$0xff] }
 0x124   : > { %v871_v58 = vsel %vm840_vm1, %v6857_v15, %v616_v57  ;;  %v867_v59 = vsel %vm840_vm1, %v6788_v11, %v615_v52  ;;  %v403_v15 = vld [vmem:[%s10013_s1 + $0x78] sm:$0xff]  ;;  %v405_v52 = vld [vmem:[%s10013_s1 + $0x88] sm:$0xff] }
 0x125   : > { %1179 = vmatprep.subr.bf16.mxu1 %v871_v58  ;;  %v425_v57 = vld [vmem:[%s10013_s1 + $0x128] sm:$0xff] }
 0x126   : > { %v667_v62 = vpop.permute.xlu1 %666  ;;  %1180 = vmatpush1.bf16.msra.mxu1 %v867_v59  ;;  %v637_v12 = vpop.permute.xlu0 %636  ;;  %v389_v58 = vld [vmem:[%s10013_s1 + $0x8] sm:$0xff]  ;;  %v440_v59 = vld [vmem:[%s10013_s1 + $0x1a0] sm:$0xff] }
 0x127   : > { %v677_v61 = vsel %vm668_vm7, %v665_v43, %v667_v62  ;;  %v647_v2 = vsel %vm638_vm6, %v635_v28, %v637_v12  ;;  %v919_v3 = vsel %vm840_vm1, %v637_v12, %v667_v62  ;;  %5737 = vmatprep.subr.mxu1 %v419_v60  ;;  %v394_v28 = vld [vmem:[%s10013_s1 + $0x30] sm:$0xff]  ;;  %v409_v43 = vld [vmem:[%s10013_s1 + $0xa8] sm:$0xff]  ;;  %v404_v60 = vld [vmem:[%s10013_s1 + $0x80] sm:$0xff] }
 0x128   : > { %1218 = vmatprep.subr.bf16.mxu0 %v919_v3  ;;  %v915_v11 = vsel %vm840_vm1, %v647_v2, %v677_v61  ;;  %v424_v62 = vld [vmem:[%s10013_s1 + $0x120] sm:$0xff]  ;;  %v439_v61 = vld [vmem:[%s10013_s1 + $0x198] sm:$0xff] }
 0x129   : > { %5581 = vmatmul.mubr.msk.bf16.vlgmr.msra.gmra.mxu1 %vm10029_vm9, %v6971_v17  ;;  %1219 = vmatpush1.bf16.msra.mxu0 %v915_v11  ;;  %v388_v12 = vld [vmem:[%s10013_s1] sm:$0xff]  ;;  %v483_v2 = vld [vmem:[%s10013_s1 + $0x2f8] sm:$0xff]  ;;  %v422_v11 = vld [vmem:[%s10013_s1 + $0x110] sm:$0xff] }
 0x12a   : > { %v607_v0 = vpop.permute.xlu0 %606  ;;  %5738 = vmatpush3.msra.mxu1 %v403_v15  ;;  %v423_v3 = vld [vmem:[%s10013_s1 + $0x118] sm:$0xff]  ;;  %v438_v15 = vld [vmem:[%s10013_s1 + $0x190] sm:$0xff] }
 0x12b   : > { %v617_v7 = vsel %vm608_vm8, %v605_v55, %v607_v0  ;;  %v879_v10 = vsel %vm840_vm1, %v6878_v24, %v607_v0  ;;  %5739 = vmatprep.subr.mxu1 %v418_v18  ;;  %v400_v24 = vld [vmem:[%s10013_s1 + $0x60] sm:$0xff]  ;;  %v390_v55 = vld [vmem:[%s10013_s1 + $0x10] sm:$0xff]  ;;  %v437_v18 = vld [vmem:[%s10013_s1 + $0x188] sm:$0xff] }
 0x12c   : > { %1220 = vmatprep.subr.bf16.mxu0 %v879_v10  ;;  %v875_v19 = vsel %vm840_vm1, %v6855_v14, %v617_v7  ;;  %5740 = vmatpush3.msra.mxu1 %v402_v63  ;;  %v435_v14 = vld [vmem:[%s10013_s1 + $0x178] sm:$0xff]  ;;  %v421_v63 = vld [vmem:[%s10013_s1 + $0x108] sm:$0xff]  ;;  %v436_v0 = vld [vmem:[%s10013_s1 + $0x180] sm:$0xff] }
 0x12d   : > { %1221 = vmatpush1.bf16.msra.mxu0 %v875_v19  ;;  %5741 = vmatprep.subr.mxu1 %v417_v1  ;;  %v420_v1 = vld [vmem:[%s10013_s1 + $0x100] sm:$0xff]  ;;  %v515_v7 = vld [vmem:[%s10013_s1 + $0x3f8] sm:$0xff] }
 0x12e   : > { %5742 = vmatpush3.msra.mxu1 %v401_v4  ;;  %5775 = vmatprep.subr.mxu0 %v451_v5 }
 0x12f   : > { %5743 = vmatprep.subr.mxu1 %v416_v22 }
 0x130   : > { %5583 = vmatmul.mubr.msk.bf16.vlgmr.msra.gmra.mxu0 %vm10029_vm9, %v6971_v17  ;;  %5744 = vmatpush3.msra.mxu1 %v400_v24  ;;  %v413_v17 = vld [vmem:[%s10013_s1 + $0xc8] sm:$0xff] }
 0x131   : > { %5745 = vmatprep.subr.mxu1 %v415_v25  ;;  %5776 = vmatpush3.msra.mxu0 %v435_v14 }
 0x132   : > { %5746 = vmatpush3.msra.mxu1 %v399_v20  ;;  %5777 = vmatprep.subr.mxu0 %v450_v21  ;;  %v467_v20 = vld [vmem:[%s10013_s1 + $0x278] sm:$0xff] }
 0x133   : > { %5747 = vmatprep.subr.mxu1 %v414_v27  ;;  %5778 = vmatpush3.msra.mxu0 %v434_v29  ;;  %v7335_v10 = vpop.permute.xlu1 %1005  ;;  %v482_v27 = vld [vmem:[%s10013_s1 + $0x2f0] sm:$0xff] }
 0x134   : > { %5748 = vmatpush3.msra.mxu1 %v398_v8  ;;  %5779 = vmatprep.subr.mxu0 %v449_v9  ;;  %v466_v8 = vld [vmem:[%s10013_s1 + $0x270] sm:$0xff] }
 0x135   : > { %5749 = vmatprep.subr.mxu1 %v413_v17  ;;  %5780 = vmatpush3.msra.mxu0 %v433_v30  ;;  %v481_v17 = vld [vmem:[%s10013_s1 + $0x2e8] sm:$0xff] }
 0x136   : > { %5750 = vmatpush3.msra.mxu1 %v397_v13  ;;  %5781 = vmatprep.subr.mxu0 %v448_v16  ;;  %v465_v30 = vld [vmem:[%s10013_s1 + $0x268] sm:$0xff]  ;;  %v480_v13 = vld [vmem:[%s10013_s1 + $0x2e0] sm:$0xff] }
 0x137   : > { %5751 = vmatprep.subr.mxu1 %v412_v31  ;;  %5782 = vmatpush3.msra.mxu0 %v432_v33  ;;  %v464_v16 = vld [vmem:[%s10013_s1 + $0x260] sm:$0xff]  ;;  %v479_v31 = vld [vmem:[%s10013_s1 + $0x2d8] sm:$0xff] }
 0x138   : > { %5752 = vmatpush3.msra.mxu1 %v396_v34  ;;  %5783 = vmatprep.subr.mxu0 %v447_v35  ;;  %v463_v33 = vld [vmem:[%s10013_s1 + $0x258] sm:$0xff]  ;;  %v478_v34 = vld [vmem:[%s10013_s1 + $0x2d0] sm:$0xff] }
 0x139   : > { %5753 = vmatprep.subr.mxu1 %v411_v36  ;;  %5784 = vmatpush3.msra.mxu0 %v431_v37  ;;  %v462_v35 = vld [vmem:[%s10013_s1 + $0x250] sm:$0xff]  ;;  %v477_v36 = vld [vmem:[%s10013_s1 + $0x2c8] sm:$0xff] }
 0x13a   : > { %5754 = vmatpush3.msra.mxu1 %v395_v42  ;;  %5785 = vmatprep.subr.mxu0 %v446_v41  ;;  %v461_v37 = vld [vmem:[%s10013_s1 + $0x248] sm:$0xff]  ;;  %v476_v42 = vld [vmem:[%s10013_s1 + $0x2c0] sm:$0xff] }
 0x13b   : > { %5755 = vmatprep.subr.mxu1 %v410_v26  ;;  %5786 = vmatpush3.msra.mxu0 %v430_v23  ;;  %v460_v41 = vld [vmem:[%s10013_s1 + $0x240] sm:$0xff]  ;;  %v475_v26 = vld [vmem:[%s10013_s1 + $0x2b8] sm:$0xff] }
 0x13c   : > { %5756 = vmatpush3.msra.mxu1 %v394_v28  ;;  %5787 = vmatprep.subr.mxu0 %v445_v32  ;;  %v459_v23 = vld [vmem:[%s10013_s1 + $0x238] sm:$0xff]  ;;  %v474_v28 = vld [vmem:[%s10013_s1 + $0x2b0] sm:$0xff] }
 0x13d   : > { %5757 = vmatprep.subr.mxu1 %v409_v43  ;;  %5788 = vmatpush3.msra.mxu0 %v429_v44  ;;  %v458_v32 = vld [vmem:[%s10013_s1 + $0x230] sm:$0xff]  ;;  %v473_v43 = vld [vmem:[%s10013_s1 + $0x2a8] sm:$0xff] }
 0x13e   : > { %5758 = vmatpush3.msra.mxu1 %v393_v45  ;;  %5789 = vmatprep.subr.mxu0 %v444_v47  ;;  %v457_v44 = vld [vmem:[%s10013_s1 + $0x228] sm:$0xff]  ;;  %v472_v45 = vld [vmem:[%s10013_s1 + $0x2a0] sm:$0xff] }
 0x13f   : > { %5759 = vmatprep.subr.mxu1 %v408_v38  ;;  %5790 = vmatpush3.msra.mxu0 %v428_v39  ;;  %v456_v47 = vld [vmem:[%s10013_s1 + $0x220] sm:$0xff]  ;;  %v471_v38 = vld [vmem:[%s10013_s1 + $0x298] sm:$0xff] }
 0x140   : > { %5760 = vmatpush3.msra.mxu1 %v392_v40  ;;  %5791 = vmatprep.subr.mxu0 %v443_v46  ;;  %v455_v39 = vld [vmem:[%s10013_s1 + $0x218] sm:$0xff]  ;;  %v470_v40 = vld [vmem:[%s10013_s1 + $0x290] sm:$0xff] }
 0x141   : > { %5761 = vmatprep.subr.mxu1 %v407_v48  ;;  %5792 = vmatpush3.msra.mxu0 %v427_v49  ;;  %v454_v46 = vld [vmem:[%s10013_s1 + $0x210] sm:$0xff]  ;;  %v469_v48 = vld [vmem:[%s10013_s1 + $0x288] sm:$0xff] }
 0x142   : > { %5762 = vmatpush3.msra.mxu1 %v391_v50  ;;  %5793 = vmatprep.subr.mxu0 %v442_v51  ;;  %v453_v49 = vld [vmem:[%s10013_s1 + $0x208] sm:$0xff]  ;;  %v468_v50 = vld [vmem:[%s10013_s1 + $0x280] sm:$0xff] }
 0x143   : > { %5763 = vmatprep.subr.mxu1 %v406_v53  ;;  %5794 = vmatpush3.msra.mxu0 %v426_v56  ;;  %v452_v51 = vld [vmem:[%s10013_s1 + $0x200] sm:$0xff]  ;;  %v6632_v53 = vmov 0.0  }
 0x144   : > { %5764 = vmatpush3.msra.mxu1 %v390_v55  ;;  %5795 = vmatprep.subr.mxu0 %v441_v54 }
 0x145   : > { %5765 = vmatprep.subr.mxu1 %v405_v52  ;;  %5796 = vmatpush3.msra.mxu0 %v425_v57 }
 0x146   : > { %5766 = vmatpush3.msra.mxu1 %v389_v58  ;;  %5797 = vmatprep.subr.mxu0 %v440_v59 }
 0x147   : > { %5767 = vmatprep.subr.mxu1 %v404_v60  ;;  %5798 = vmatpush3.msra.mxu0 %v424_v62  ;;  %v531_v62 = vld [vmem:[%s10013_s1 + $0x478] sm:$0xff] }
 0x148   : > { %5768 = vmatpush3.msra.mxu1 %v388_v12  ;;  %5799 = vmatprep.subr.mxu0 %v439_v61  ;;  %v530_v61 = vld [vmem:[%s10013_s1 + $0x470] sm:$0xff] }
 0x149   : > { %5813 = vmatprep.subr.mxu1 %v483_v2  ;;  %5800 = vmatpush3.msra.mxu0 %v423_v3  ;;  %v529_v3 = vld [vmem:[%s10013_s1 + $0x468] sm:$0xff] }
 0x14a   : > { %5801 = vmatprep.subr.mxu0 %v438_v15  ;;  %v528_v15 = vld [vmem:[%s10013_s1 + $0x460] sm:$0xff] }
 0x14b   : > { %5802 = vmatpush3.msra.mxu0 %v422_v11  ;;  %v527_v11 = vld [vmem:[%s10013_s1 + $0x458] sm:$0xff] }
 0x14c   : > { %5803 = vmatprep.subr.mxu0 %v437_v18  ;;  %v526_v18 = vld [vmem:[%s10013_s1 + $0x450] sm:$0xff] }
 0x14d   : > { %5804 = vmatpush3.msra.mxu0 %v421_v63  ;;  %v525_v63 = vld [vmem:[%s10013_s1 + $0x448] sm:$0xff] }
 0x14e   : > { %5805 = vmatprep.subr.mxu0 %v436_v0 }
 0x14f   : > { %5806 = vmatpush3.msra.mxu0 %v420_v1  ;;  %v524_v1 = vld [vmem:[%s10013_s1 + $0x440] sm:$0xff] }
 0x150   : > { %5851 = vmatprep.subr.mxu0 %v515_v7 }
 0x179   : > { %v1076_v4 = vpop.f32.mrf.mxu0 }
 0x17a   : > { %v1077_v5 = vadd.f32 %v1076_v4, %v7335_v10 }
 0x17b   : > { %v1078_v19 = vpop.f32.mrf.mxu0 }
 0x17c   : > { %v1079_v22 = vadd.f32 %v1078_v19, %v7335_v10  ;;  %v7339_v24 = vmax.f32 %v1077_v5, 0.0  ;;  %v523_v5 = vld [vmem:[%s10013_s1 + $0x438] sm:$0xff] }
 0x17d   : > { %v1080_v25 = vpop.f32.mrf.mxu0 }
 0x17e   : > { %v7341_v14 = vmax.f32 %v1079_v22, 0.0  ;;  %v1257_v9 = vmul.f32 %v7339_v24, %v7339_v24  ;;  %v522_v25 = vld [vmem:[%s10013_s1 + $0x430] sm:$0xff] }
 0x17f   : > { %v1081_v21 = vpop.f32.mrf.mxu0 }
 0x180   : > { %1342 = vmatprep.mubr.f32.mxu1 %v7341_v14  ;;  %v1258_v29 = vmul.f32 %v7341_v14, %v7341_v14 }
 0x181   : > { %1343 = vmatmul.mubr.f32.vlgmr.msra.gmra.mxu1 %v7339_v24 }
 0x182   : > { %5814 = vmatpush3.msra.mxu1 %v467_v20  ;;  %1347 = vmatprep.mubr.f32.mxu1 %v1258_v29  ;;  %v521_v29 = vld [vmem:[%s10013_s1 + $0x428] sm:$0xff] }
 0x183   : > { %5815 = vmatprep.subr.mxu1 %v482_v27 }
 0x184   : > { %5816 = vmatpush3.msra.mxu1 %v466_v8 }
 0x185   : > { %5817 = vmatprep.subr.mxu1 %v481_v17  ;;  %1348 = vmatmul.mubr.f32.gmra.mxu1 %v1257_v9  ;;  %v499_v9 = vld [vmem:[%s10013_s1 + $0x378] sm:$0xff]  ;;  %v514_v17 = vld [vmem:[%s10013_s1 + $0x3f0] sm:$0xff] }
 0x186   : > { %5818 = vmatpush3.msra.mxu1 %v465_v30  ;;  %v520_v30 = vld [vmem:[%s10013_s1 + $0x420] sm:$0xff] }
 0x187   : > { %5819 = vmatprep.subr.mxu1 %v480_v13 }
 0x188   : > { %5820 = vmatpush3.msra.mxu1 %v464_v16  ;;  %v498_v16 = vld [vmem:[%s10013_s1 + $0x370] sm:$0xff] }
 0x189   : > { %5821 = vmatprep.subr.mxu1 %v479_v31  ;;  %v519_v31 = vld [vmem:[%s10013_s1 + $0x418] sm:$0xff] }
 0x18a   : > { %5822 = vmatpush3.msra.mxu1 %v463_v33  ;;  %v513_v33 = vld [vmem:[%s10013_s1 + $0x3e8] sm:$0xff] }
 0x18b   : > { %5823 = vmatprep.subr.mxu1 %v478_v34  ;;  %v497_v34 = vld [vmem:[%s10013_s1 + $0x368] sm:$0xff] }
 0x18c   : > { %5824 = vmatpush3.msra.mxu1 %v462_v35  ;;  %v518_v35 = vld [vmem:[%s10013_s1 + $0x410] sm:$0xff] }
 0x18d   : > { %5825 = vmatprep.subr.mxu1 %v477_v36  ;;  %v512_v36 = vld [vmem:[%s10013_s1 + $0x3e0] sm:$0xff] }
 0x18e   : > { %5826 = vmatpush3.msra.mxu1 %v461_v37  ;;  %v496_v37 = vld [vmem:[%s10013_s1 + $0x360] sm:$0xff] }
 0x18f   : > { %5827 = vmatprep.subr.mxu1 %v476_v42  ;;  %v517_v42 = vld [vmem:[%s10013_s1 + $0x408] sm:$0xff] }
 0x190   : > { %5828 = vmatpush3.msra.mxu1 %v460_v41  ;;  %v511_v41 = vld [vmem:[%s10013_s1 + $0x3d8] sm:$0xff] }
 0x191   : > { %5829 = vmatprep.subr.mxu1 %v475_v26  ;;  %v495_v26 = vld [vmem:[%s10013_s1 + $0x358] sm:$0xff] }
 0x192   : > { %5830 = vmatpush3.msra.mxu1 %v459_v23  ;;  %v516_v23 = vld [vmem:[%s10013_s1 + $0x400] sm:$0xff] }
 0x193   : > { %5831 = vmatprep.subr.mxu1 %v474_v28  ;;  %v510_v28 = vld [vmem:[%s10013_s1 + $0x3d0] sm:$0xff] }
 0x194   : > { %5832 = vmatpush3.msra.mxu1 %v458_v32  ;;  %v494_v32 = vld [vmem:[%s10013_s1 + $0x350] sm:$0xff] }
 0x195   : > { %5833 = vmatprep.subr.mxu1 %v473_v43  ;;  %v545_v43 = vld [vmem:[%s10013_s1 + $0x4e8] sm:$0x3] }
 0x196   : > { %5834 = vmatpush3.msra.mxu1 %v457_v44  ;;  %v509_v44 = vld [vmem:[%s10013_s1 + $0x3c8] sm:$0xff] }
 0x197   : > { %5835 = vmatprep.subr.mxu1 %v472_v45  ;;  %v493_v45 = vld [vmem:[%s10013_s1 + $0x348] sm:$0xff] }
 0x198   : > { %5836 = vmatpush3.msra.mxu1 %v456_v47  ;;  %v544_v47 = vld [vmem:[%s10013_s1 + $0x4e0] sm:$0xff] }
 0x199   : > { %5837 = vmatprep.subr.mxu1 %v471_v38  ;;  %v508_v38 = vld [vmem:[%s10013_s1 + $0x3c0] sm:$0xff] }
 0x19a   : > { %5838 = vmatpush3.msra.mxu1 %v455_v39  ;;  %v492_v39 = vld [vmem:[%s10013_s1 + $0x340] sm:$0xff] }
 0x19b   : > { %5839 = vmatprep.subr.mxu1 %v470_v40  ;;  %v543_v40 = vld [vmem:[%s10013_s1 + $0x4d8] sm:$0xff] }
 0x19c   : > { %5840 = vmatpush3.msra.mxu1 %v454_v46  ;;  %v507_v46 = vld [vmem:[%s10013_s1 + $0x3b8] sm:$0xff] }
 0x19d   : > { %5841 = vmatprep.subr.mxu1 %v469_v48  ;;  %v491_v48 = vld [vmem:[%s10013_s1 + $0x338] sm:$0xff] }
 0x19e   : > { %5842 = vmatpush3.msra.mxu1 %v453_v49  ;;  %v542_v49 = vld [vmem:[%s10013_s1 + $0x4d0] sm:$0xff] }
 0x19f   : > { %5843 = vmatprep.subr.mxu1 %v468_v50  ;;  %v506_v50 = vld [vmem:[%s10013_s1 + $0x3b0] sm:$0xff] }
 0x1a0   : > { %5844 = vmatpush3.msra.mxu1 %v452_v51  ;;  %v490_v51 = vld [vmem:[%s10013_s1 + $0x330] sm:$0xff] }
 0x1a1   : > { %1578 = vmatprep.subr.mxu1 %v6632_v53 }
 0x1a9   : > { %v1158_v56 = vpop.f32.mrf.mxu0 }
 0x1aa   : > { %v1159_v55 = vadd.f32 %v1158_v56, %v7335_v10  ;;  %v541_v56 = vld [vmem:[%s10013_s1 + $0x4c8] sm:$0xff] }
 0x1ab   : > { %v1160_v54 = vpop.f32.mrf.mxu0 }
 0x1ac   : > { %v1161_v52 = vadd.f32 %v1160_v54, %v7335_v10  ;;  %v7447_v59 = vmax.f32 %v1159_v55, 0.0  ;;  %v505_v55 = vld [vmem:[%s10013_s1 + $0x3a8] sm:$0xff] }
 0x1ad   : > { %v1162_v57 = vpop.f32.mrf.mxu0  ;;  %v489_v54 = vld [vmem:[%s10013_s1 + $0x328] sm:$0xff] }
 0x1ae   : > { %v7445_v58 = vmax.f32 %v1161_v52, 0.0  ;;  %v1261_v2 = vmul.f32 %v7447_v59, %v7447_v59  ;;  %v540_v52 = vld [vmem:[%s10013_s1 + $0x4c0] sm:$0xff] }
 0x1af   : > { %v1163_v60 = vpop.f32.mrf.mxu0  ;;  %v504_v57 = vld [vmem:[%s10013_s1 + $0x3a0] sm:$0xff] }
 0x1b0   : > { %1492 = vmatprep.mubr.f32.mxu1 %v7445_v58  ;;  %v1262_v12 = vmul.f32 %v7445_v58, %v7445_v58  ;;  %v488_v60 = vld [vmem:[%s10013_s1 + $0x320] sm:$0xff] }
 0x1b1   : > { %1493 = vmatmul.mubr.f32.vlgmr.msra.gmra.mxu1 %v7447_v59 }
 0x1b2   : > { %1497 = vmatprep.mubr.f32.mxu1 %v1262_v12  ;;  %1579 = vmatpush1.msra.mxu1 %v531_v62  ;;  %v539_v62 = vld [vmem:[%s10013_s1 + $0x4b8] sm:$0xff] }
 0x1b3   : > { %1580 = vmatprep.subr.mxu1 %v6632_v53  ;;  %v503_v12 = vld [vmem:[%s10013_s1 + $0x398] sm:$0xff] }
 0x1b4   : > { %1581 = vmatpush1.msra.mxu1 %v530_v61  ;;  %v487_v61 = vld [vmem:[%s10013_s1 + $0x318] sm:$0xff] }
 0x1b5   : > { %1498 = vmatmul.mubr.f32.gmra.mxu1 %v1261_v2  ;;  %1582 = vmatprep.subr.mxu1 %v6632_v53  ;;  %v538_v2 = vld [vmem:[%s10013_s1 + $0x4b0] sm:$0xff] }
 0x1b6   : > { %1583 = vmatpush1.msra.mxu1 %v529_v3  ;;  %v502_v3 = vld [vmem:[%s10013_s1 + $0x390] sm:$0xff] }
 0x1b7   : > { %1584 = vmatprep.subr.mxu1 %v6632_v53 }
 0x1b8   : > { %1585 = vmatpush1.msra.mxu1 %v528_v15  ;;  %v486_v15 = vld [vmem:[%s10013_s1 + $0x310] sm:$0xff] }
 0x1b9   : > { %1586 = vmatprep.subr.mxu1 %v6632_v53 }
 0x1ba   : > { %1587 = vmatpush1.msra.mxu1 %v527_v11  ;;  %v537_v11 = vld [vmem:[%s10013_s1 + $0x4a8] sm:$0xff] }
 0x1bb   : > { %1588 = vmatprep.subr.mxu1 %v6632_v53 }
 0x1bc   : > { %1589 = vmatpush1.msra.mxu1 %v526_v18  ;;  %v501_v18 = vld [vmem:[%s10013_s1 + $0x388] sm:$0xff] }
 0x1bd   : > { %v1117_v0 = vpop.f32.mrf.mxu1  ;;  %1590 = vmatprep.subr.mxu1 %v6632_v53 }
 0x1be   : > { %1591 = vmatpush1.msra.mxu1 %v525_v63  ;;  %v1118_v7 = vadd.f32 %v1117_v0, %v7335_v10  ;;  %v485_v63 = vld [vmem:[%s10013_s1 + $0x308] sm:$0xff]  ;;  %v536_v0 = vld [vmem:[%s10013_s1 + $0x4a0] sm:$0xff] }
 0x1bf   : > { %v1119_v4 = vpop.f32.mrf.mxu1  ;;  %1592 = vmatprep.subr.mxu1 %v6632_v53 }
 0x1c0   : > { %v1120_v19 = vadd.f32 %v1119_v4, %v7335_v10  ;;  %1593 = vmatpush1.msra.mxu1 %v524_v1  ;;  %v7497_v21 = vmax.f32 %v1118_v7, 0.0  ;;  %v500_v1 = vld [vmem:[%s10013_s1 + $0x380] sm:$0xff]  ;;  %v535_v4 = vld [vmem:[%s10013_s1 + $0x498] sm:$0xff] }
 0x1c1   : > { %v1121_v22 = vpop.f32.mrf.mxu1  ;;  %1594 = vmatprep.subr.mxu1 %v6632_v53  ;;  %v484_v7 = vld [vmem:[%s10013_s1 + $0x300] sm:$0xff] }
 0x1c2   : > { %v7495_v20 = vmax.f32 %v1120_v19, 0.0  ;;  %1595 = vmatpush1.msra.mxu1 %v523_v5  ;;  %v1259_v13 = vmul.f32 %v7497_v21, %v7497_v21  ;;  %v534_v5 = vld [vmem:[%s10013_s1 + $0x490] sm:$0xff]  ;;  %v533_v19 = vld [vmem:[%s10013_s1 + $0x488] sm:$0xff] }
 0x1c3   : > { %v1122_v27 = vpop.f32.mrf.mxu1  ;;  %1596 = vmatprep.subr.mxu1 %v6632_v53 }
 0x1c4   : > { %1417 = vmatprep.mubr.f32.mxu0 %v7495_v20  ;;  %v1260_v8 = vmul.f32 %v7495_v20, %v7495_v20  ;;  %1597 = vmatpush1.msra.mxu1 %v522_v25  ;;  %v532_v25 = vld [vmem:[%s10013_s1 + $0x480] sm:$0xff] }
 0x1c5   : > { %1418 = vmatmul.mubr.f32.vlgmr.msra.gmra.mxu0 %v7497_v21  ;;  %1598 = vmatprep.subr.mxu1 %v6632_v53 }
 0x1c6   : > { %1422 = vmatprep.mubr.f32.mxu0 %v1260_v8  ;;  %1599 = vmatpush1.msra.mxu1 %v521_v29 }
 0x1c7   : > { %5852 = vmatpush3.msra.mxu0 %v499_v9  ;;  %1600 = vmatprep.subr.mxu1 %v6632_v53 }
 0x1c8   : > { %5853 = vmatprep.subr.mxu0 %v514_v17  ;;  %1601 = vmatpush1.msra.mxu1 %v520_v30 }
 0x1c9   : > { %1423 = vmatmul.mubr.f32.gmra.mxu0 %v1259_v13  ;;  %1602 = vmatprep.subr.mxu1 %v6632_v53 }
 0x1ca   : > { %5854 = vmatpush3.msra.mxu0 %v498_v16  ;;  %1603 = vmatpush1.msra.mxu1 %v519_v31 }
 0x1cb   : > { %5855 = vmatprep.subr.mxu0 %v513_v33  ;;  %1604 = vmatprep.subr.mxu1 %v6632_v53 }
 0x1cc   : > { %5856 = vmatpush3.msra.mxu0 %v497_v34  ;;  %1605 = vmatpush1.msra.mxu1 %v518_v35 }
 0x1cd   : > { %5857 = vmatprep.subr.mxu0 %v512_v36  ;;  %1606 = vmatprep.subr.mxu1 %v6632_v53 }
 0x1ce   : > { %5858 = vmatpush3.msra.mxu0 %v496_v37  ;;  %1607 = vmatpush1.msra.mxu1 %v517_v42 }
 0x1cf   : > { %5859 = vmatprep.subr.mxu0 %v511_v41  ;;  %1608 = vmatprep.subr.mxu1 %v6632_v53 }
 0x1d0   : > { %5860 = vmatpush3.msra.mxu0 %v495_v26  ;;  %1609 = vmatpush1.msra.mxu1 %v516_v23 }
 0x1d1   : > { %5861 = vmatprep.subr.mxu0 %v510_v28  ;;  %1614 = vmatprep.subr.mxu1 %v6632_v53  ;;  %v546_v28 = vld [vmem:[%s10014_s2] sm:$0xff] }
 0x1d2   : > { %5862 = vmatpush3.msra.mxu0 %v494_v32  ;;  %5584 = vmatpush2.msk.msra.mxu1 %vm10028_vm10, %v545_v43  ;;  %v7711_v32 = vcombine.high %v546_v28, %v546_v28  ;;  %v547_v43 = vld [vmem:[%s10014_s2 + $0x8] sm:$0xff] }
 0x1d3   : > { %5863 = vmatprep.subr.mxu0 %v509_v44  ;;  %1616 = vmatprep.subr.mxu1 %v6632_v53  ;;  %v7719_v44 = vcombine.high %v547_v43, %v547_v43 }
 0x1d4   : > { %5864 = vmatpush3.msra.mxu0 %v493_v45  ;;  %1617 = vmatpush2.msra.mxu1 %v544_v47 }
 0x1d5   : > { %5865 = vmatprep.subr.mxu0 %v508_v38  ;;  %1618 = vmatprep.subr.mxu1 %v6632_v53 }
 0x1d6   : > { %5866 = vmatpush3.msra.mxu0 %v492_v39  ;;  %1619 = vmatpush2.msra.mxu1 %v543_v40 }
 0x1d7   : > { %5867 = vmatprep.subr.mxu0 %v507_v46  ;;  %1620 = vmatprep.subr.mxu1 %v6632_v53 }
 0x1d8   : > { %5868 = vmatpush3.msra.mxu0 %v491_v48  ;;  %1621 = vmatpush2.msra.mxu1 %v542_v49 }
 0x1d9   : > { %5869 = vmatprep.subr.mxu0 %v506_v50  ;;  %1622 = vmatprep.subr.mxu1 %v6632_v53 }
 0x1da   : > { %5870 = vmatpush3.msra.mxu0 %v490_v51  ;;  %1623 = vmatpush2.msra.mxu1 %v541_v56 }
 0x1db   : > { %5871 = vmatprep.subr.mxu0 %v505_v55  ;;  %1624 = vmatprep.subr.mxu1 %v6632_v53 }
 0x1dc   : > { %5872 = vmatpush3.msra.mxu0 %v489_v54  ;;  %1625 = vmatpush2.msra.mxu1 %v540_v52 }
 0x1dd   : > { %5873 = vmatprep.subr.mxu0 %v504_v57  ;;  %1626 = vmatprep.subr.mxu1 %v6632_v53 }
 0x1de   : > { %5874 = vmatpush3.msra.mxu0 %v488_v60  ;;  %1627 = vmatpush2.msra.mxu1 %v539_v62 }
 0x1df   : > { %5875 = vmatprep.subr.mxu0 %v503_v12  ;;  %1628 = vmatprep.subr.mxu1 %v6632_v53 }
 0x1e0   : > { %5876 = vmatpush3.msra.mxu0 %v487_v61  ;;  %1629 = vmatpush2.msra.mxu1 %v538_v2 }
 0x1e1   : > { %5877 = vmatprep.subr.mxu0 %v502_v3  ;;  %1630 = vmatprep.subr.mxu1 %v6632_v53 }
 0x1e2   : > { %5878 = vmatpush3.msra.mxu0 %v486_v15  ;;  %1631 = vmatpush2.msra.mxu1 %v537_v11 }
 0x1e3   : > { %5879 = vmatprep.subr.mxu0 %v501_v18  ;;  %1632 = vmatprep.subr.mxu1 %v6632_v53 }
 0x1e4   : > { %5880 = vmatpush3.msra.mxu0 %v485_v63  ;;  %1633 = vmatpush2.msra.mxu1 %v536_v0 }
 0x1e5   : > { %5881 = vmatprep.subr.mxu0 %v500_v1  ;;  %1634 = vmatprep.subr.mxu1 %v6632_v53 }
 0x1e6   : > { %5882 = vmatpush3.msra.mxu0 %v484_v7  ;;  %1635 = vmatpush2.msra.mxu1 %v535_v4 }
 0x1e7   : > { %1636 = vmatprep.subr.mxu1 %v6632_v53  ;;  %5587 = vmatprep.subr.msk.mxu0 %vm840_vm1, %v7711_v32 }
 0x1e8   : > { %1637 = vmatpush2.msra.mxu1 %v534_v5 }
 0x1e9   : > { %v1199_v22 = vpop.f32.mrf.mxu1  ;;  %1638 = vmatprep.subr.mxu1 %v6632_v53 }
 0x1ea   : > { %1639 = vmatpush2.msra.mxu1 %v533_v19  ;;  %v1200_v27 = vadd.f32 %v1199_v22, %v7335_v10 }
 0x1eb   : > { %v1201_v29 = vpop.f32.mrf.mxu1  ;;  %1640 = vmatprep.subr.mxu1 %v6632_v53 }
 0x1ec   : > { %v1202_v8 = vadd.f32 %v1201_v29, %v7335_v10  ;;  %1641 = vmatpush2.msra.mxu1 %v532_v25  ;;  %v7684_v30 = vmax.f32 %v1200_v27, 0.0 }
 0x1ed   : > { %v1203_v9 = vpop.f32.mrf.mxu1 }
 0x1ee   : > { %v7682_v17 = vmax.f32 %v1202_v8, 0.0  ;;  %v1263_v36 = vmul.f32 %v7684_v30, %v7684_v30 }
 0x1ef   : > { %v1204_v13 = vpop.f32.mrf.mxu1 }
 0x1f0   : > { %v1240_v16 = vpop.f32.mrf.mxu0  ;;  %1567 = vmatprep.mubr.f32.mxu0 %v7682_v17  ;;  %v1264_v31 = vmul.f32 %v7682_v17, %v7682_v17 }
 0x1f1   : > { %1568 = vmatmul.mubr.f32.vlgmr.msra.gmra.mxu0 %v7684_v30  ;;  %v1241_v33 = vadd.f32 %v1240_v16, %v7335_v10 }
 0x1f2   : > { %v1242_v34 = vpop.f32.mrf.mxu0  ;;  %1572 = vmatprep.mubr.f32.mxu0 %v1264_v31  ;;  %5588 = vmatpush1.msk.msra.mxu0 %vm840_vm1, %v546_v28 }
 0x1f3   : > { %v1243_v35 = vadd.f32 %v1242_v34, %v7335_v10  ;;  %v7696_v41 = vmax.f32 %v1241_v33, 0.0  ;;  %5591 = vmatprep.subr.msk.mxu0 %vm840_vm1, %v7719_v44  ;;  %v548_v34 = vld [vmem:[%s10014_s2 + $0x10] sm:$0xff] }
 0x1f4   : > { %v1244_v37 = vpop.f32.mrf.mxu0 }
 0x1f5   : > { %v7694_v42 = vmax.f32 %v1243_v35, 0.0  ;;  %1573 = vmatmul.mubr.f32.gmra.mxu0 %v1263_v36  ;;  %v1265_v10 = vmul.f32 %v7696_v41, %v7696_v41  ;;  %v7726_v35 = vcombine.high %v548_v34, %v548_v34 }
 0x1f6   : > { %v1245_v26 = vpop.f32.mrf.mxu0  ;;  %1761 = vmatprep.mubr.f32.mxu0 %v6632_v53 }
 0x1f7   : > { %v1266_v23 = vmul.f32 %v7694_v42, %v7694_v42  ;;  %5585 = vmatprep.mubr.msk.f32.mxu1 %vm10027_vm11, %v7694_v42  ;;  %v549_v26 = vld [vmem:[%s10014_s2 + $0x18] sm:$0xff] }
 0x1f8   : > { %1643 = vmatmul.mubr.f32.vlgmr.msra.gmra.mxu1 %v7696_v41 }
 0x1f9   : > { %5586 = vmatprep.mubr.msk.f32.mxu1 %vm10027_vm11, %v1266_v23  ;;  %v7738_v23 = vcombine.high %v549_v26, %v549_v26 }
 0x1fc   : > { %1648 = vmatmul.mubr.f32.gmra.mxu1 %v1265_v10  ;;  %v550_v10 = vld [vmem:[%s10014_s2 + $0x20] sm:$0xff] }
 0x1fd   : > { %2726 = vmatprep.mubr.bf16.mxu1 %v6630_v6  ;;  %v7750_v28 = vcombine.high %v550_v10, %v550_v10 }
 0x241   : > { %v5769_v45 = vpop.f32.mrf.mxu1 }
 0x243   : > { %v5770_v47 = vpop.f32.mrf.mxu1 }
 0x244   : > { %v5771_v55 = vadd.f32 %v5770_v47, %v5769_v45 }
 0x245   : > { %v5772_v38 = vpop.f32.mrf.mxu1 }
 0x247   : > { %v5773_v40 = vpop.f32.mrf.mxu1 }
 0x248   : > { %v5774_v62 = vadd.f32 %v5773_v40, %v5772_v38 }
 0x271   : > { %v5845_v48 = vpop.f32.mrf.mxu1 }
 0x273   : > { %v5846_v50 = vpop.f32.mrf.mxu1 }
 0x274   : > { %v5847_v12 = vadd.f32 %v5846_v50, %v5845_v48 }
 0x275   : > { %v5848_v54 = vpop.f32.mrf.mxu1 }
 0x277   : > { %v5849_v61 = vpop.f32.mrf.mxu1 }
 0x278   : > { %v5850_v63 = vadd.f32 %v5849_v61, %v5848_v54 }
 0x285   : > { %v5807_v39 = vpop.f32.mrf.mxu0 }
 0x287   : > { %v5808_v46 = vpop.f32.mrf.mxu0 }
 0x288   : > { %v5809_v51 = vadd.f32 %v5808_v46, %v5807_v39 }
 0x289   : > { %v5810_v49 = vpop.f32.mrf.mxu0 }
 0x28a   : > { %v1420_v52 = vadd.f32 %v5809_v51, %v5771_v55 }
 0x28b   : > { %v5811_v56 = vpop.f32.mrf.mxu0 }
 0x28c   : > { %v5812_v57 = vadd.f32 %v5811_v56, %v5810_v49  ;;  %v1495_v11 = vadd.f32 %v5847_v12, %v1420_v52 }
 0x28e   : > { %v1425_v3 = vadd.f32 %v5812_v57, %v5774_v62 }
 0x290   : > { %v1500_v5 = vadd.f32 %v5850_v63, %v1425_v3 }
 0x2b1   : > { %v5883_v60 = vpop.f32.mrf.mxu0 }
 0x2b3   : > { %v5884_v2 = vpop.f32.mrf.mxu0 }
 0x2b4   : > { %v5885_v15 = vadd.f32 %v5884_v2, %v5883_v60 }
 0x2b5   : > { %v5886_v18 = vpop.f32.mrf.mxu0 }
 0x2b6   : > { %v1570_v0 = vadd.f32 %v5885_v15, %v1495_v11 }
 0x2b7   : > { %v5887_v1 = vpop.f32.mrf.mxu0 }
 0x2b8   : > { %v5888_v7 = vadd.f32 %v5887_v1, %v5886_v18  ;;  %v1644_v4 = vpop.f32.mrf.mxu1 }
 0x2b9   : > { %v1645_v19 = vadd.f32 %v1644_v4, %v1570_v0 }
 0x2ba   : > { %v1646_v22 = vpop.f32.mrf.mxu1  ;;  %v1575_v25 = vadd.f32 %v5888_v7, %v1500_v5 }
 0x2bb   : > { %v1653_v27 = vmul.f32 0.00390625, %v1645_v19 }
 0x2bc   : > { %v1649_v29 = vpop.f32.mrf.mxu1 }
 0x2bd   : > { %v1650_v8 = vadd.f32 %v1649_v29, %v1575_v25  ;;  %v1655_v13 = vmul.f32 %v1653_v27, %v1653_v27 }
 0x2be   : > { %v1651_v9 = vpop.f32.mrf.mxu1 }
 0x2bf   : > { %v1654_v16 = vmul.f32 0.00390625, %v1650_v8 }
 0x2c1   : > { %v1656_v31 = vsub.f32 %v1654_v16, %v1655_v13 }
 0x2c3   : > { %v1657_v33 = vadd.f32 1e-05, %v1656_v31 }
 0x2c5   : > { %6243 = vrsqrt.f32 %v1657_v33 }
 0x2d2   : > { %v6244_v36 = vpop.eup %6243 }
 0x2d3   : > { %5589 = vmatmul.mubr.msk.f32.vlgmr.msra.gmra.mxu0 %vm10024_vm12, %v6244_v36  ;;  %v1659_v37 = vmul.f32 %v6244_v36, %v1653_v27 }
 0x2d4   : > { %1767 = vmatprep.mubr.f32.mxu0 %v6632_v53  ;;  %5592 = vmatpush1.msk.msra.mxu0 %vm840_vm1, %v547_v43 }
 0x2d5   : > { %5595 = vmatprep.subr.msk.mxu0 %vm840_vm1, %v7726_v35 }
 0x2d7   : > { %5590 = vmatmul.mubr.msk.f32.gmra.mxu0 %vm10024_vm12, %v1659_v37 }
 0x2d8   : > { %1838 = vmatprep.mubr.f32.mxu0 %v6632_v53 }
 0x2db   : > { %5593 = vmatmul.mubr.msk.f32.vlgmr.msra.gmra.mxu0 %vm10024_vm12, %v6244_v36 }
 0x2dc   : > { %1844 = vmatprep.mubr.f32.mxu0 %v6632_v53  ;;  %5596 = vmatpush1.msk.msra.mxu0 %vm840_vm1, %v548_v34 }
 0x2dd   : > { %5599 = vmatprep.subr.msk.mxu0 %vm840_vm1, %v7738_v23 }
 0x2df   : > { %5594 = vmatmul.mubr.msk.f32.gmra.mxu0 %vm10024_vm12, %v1659_v37 }
 0x2e0   : > { %1915 = vmatprep.mubr.f32.mxu0 %v6632_v53 }
 0x2e3   : > { %5597 = vmatmul.mubr.msk.f32.vlgmr.msra.gmra.mxu0 %vm10024_vm12, %v6244_v36 }
 0x2e4   : > { %1921 = vmatprep.mubr.f32.mxu0 %v6632_v53  ;;  %5600 = vmatpush1.msk.msra.mxu0 %vm840_vm1, %v549_v26 }
 0x2e5   : > { %5603 = vmatprep.subr.msk.mxu0 %vm840_vm1, %v7750_v28 }
 0x2e7   : > { %5598 = vmatmul.mubr.msk.f32.gmra.mxu0 %vm10024_vm12, %v1659_v37 }
 0x2e8   : > { %1992 = vmatprep.mubr.f32.mxu0 %v6632_v53 }
 0x2eb   : > { %5601 = vmatmul.mubr.msk.f32.vlgmr.msra.gmra.mxu0 %vm10024_vm12, %v6244_v36 }
 0x2ec   : > { %1998 = vmatprep.mubr.f32.mxu0 %v6632_v53  ;;  %5604 = vmatpush1.msk.msra.mxu0 %vm840_vm1, %v550_v10 }
 0x2ef   : > { %5602 = vmatmul.mubr.msk.f32.gmra.mxu0 %vm10024_vm12, %v1659_v37 }
 0x2f0   : > { %2069 = vmatprep.mubr.f32.mxu0 %v6632_v53 }
 0x2f3   : > { %5605 = vmatmul.mubr.msk.f32.vlgmr.msra.gmra.mxu0 %vm10024_vm12, %v6244_v36 }
 0x2f4   : > { %2075 = vmatprep.mubr.f32.mxu0 %v6632_v53 }
 0x2f7   : > { %5606 = vmatmul.mubr.msk.f32.gmra.mxu0 %vm10024_vm12, %v1659_v37  ;;  %vm7815_vm12 = vmor %vm2169_vm15, %vm2168_vm14  ;;  %vm2175_vm14 = vcmask 1022980  }
 0x2f8   : > { %2685 = vmatprep.mubr.bf16.mxu0 %v6630_v6  ;;  %vm7849_vm15 = vmor %vm2175_vm14, %vm840_vm1  ;;  %vm10034_vm14 = vcmask 31744  }
 0x393   : > { %v1763_v43 = vpop.f32.mrf.mxu0 }
 0x394   : > { %v2082_v38 = vmul.f32 %v1763_v43, %v7339_v24 }
 0x395   : > { %v1765_v45 = vpop.f32.mrf.mxu0 }
 0x396   : > { %v2083_v39 = vmul.f32 %v1765_v45, %v7341_v14 }
 0x397   : > { %v1769_v47 = vpop.f32.mrf.mxu0 }
 0x398   : > { %v7771_v46 = vsub.f32 %v2082_v38, %v1769_v47 }
 0x399   : > { %v1771_v40 = vpop.f32.mrf.mxu0 }
 0x39a   : > { %v7773_v48 = vsub.f32 %v2083_v39, %v1771_v40 }
 0x39b   : > { %v1840_v49 = vpop.f32.mrf.mxu0 }
 0x39c   : > { %v5727_v50 = vpack.c.bf16 %v7773_v48, %v7771_v46  ;;  %v2084_v55 = vmul.f32 %v1840_v49, %v7497_v21 }
 0x39d   : > { %v1842_v51 = vpop.f32.mrf.mxu0 }
 0x39e   : > { %2137 = vrot.lane.b32.xlu0 %v5727_v50, %s6633_s13  ;;  %v2085_v24 = vmul.f32 %v1842_v51, %v7495_v20 }
 0x39f   : > { %v1846_v56 = vpop.f32.mrf.mxu0 }
 0x3a0   : > { %v7780_v14 = vsub.f32 %v2084_v55, %v1846_v56 }
 0x3a1   : > { %v1848_v54 = vpop.f32.mrf.mxu0 }
 0x3a2   : > { %v7782_v52 = vsub.f32 %v2085_v24, %v1848_v54 }
 0x3a3   : > { %v1917_v57 = vpop.f32.mrf.mxu0 }
 0x3a4   : > { %v5728_v60 = vpack.c.bf16 %v7782_v52, %v7780_v14  ;;  %v2086_v61 = vmul.f32 %v1917_v57, %v7447_v59 }
 0x3a5   : > { %v1919_v62 = vpop.f32.mrf.mxu0 }
 0x3a6   : > { %2139 = vrot.lane.b32.xlu1 %v5728_v60, %s6633_s13  ;;  %v2087_v2 = vmul.f32 %v1919_v62, %v7445_v58 }
 0x3a7   : > { %v1923_v12 = vpop.f32.mrf.mxu0 }
 0x3a8   : > { %v7789_v3 = vsub.f32 %v2086_v61, %v1923_v12 }
 0x3a9   : > { %v1925_v21 = vpop.f32.mrf.mxu0 }
 0x3aa   : > { %v7791_v20 = vsub.f32 %v2087_v2, %v1925_v21  ;;  %v6235_v2 = vld [vmem:[#allocation2 + $0x28] ss:$0 sps:$4 sm:$0xff]  }
 0x3ab   : > { %v1994_v15 = vpop.f32.mrf.mxu0 }
 0x3ac   : > { %v5729_v11 = vpack.c.bf16 %v7791_v20, %v7789_v3  ;;  %v2088_v59 = vmul.f32 %v1994_v15, %v7684_v30 }
 0x3ad   : > { %v1996_v18 = vpop.f32.mrf.mxu0 }
 0x3ae   : > { %2141 = vrot.lane.b32.xlu0 %v5729_v11, %s6633_s13  ;;  %v2089_v58 = vmul.f32 %v1996_v18, %v7682_v17 }
 0x3af   : > { %v2000_v63 = vpop.f32.mrf.mxu0 }
 0x3b0   : > { %v7799_v1 = vsub.f32 %v2088_v59, %v2000_v63 }
 0x3b1   : > { %v2002_v0 = vpop.f32.mrf.mxu0 }
 0x3b2   : > { %v7801_v7 = vsub.f32 %v2089_v58, %v2002_v0 }
 0x3b3   : > { %v2071_v4 = vpop.f32.mrf.mxu0 }
 0x3b4   : > { %v5730_v5 = vpack.c.bf16 %v7801_v7, %v7799_v1  ;;  %v2090_v25 = vmul.f32 %v2071_v4, %v7696_v41 }
 0x3b5   : > { %v2073_v19 = vpop.f32.mrf.mxu0 }
 0x3b6   : > { %2143 = vrot.lane.b32.xlu1 %v5730_v5, %s6633_s13  ;;  %v2091_v30 = vmul.f32 %v2073_v19, %v7694_v42 }
 0x3b7   : > { %v2077_v22 = vpop.f32.mrf.mxu0 }
 0x3b8   : > { %v7808_v27 = vsub.f32 %v2090_v25, %v2077_v22 }
 0x3b9   : > { %v2079_v17 = vpop.f32.mrf.mxu0 }
 0x3ba   : > { %v7810_v29 = vsub.f32 %v2091_v30, %v2079_v17 }
 0x3bc   : > { %v5731_v8 = vpack.c.bf16 %v7810_v29, %v7808_v27 }
 0x3be   : > { %2145 = vrot.lane.b32.xlu1 %v5731_v8, %s6633_s13 }
 0x410   : > { %v2138_v9 = vpop.permute.xlu0 %2137 }
 0x411   : > { %v2147_v41 = vrot.slane %v2138_v9, 4 }
 0x413   : > { %v2153_v42 = vsel %vm2152_vm13, %v2147_v41, %v2138_v9 }
 0x414   : > { %2171 = vst.msk [vmem:[#allocation2] sm:$0xff] %vm7815_vm12, %v2153_v42 }
 0x418   : > { %v2140_v34 = vpop.permute.xlu1 %2139 }
 0x419   : > { %v2148_v36 = vrot.slane %v2140_v34, 4 }
 0x41b   : > { %v2178_v16 = vld [vmem:[#allocation2] sm:$0xff]  ;;  %v2155_v26 = vsel %vm840_vm1, %v2147_v41, %v2148_v36 }
 0x41c   : > { %v7822_v31 = vcombine.low %v2178_v16, %v2178_v16  ;;  %v7824_v33 = vcombine.high %v2178_v16, %v2178_v16  ;;  %v2156_v43 = vsel %vm2152_vm13, %v2155_v26, %v2140_v34 }
 0x41d   : > { %v7858_v40 = vcombine.low %v2156_v43, %v2156_v43  ;;  %v7883_v51 = vcombine.high %v2156_v43, %v2156_v43 }
 0x41e   : > { %2421 = vrot.lane.b32.xlu0 %v7822_v31, %s6623_s24  ;;  %2423 = vrot.lane.b32.xlu1 %v7824_v33, %s6623_s24 }
 0x420   : > { %v2142_v50 = vpop.permute.xlu0 %2141 }
 0x421   : > { %v2149_v56 = vrot.slane %v2142_v50, 4 }
 0x422   : > { %2389 = vrot.lane.b32.xlu0 %v7822_v31, %s6625_s26  ;;  %2359 = vrot.lane.b32.xlu1 %v7824_v33, %s6624_s25 }
 0x423   : > { %v2157_v55 = vsel %vm840_vm1, %v2148_v36, %v2149_v56 }
 0x424   : > { %v2158_v24 = vsel %vm2152_vm13, %v2157_v55, %v2142_v50 }
 0x425   : > { %v7899_v54 = vcombine.low %v2158_v24, %v2158_v24  ;;  %v7909_v57 = vcombine.high %v2158_v24, %v2158_v24 }
 0x426   : > { %2325 = vrot.lane.b32.xlu0 %v7822_v31, %s6627_s28  ;;  %2391 = vrot.lane.b32.xlu1 %v7824_v33, %s6625_s26 }
 0x428   : > { %v2144_v37 = vpop.permute.xlu1 %2143 }
 0x429   : > { %v2150_v45 = vrot.slane %v2144_v37, 4 }
 0x42a   : > { %2267 = vrot.lane.b32.xlu0 %v7822_v31, %s6629_s30  ;;  %2357 = vrot.lane.b32.xlu1 %v7822_v31, %s6624_s25 }
 0x42b   : > { %v2159_v60 = vsel %vm840_vm1, %v2149_v56, %v2150_v45 }
 0x42c   : > { %v2160_v62 = vsel %vm2152_vm13, %v2159_v60, %v2144_v37 }
 0x42d   : > { %v7921_v12 = vcombine.low %v2160_v62, %v2160_v62  ;;  %v7959_v61 = vcombine.high %v2160_v62, %v2160_v62 }
 0x42e   : > { %2211 = vrot.lane.b32.xlu0 %v7824_v33, %s6631_s12  ;;  %2298 = vrot.lane.b32.xlu1 %v7824_v33, %s6626_s27 }
 0x430   : > { %v2146_v10 = vpop.permute.xlu1 %2145 }
 0x431   : > { %v2151_v47 = vrot.slane %v2146_v10, 4 }
 0x432   : > { %2209 = vrot.lane.b32.xlu0 %v7822_v31, %s6631_s12  ;;  %2327 = vrot.lane.b32.xlu1 %v7824_v33, %s6627_s28 }
 0x433   : > { %v2161_v39 = vsel %vm840_vm1, %v2150_v45, %v2151_v47 }
 0x434   : > { %v2162_v49 = vsel %vm2152_vm13, %v2161_v39, %v2146_v10 }
 0x435   : > { %2177 = vst.msk [vmem:[#allocation2 + $0x20] sm:$0xff] %vm7849_vm15, %v2162_v49 }
 0x436   : > { %2425 = vrot.lane.b32.xlu0 %v7858_v40, %s6623_s24  ;;  %2296 = vrot.lane.b32.xlu1 %v7822_v31, %s6626_s27 }
 0x43a   : > { %2361 = vrot.lane.b32.xlu0 %v7858_v40, %s6624_s25  ;;  %2240 = vrot.lane.b32.xlu1 %v7824_v33, %s10025_s29 }
 0x43c   : > { %v2182_v58 = vld [vmem:[#allocation2 + $0x20] sm:$0xff] }
 0x43d   : > { %v7980_v5 = vcombine.low %v2182_v58, %v2182_v58  ;;  %v7994_v17 = vcombine.high %v2182_v58, %v2182_v58 }
 0x43e   : > { %2393 = vrot.lane.b32.xlu0 %v7858_v40, %s6625_s26  ;;  %2269 = vrot.lane.b32.xlu1 %v7824_v33, %s6629_s30 }
 0x442   : > { %2300 = vrot.lane.b32.xlu0 %v7858_v40, %s6626_s27  ;;  %2238 = vrot.lane.b32.xlu1 %v7822_v31, %s10025_s29 }
 0x446   : > { %2329 = vrot.lane.b32.xlu0 %v7858_v40, %s6627_s28  ;;  %2213 = vrot.lane.b32.xlu1 %v7858_v40, %s6631_s12 }
 0x44a   : > { %2242 = vrot.lane.b32.xlu0 %v7858_v40, %s10025_s29  ;;  %2427 = vrot.lane.b32.xlu1 %v7883_v51, %s6623_s24 }
 0x44e   : > { %2271 = vrot.lane.b32.xlu0 %v7858_v40, %s6629_s30  ;;  %2395 = vrot.lane.b32.xlu1 %v7883_v51, %s6625_s26 }
 0x452   : > { %2363 = vrot.lane.b32.xlu0 %v7883_v51, %s6624_s25  ;;  %2331 = vrot.lane.b32.xlu1 %v7883_v51, %s6627_s28 }
 0x456   : > { %2302 = vrot.lane.b32.xlu0 %v7883_v51, %s6626_s27  ;;  %2429 = vrot.lane.b32.xlu1 %v7899_v54, %s6623_s24 }
 0x45a   : > { %2244 = vrot.lane.b32.xlu0 %v7883_v51, %s10025_s29  ;;  %2397 = vrot.lane.b32.xlu1 %v7899_v54, %s6625_s26 }
 0x45e   : > { %2431 = vrot.lane.b32.xlu0 %v7909_v57, %s6623_s24  ;;  %2333 = vrot.lane.b32.xlu1 %v7899_v54, %s6627_s28 }
 0x462   : > { %2367 = vrot.lane.b32.xlu0 %v7909_v57, %s6624_s25  ;;  %2275 = vrot.lane.b32.xlu1 %v7899_v54, %s6629_s30 }
 0x466   : > { %2399 = vrot.lane.b32.xlu0 %v7909_v57, %s6625_s26  ;;  %2433 = vrot.lane.b32.xlu1 %v7921_v12, %s6623_s24 }
 0x46a   : > { %2365 = vrot.lane.b32.xlu0 %v7899_v54, %s6624_s25  ;;  %2369 = vrot.lane.b32.xlu1 %v7921_v12, %s6624_s25 }
 0x46e   : > { %2306 = vrot.lane.b32.xlu0 %v7909_v57, %s6626_s27  ;;  %2401 = vrot.lane.b32.xlu1 %v7921_v12, %s6625_s26 }
 0x472   : > { %2335 = vrot.lane.b32.xlu0 %v7909_v57, %s6627_s28  ;;  %2308 = vrot.lane.b32.xlu1 %v7921_v12, %s6626_s27 }
 0x476   : > { %2304 = vrot.lane.b32.xlu0 %v7899_v54, %s6626_s27  ;;  %2337 = vrot.lane.b32.xlu1 %v7921_v12, %s6627_s28 }
 0x47a   : > { %2248 = vrot.lane.b32.xlu0 %v7909_v57, %s10025_s29  ;;  %2250 = vrot.lane.b32.xlu1 %v7921_v12, %s10025_s29 }
 0x47e   : > { %2277 = vrot.lane.b32.xlu0 %v7909_v57, %s6629_s30  ;;  %2279 = vrot.lane.b32.xlu1 %v7921_v12, %s6629_s30 }
 0x482   : > { %2246 = vrot.lane.b32.xlu0 %v7899_v54, %s10025_s29  ;;  %2221 = vrot.lane.b32.xlu1 %v7921_v12, %s6631_s12 }
 0x486   : > { %2219 = vrot.lane.b32.xlu0 %v7909_v57, %s6631_s12  ;;  %2273 = vrot.lane.b32.xlu1 %v7883_v51, %s6629_s30 }
 0x48a   : > { %2217 = vrot.lane.b32.xlu0 %v7899_v54, %s6631_s12  ;;  %2435 = vrot.lane.b32.xlu1 %v7959_v61, %s6623_s24 }
 0x48e   : > { %2215 = vrot.lane.b32.xlu0 %v7883_v51, %s6631_s12  ;;  %2371 = vrot.lane.b32.xlu1 %v7959_v61, %s6624_s25 }
 0x490   : > { %v2422_v21 = vpop.permute.xlu0 %2421  ;;  %v2424_v15 = vpop.permute.xlu1 %2423 }
 0x491   : > { %v2443_v8 = vsel %vm829_vm0, %v2422_v21, %v2424_v15 }
 0x492   : > { %2441 = vrot.lane.b32.xlu0 %v6235_v2, %s6623_s24  ;;  %2403 = vrot.lane.b32.xlu1 %v7959_v61, %s6625_s26  ;;  %v2624_v16 = vsel %vm840_vm1, %v2443_v8, 0 }
 0x494   : > { %v2390_v11 = vpop.permute.xlu0 %2389  ;;  %v2360_v18 = vpop.permute.xlu1 %2359 }
 0x496   : > { %2377 = vrot.lane.b32.xlu0 %v6235_v2, %s6624_s25  ;;  %2310 = vrot.lane.b32.xlu1 %v7959_v61, %s6626_s27 }
 0x498   : > { %v2326_v63 = vpop.permute.xlu0 %2325  ;;  %v2392_v59 = vpop.permute.xlu1 %2391 }
 0x499   : > { %v2411_v47 = vsel %vm796_vm3, %v2390_v11, %v2392_v59 }
 0x49a   : > { %2409 = vrot.lane.b32.xlu0 %v6235_v2, %s6625_s26  ;;  %2339 = vrot.lane.b32.xlu1 %v7959_v61, %s6627_s28 }
 0x49c   : > { %v7978_v0 = vpop.permute.xlu0 %2267  ;;  %v2358_v4 = vpop.permute.xlu1 %2357 }
 0x49d   : > { %v2379_v37 = vsel %vm763_vm2, %v2358_v4, %v2360_v18 }
 0x49e   : > { %2252 = vrot.lane.b32.xlu1 %v7959_v61, %s10025_s29  ;;  %2437 = vrot.lane.b32.xlu0 %v7980_v5, %s6623_s24  ;;  %v2575_v49 = vsel %vm840_vm1, %v2379_v37, %v2411_v47  ;;  %v2614_v37 = vld [vmem:[%s10018_s6] sm:$0xff] }
 0x4a0   : > { %v7986_v19 = vpop.permute.xlu0 %2211  ;;  %v2299_v22 = vpop.permute.xlu1 %2298 }
 0x4a2   : > { %2281 = vrot.lane.b32.xlu1 %v7959_v61, %s6629_s30  ;;  %2373 = vrot.lane.b32.xlu0 %v7980_v5, %s6624_s25 }
 0x4a4   : > { %v7992_v25 = vpop.permute.xlu0 %2209  ;;  %v2328_v30 = vpop.permute.xlu1 %2327 }
 0x4a5   : > { %v2345_v21 = vsel %vm728_vm5, %v2326_v63, %v2328_v30 }
 0x4a6   : > { %2439 = vrot.lane.b32.xlu1 %v7994_v17, %s6623_s24  ;;  %2405 = vrot.lane.b32.xlu0 %v7980_v5, %s6625_s26 }
 0x4a8   : > { %v8001_v9 = vpop.permute.xlu0 %2425  ;;  %v2297_v41 = vpop.permute.xlu1 %2296 }
 0x4a9   : > { %v2444_v42 = vsel %vm829_vm0, %v2424_v15, %v8001_v9  ;;  %v2316_v55 = vsel %vm698_vm4, %v2297_v41, %v2299_v22 }
 0x4aa   : > { %2375 = vrot.lane.b32.xlu1 %v7994_v17, %s6624_s25  ;;  %2312 = vrot.lane.b32.xlu0 %v7980_v5, %s6626_s27  ;;  %v2535_v11 = vsel %vm840_vm1, %v2316_v55, %v2345_v21 }
 0x4ab   : > { %5623 = vmatprep.subr.msk.bf16.mxu0 %vm840_vm1, %v2444_v42 }
 0x4ac   : > { %2660 = vmatpush1.bf16.msra.mxu0 %v2624_v16  ;;  %v8011_v34 = vpop.permute.xlu0 %2361  ;;  %v2241_v36 = vpop.permute.xlu1 %2240 }
 0x4ad   : > { %v2380_v43 = vsel %vm763_vm2, %v2360_v18, %v8011_v34 }
 0x4ae   : > { %2407 = vrot.lane.b32.xlu1 %v7994_v17, %s6625_s26  ;;  %2341 = vrot.lane.b32.xlu0 %v7980_v5, %s6627_s28 }
 0x4b0   : > { %v8018_v26 = vpop.permute.xlu0 %2393  ;;  %v2270_v10 = vpop.permute.xlu1 %2269 }
 0x4b1   : > { %v2412_v45 = vsel %vm796_vm3, %v2392_v59, %v8018_v26  ;;  %v2287_v41 = vsel %vm668_vm7, %v7978_v0, %v2270_v10 }
 0x4b2   : > { %2223 = vrot.lane.b32.xlu1 %v7959_v61, %s6631_s12  ;;  %2254 = vrot.lane.b32.xlu0 %v7980_v5, %s10025_s29  ;;  %v2579_v39 = vsel %vm840_vm1, %v2380_v43, %v2412_v45 }
 0x4b3   : > { %2661 = vmatprep.subr.bf16.mxu0 %v2579_v39 }
 0x4b4   : > { %v8031_v50 = vpop.permute.xlu0 %2300  ;;  %2662 = vmatpush1.bf16.msra.mxu0 %v2575_v49  ;;  %v2239_v56 = vpop.permute.xlu1 %2238 }
 0x4b5   : > { %v2317_v62 = vsel %vm698_vm4, %v2299_v22, %v8031_v50  ;;  %v2258_v63 = vsel %vm638_vm6, %v2239_v56, %v2241_v36 }
 0x4b6   : > { %2314 = vrot.lane.b32.xlu1 %v7994_v17, %s6626_s27  ;;  %2283 = vrot.lane.b32.xlu0 %v7980_v5, %s6629_s30  ;;  %v2495_v16 = vsel %vm840_vm1, %v2258_v63, %v2287_v41 }
 0x4b8   : > { %v8038_v24 = vpop.permute.xlu0 %2329  ;;  %v8040_v60 = vpop.permute.xlu1 %2213 }
 0x4b9   : > { %v2346_v2 = vsel %vm728_vm5, %v2328_v30, %v8038_v24  ;;  %v2230_v22 = vsel %vm608_vm8, %v7986_v19, %v8040_v60 }
 0x4ba   : > { %2256 = vrot.lane.b32.xlu1 %v7994_v17, %s10025_s29  ;;  %2343 = vrot.lane.b32.xlu0 %v7994_v17, %s6627_s28  ;;  %v2539_v15 = vsel %vm840_vm1, %v2317_v62, %v2346_v2  ;;  %v2459_v0 = vsel %vm840_vm1, %v7824_v33, %v2230_v22 }
 0x4bb   : > { %2663 = vmatprep.subr.bf16.mxu0 %v2539_v15 }
 0x4bc   : > { %v8053_v18 = vpop.permute.xlu0 %2242  ;;  %2664 = vmatpush1.bf16.msra.mxu0 %v2535_v11  ;;  %v2428_v59 = vpop.permute.xlu1 %2427 }
 0x4bd   : > { %v2259_v30 = vsel %vm638_vm6, %v2241_v36, %v8053_v18  ;;  %v2229_v36 = vsel %vm608_vm8, %v7992_v25, %v7986_v19  ;;  %v8090_v19 = vld [vmem:[%s10017_s5] sm:$0xf] }
 0x4be   : > { %2227 = vrot.lane.b32.xlu1 %v7994_v17, %s6631_s12  ;;  %2225 = vrot.lane.b32.xlu0 %v7980_v5, %s6631_s12  ;;  %v2455_v47 = vsel %vm840_vm1, %v7822_v31, %v2229_v36 }
 0x4c0   : > { %v8060_v58 = vpop.permute.xlu0 %2271  ;;  %v2396_v4 = vpop.permute.xlu1 %2395 }
 0x4c1   : > { %v2288_v8 = vsel %vm668_vm7, %v2270_v10, %v8060_v58  ;;  %v2445_v10 = vsel %vm829_vm0, %v8001_v9, %v2428_v59 }
 0x4c2   : > { %2285 = vrot.lane.b32.xlu0 %v7994_v17, %s6629_s30  ;;  %v2499_v42 = vsel %vm840_vm1, %v2259_v30, %v2288_v8  ;;  %v2630_v33 = vsel %vm840_vm1, %v2445_v10, 0 }
 0x4c3   : > { %2665 = vmatprep.subr.bf16.mxu0 %v2499_v42 }
 0x4c4   : > { %v2364_v43 = vpop.permute.xlu0 %2363  ;;  %2666 = vmatpush1.bf16.msra.mxu0 %v2495_v16  ;;  %v2332_v45 = vpop.permute.xlu1 %2331  ;;  %v2413_v16 = vsel %vm796_vm3, %v8018_v26, %v2396_v4 }
 0x4c5   : > { %2667 = vmatprep.subr.bf16.mxu0 %v2459_v0  ;;  %v2381_v22 = vsel %vm763_vm2, %v8011_v34, %v2364_v43 }
 0x4c6   : > { %2617 = vperm.xlu0 %6216, %v2614_v37   ;;  %v2583_v36 = vsel %vm840_vm1, %v2381_v22, %v2413_v16 }
 0x4c8   : > { %v2303_v39 = vpop.permute.xlu0 %2302  ;;  %2668 = vmatpush1.bf16.msra.mxu0 %v2455_v47  ;;  %v2430_v49 = vpop.permute.xlu1 %2429 }
 0x4c9   : > { %v2446_v25 = vsel %vm829_vm0, %v2428_v59, %v2430_v49 }
 0x4ca   : > { %5625 = vmatprep.subr.msk.bf16.mxu1 %vm840_vm1, %v2446_v25 }
 0x4cb   : > { %2701 = vmatpush1.bf16.msra.mxu1 %v2630_v33  ;;  %5624 = vmatmul.mubr.msk.bf16.vlgmr.msra.gmra.mxu0 %vm10029_vm9, %v8090_v19 }
 0x4cc   : > { %v8097_v9 = vpop.permute.xlu0 %2244  ;;  %v2398_v31 = vpop.permute.xlu1 %2397  ;;  %2767 = vmatprep.mubr.bf16.mxu0 %v6630_v6 }
 0x4cd   : > { %v2414_v41 = vsel %vm796_vm3, %v2396_v4, %v2398_v31 }
 0x4d0   : > { %v2432_v56 = vpop.permute.xlu0 %2431  ;;  %v2334_v55 = vpop.permute.xlu1 %2333 }
 0x4d1   : > { %v2447_v21 = vsel %vm829_vm0, %v2430_v49, %v2432_v56 }
 0x4d2   : > { %v2636_v63 = vsel %vm840_vm1, %v2447_v21, 0  ;;  %v2348_v21 = vsel %vm728_vm5, %v2332_v45, %v2334_v55 }
 0x4d4   : > { %v2368_v62 = vpop.permute.xlu0 %2367  ;;  %v8100_v2 = vpop.permute.xlu1 %2275 }
 0x4d8   : > { %v2400_v15 = vpop.permute.xlu0 %2399  ;;  %v8103_v11 = vpop.permute.xlu1 %2433 }
 0x4d9   : > { %v2448_v59 = vsel %vm829_vm0, %v2432_v56, %v8103_v11  ;;  %v2415_v49 = vsel %vm796_vm3, %v2398_v31, %v2400_v15  ;;  %v2318_v56 = vsel %vm698_vm4, %v8031_v50, %v2303_v39  ;;  %v2347_v50 = vsel %vm728_vm5, %v8038_v24, %v2332_v45 }
 0x4da   : > { %5627 = vmatprep.subr.msk.bf16.mxu0 %vm840_vm1, %v2448_v59  ;;  %v2543_v16 = vsel %vm840_vm1, %v2318_v56, %v2347_v50 }
 0x4db   : > { %2742 = vmatpush1.bf16.msra.mxu0 %v2636_v63 }
 0x4dc   : > { %v2366_v30 = vpop.permute.xlu0 %2365  ;;  %v8111_v8 = vpop.permute.xlu1 %2369 }
 0x4dd   : > { %v2382_v42 = vsel %vm763_vm2, %v2364_v43, %v2366_v30  ;;  %v2383_v0 = vsel %vm763_vm2, %v2366_v30, %v2368_v62  ;;  %v2384_v47 = vsel %vm763_vm2, %v2368_v62, %v8111_v8 }
 0x4de   : > { %v2587_v37 = vsel %vm840_vm1, %v2382_v42, %v2414_v41  ;;  %v2591_v4 = vsel %vm840_vm1, %v2383_v0, %v2415_v49 }
 0x4df   : > { %2702 = vmatprep.subr.bf16.mxu1 %v2587_v37 }
 0x4e0   : > { %v2307_v10 = vpop.permute.xlu0 %2306  ;;  %2703 = vmatpush1.bf16.msra.mxu1 %v2583_v36  ;;  %v8120_v34 = vpop.permute.xlu1 %2401 }
 0x4e1   : > { %v2416_v43 = vsel %vm796_vm3, %v2400_v15, %v8120_v34 }
 0x4e2   : > { %v2595_v26 = vsel %vm840_vm1, %v2384_v47, %v2416_v43 }
 0x4e3   : > { %2743 = vmatprep.subr.bf16.mxu0 %v2595_v26 }
 0x4e4   : > { %v2336_v25 = vpop.permute.xlu0 %2335  ;;  %2744 = vmatpush1.bf16.msra.mxu0 %v2591_v4  ;;  %v8129_v33 = vpop.permute.xlu1 %2308 }
 0x4e5   : > { %v2349_v62 = vsel %vm728_vm5, %v2334_v55, %v2336_v25  ;;  %v2321_v31 = vsel %vm698_vm4, %v2307_v10, %v8129_v33 }
 0x4e8   : > { %v2305_v59 = vpop.permute.xlu0 %2304  ;;  %v8135_v63 = vpop.permute.xlu1 %2337 }
 0x4e9   : > { %v2319_v15 = vsel %vm698_vm4, %v2303_v39, %v2305_v59  ;;  %v2320_v22 = vsel %vm698_vm4, %v2305_v59, %v2307_v10  ;;  %v2350_v30 = vsel %vm728_vm5, %v2336_v25, %v8135_v63  ;;  %v2260_v25 = vsel %vm638_vm6, %v8053_v18, %v8097_v9 }
 0x4ea   : > { %v2547_v41 = vsel %vm840_vm1, %v2319_v15, %v2348_v21  ;;  %v2555_v55 = vsel %vm840_vm1, %v2321_v31, %v2350_v30  ;;  %v2551_v42 = vsel %vm840_vm1, %v2320_v22, %v2349_v62 }
 0x4eb   : > { %2704 = vmatprep.subr.bf16.mxu1 %v2547_v41  ;;  %2745 = vmatprep.subr.bf16.mxu0 %v2555_v55 }
 0x4ec   : > { %v2249_v37 = vpop.permute.xlu0 %2248  ;;  %2705 = vmatpush1.bf16.msra.mxu1 %v2543_v16  ;;  %2746 = vmatpush1.bf16.msra.mxu0 %v2551_v42  ;;  %v8149_v39 = vpop.permute.xlu1 %2250 }
 0x4ed   : > { %v2263_v24 = vsel %vm638_vm6, %v2249_v37, %v8149_v39 }
 0x4f0   : > { %v2278_v36 = vpop.permute.xlu0 %2277  ;;  %v8151_v0 = vpop.permute.xlu1 %2279 }
 0x4f1   : > { %v2292_v45 = vsel %vm668_vm7, %v2278_v36, %v8151_v0  ;;  %v2291_v49 = vsel %vm668_vm7, %v8100_v2, %v2278_v36 }
 0x4f2   : > { %v2515_v10 = vsel %vm840_vm1, %v2263_v24, %v2292_v45 }
 0x4f3   : > { %2747 = vmatprep.subr.bf16.mxu0 %v2515_v10 }
 0x4f4   : > { %v2247_v47 = vpop.permute.xlu0 %2246  ;;  %v8158_v43 = vpop.permute.xlu1 %2221 }
 0x4f5   : > { %v2262_v26 = vsel %vm638_vm6, %v2247_v47, %v2249_v37  ;;  %v2261_v62 = vsel %vm638_vm6, %v8097_v9, %v2247_v47 }
 0x4f6   : > { %v2511_v4 = vsel %vm840_vm1, %v2262_v26, %v2291_v49 }
 0x4f7   : > { %2748 = vmatpush1.bf16.msra.mxu0 %v2511_v4 }
 0x4f8   : > { %v2220_v56 = vpop.permute.xlu0 %2219  ;;  %v2274_v21 = vpop.permute.xlu1 %2273 }
 0x4f9   : > { %v2234_v59 = vsel %vm608_vm8, %v2220_v56, %v8158_v43  ;;  %v2289_v31 = vsel %vm668_vm7, %v8060_v58, %v2274_v21  ;;  %v2290_v15 = vsel %vm668_vm7, %v2274_v21, %v8100_v2 }
 0x4fa   : > { %v2507_v22 = vsel %vm840_vm1, %v2261_v62, %v2290_v15  ;;  %v2475_v30 = vsel %vm840_vm1, %v7909_v57, %v2234_v59  ;;  %v2503_v18 = vsel %vm840_vm1, %v2260_v25, %v2289_v31 }
 0x4fb   : > { %2706 = vmatprep.subr.bf16.mxu1 %v2507_v22  ;;  %2749 = vmatprep.subr.bf16.mxu0 %v2475_v30 }
 0x4fc   : > { %v2218_v50 = vpop.permute.xlu0 %2217  ;;  %2707 = vmatpush1.bf16.msra.mxu1 %v2503_v18  ;;  %v2436_v9 = vpop.permute.xlu1 %2435 }
 0x4fd   : > { %v2233_v41 = vsel %vm608_vm8, %v2218_v50, %v2220_v56 }
 0x4fe   : > { %v2471_v58 = vsel %vm840_vm1, %v7899_v54, %v2233_v41 }
 0x4ff   : > { %2750 = vmatpush1.bf16.msra.mxu0 %v2471_v58 }
 0x500   : > { %v2216_v55 = vpop.permute.xlu0 %2215  ;;  %v2372_v2 = vpop.permute.xlu1 %2371 }
 0x501   : > { %v2231_v42 = vsel %vm608_vm8, %v8040_v60, %v2216_v55  ;;  %v2232_v57 = vsel %vm608_vm8, %v2216_v55, %v2218_v50  ;;  %v2385_v22 = vsel %vm763_vm2, %v8111_v8, %v2372_v2 }
 0x502   : > { %5628 = vmatmul.mubr.msk.bf16.vlgmr.msra.gmra.mxu0 %vm10029_vm9, %v8090_v19  ;;  %v2467_v16 = vsel %vm840_vm1, %v7883_v51, %v2232_v57  ;;  %v2463_v37 = vsel %vm840_vm1, %v7858_v40, %v2231_v42  ;;  %v2449_v51 = vsel %vm829_vm0, %v8103_v11, %v2436_v9 }
 0x503   : > { %2708 = vmatprep.subr.bf16.mxu1 %v2467_v16  ;;  %2849 = vmatprep.mubr.bf16.mxu0 %v6630_v6  ;;  %v2642_v26 = vsel %vm840_vm1, %v2449_v51, 0 }
 0x504   : > { %v2442_v54 = vpop.permute.xlu0 %2441  ;;  %2709 = vmatpush1.bf16.msra.mxu1 %v2463_v37  ;;  %v2404_v36 = vpop.permute.xlu1 %2403 }
 0x505   : > { %v2417_v56 = vsel %vm796_vm3, %v8120_v34, %v2404_v36 }
 0x506   : > { %v2599_v34 = vsel %vm840_vm1, %v2385_v22, %v2417_v56 }
 0x507   : > { %5626 = vmatmul.mubr.msk.bf16.vlgmr.msra.gmra.mxu1 %vm10029_vm9, %v8090_v19 }
 0x508   : > { %v2378_v60 = vpop.permute.xlu0 %2377  ;;  %v2311_v24 = vpop.permute.xlu1 %2310  ;;  %2808 = vmatprep.mubr.bf16.mxu1 %v6630_v6 }
 0x50c   : > { %v2410_v45 = vpop.permute.xlu0 %2409  ;;  %v2340_v10 = vpop.permute.xlu1 %2339 }
 0x50d   : > { %v2351_v41 = vsel %vm728_vm5, %v8135_v63, %v2340_v10 }
 0x510   : > { %v2438_v47 = vpop.permute.xlu0 %2437  ;;  %v2253_v40 = vpop.permute.xlu1 %2252 }
 0x511   : > { %v2450_v49 = vsel %vm829_vm0, %v2436_v9, %v2438_v47 }
 0x512   : > { %5629 = vmatprep.subr.msk.bf16.mxu1 %vm840_vm1, %v2450_v49 }
 0x513   : > { %2783 = vmatpush1.bf16.msra.mxu1 %v2642_v26 }
 0x514   : > { %v2374_v4 = vpop.permute.xlu0 %2373  ;;  %v2282_v25 = vpop.permute.xlu1 %2281 }
 0x515   : > { %v2386_v59 = vsel %vm763_vm2, %v2372_v2, %v2374_v4 }
 0x518   : > { %v2406_v21 = vpop.permute.xlu0 %2405  ;;  %v2440_v62 = vpop.permute.xlu1 %2439 }
 0x519   : > { %v2418_v11 = vsel %vm796_vm3, %v2404_v36, %v2406_v21  ;;  %v2451_v31 = vsel %vm829_vm0, %v2438_v47, %v2440_v62  ;;  %v2452_v15 = vsel %vm829_vm0, %v2440_v62, %v2442_v54  ;;  %v2322_v54 = vsel %vm698_vm4, %v8129_v33, %v2311_v24 }
 0x51a   : > { %5631 = vmatprep.subr.msk.bf16.mxu0 %vm840_vm1, %v2452_v15  ;;  %v2603_v30 = vsel %vm840_vm1, %v2386_v59, %v2418_v11  ;;  %v2648_v18 = vsel %vm840_vm1, %v2451_v31, 0  ;;  %v2559_v47 = vsel %vm840_vm1, %v2322_v54, %v2351_v41  ;;  %v6298_v54 = vld [vmem:[%s10013_s1 + $0xd8] sm:$0xff] }
 0x51b   : > { %2784 = vmatprep.subr.bf16.mxu1 %v2603_v30  ;;  %2824 = vmatpush1.bf16.msra.mxu0 %v2648_v18 }
 0x51c   : > { %v2313_v50 = vpop.permute.xlu0 %2312  ;;  %2785 = vmatpush1.bf16.msra.mxu1 %v2599_v34  ;;  %v2376_v9 = vpop.permute.xlu1 %2375 }
 0x51d   : > { %v2323_v58 = vsel %vm698_vm4, %v2311_v24, %v2313_v50  ;;  %v2387_v8 = vsel %vm763_vm2, %v2374_v4, %v2376_v9  ;;  %v2388_v42 = vsel %vm763_vm2, %v2376_v9, %v2378_v60  ;;  %v2264_v4 = vsel %vm638_vm6, %v8149_v39, %v2253_v40 }
 0x520   : > { %v2342_v55 = vpop.permute.xlu0 %2341  ;;  %v2408_v2 = vpop.permute.xlu1 %2407 }
 0x521   : > { %v2352_v57 = vsel %vm728_vm5, %v2340_v10, %v2342_v55  ;;  %v2419_v16 = vsel %vm796_vm3, %v2406_v21, %v2408_v2  ;;  %v2420_v37 = vsel %vm796_vm3, %v2408_v2, %v2410_v45  ;;  %v2293_v45 = vsel %vm668_vm7, %v8151_v0, %v2282_v25 }
 0x522   : > { %v2563_v36 = vsel %vm840_vm1, %v2323_v58, %v2352_v57  ;;  %v2611_v63 = vsel %vm840_vm1, %v2388_v42, %v2420_v37  ;;  %v2607_v51 = vsel %vm840_vm1, %v2387_v8, %v2419_v16  ;;  %v2519_v21 = vsel %vm840_vm1, %v2264_v4, %v2293_v45  ;;  %v6290_v8 = vld [vmem:[%s10013_s1 + $0x78] sm:$0xff]  ;;  %v6292_v42 = vld [vmem:[%s10013_s1 + $0x70] sm:$0xff]  ;;  %v6294_v57 = vld [vmem:[%s10013_s1 + $0x68] sm:$0xff] }
 0x523   : > { %2786 = vmatprep.subr.bf16.mxu1 %v2563_v36  ;;  %2825 = vmatprep.subr.bf16.mxu0 %v2611_v63  ;;  %v6296_v16 = vld [vmem:[%s10013_s1 + $0xe0] sm:$0xff]  ;;  %v6299_v36 = vld [vmem:[%s10013_s1 + $0x178] sm:$0xff]  ;;  %v6306_v45 = vld [vmem:[%s10013_s1 + $0xc8] sm:$0xff] }
 0x524   : > { %v2255_v60 = vpop.permute.xlu0 %2254  ;;  %2787 = vmatpush1.bf16.msra.mxu1 %v2559_v47  ;;  %2826 = vmatpush1.bf16.msra.mxu0 %v2607_v51  ;;  %v2224_v10 = vpop.permute.xlu1 %2223  ;;  %v6297_v37 = vld [vmem:[%s10013_s1 + $0x60] sm:$0xff]  ;;  %v6300_v63 = vld [vmem:[%s10013_s1 + $0x58] sm:$0xff]  ;;  %v6302_v51 = vld [vmem:[%s10013_s1 + $0xd0] sm:$0xff] }
 0x525   : > { %v2265_v33 = vsel %vm638_vm6, %v2253_v40, %v2255_v60  ;;  %v2235_v39 = vsel %vm608_vm8, %v8158_v43, %v2224_v10  ;;  %v6289_v43 = vld [vmem:[%s10013_s1 + $0xf8] sm:$0xff]  ;;  %v6303_v47 = vld [vmem:[%s10013_s1 + $0x170] sm:$0xff]  ;;  %v6311_v4 = vld [vmem:[%s10013_s1 + $0x160] sm:$0xff] }
 0x526   : > { %v2479_v30 = vsel %vm840_vm1, %v7921_v12, %v2235_v39  ;;  %v6320_v39 = vld [vmem:[%s10013_s1 + $0x30] sm:$0xff] }
 0x528   : > { %v2284_v49 = vpop.permute.xlu0 %2283  ;;  %v2315_v26 = vpop.permute.xlu1 %2314 }
 0x529   : > { %v2294_v24 = vsel %vm668_vm7, %v2282_v25, %v2284_v49  ;;  %v2324_v59 = vsel %vm698_vm4, %v2313_v50, %v2315_v26 }
 0x52a   : > { %v2523_v56 = vsel %vm840_vm1, %v2265_v33, %v2294_v24  ;;  %v6309_v33 = vld [vmem:[%s10013_s1 + $0x1e0] sm:$0xff] }
 0x52b   : > { %2788 = vmatprep.subr.bf16.mxu1 %v2523_v56  ;;  %v6310_v24 = vld [vmem:[%s10013_s1 + $0xc0] sm:$0xff] }
 0x52c   : > { %v2344_v62 = vpop.permute.xlu0 %2343  ;;  %2789 = vmatpush1.bf16.msra.mxu1 %v2519_v21  ;;  %v2257_v31 = vpop.permute.xlu1 %2256  ;;  %v6312_v56 = vld [vmem:[%s10013_s1 + $0x40] sm:$0xff]  ;;  %v6313_v21 = vld [vmem:[%s10013_s1 + $0x1d8] sm:$0xff] }
 0x52d   : > { %v2353_v0 = vsel %vm728_vm5, %v2342_v55, %v2344_v62  ;;  %v2571_v11 = vsel %vm840_vm1, %v2315_v26, %v2344_v62  ;;  %v2266_v50 = vsel %vm638_vm6, %v2255_v60, %v2257_v31  ;;  %v6291_v55 = vld [vmem:[%s10013_s1 + $0xf0] sm:$0xff]  ;;  %v6308_v26 = vld [vmem:[%s10013_s1 + $0x48] sm:$0xff]  ;;  %v6314_v62 = vld [vmem:[%s10013_s1 + $0xb8] sm:$0xff] }
 0x52e   : > { %2827 = vmatprep.subr.bf16.mxu0 %v2571_v11  ;;  %v2567_v25 = vsel %vm840_vm1, %v2324_v59, %v2353_v0  ;;  %v6304_v60 = vld [vmem:[%s10013_s1 + $0x50] sm:$0xff]  ;;  %v6315_v59 = vld [vmem:[%s10013_s1 + $0x158] sm:$0xff] }
 0x52f   : > { %2828 = vmatpush1.bf16.msra.mxu0 %v2567_v25  ;;  %v6316_v0 = vld [vmem:[%s10013_s1 + $0x38] sm:$0xff]  ;;  %v6317_v11 = vld [vmem:[%s10013_s1 + $0x1d0] sm:$0xff] }
 0x530   : > { %v2226_v40 = vpop.permute.xlu0 %2225  ;;  %v2228_v18 = vpop.permute.xlu1 %2227  ;;  %v6319_v25 = vld [vmem:[%s10013_s1 + $0x150] sm:$0xff] }
 0x531   : > { %v2236_v15 = vsel %vm608_vm8, %v2224_v10, %v2226_v40  ;;  %v2237_v58 = vsel %vm608_vm8, %v2226_v40, %v2228_v18  ;;  %v2491_v12 = vsel %vm840_vm1, %v7994_v17, %v2228_v18  ;;  %v6293_v17 = vld [vmem:[%s10013_s1 + $0xe8] sm:$0xff]  ;;  %v6325_v18 = vld [vmem:[%s10013_s1 + $0x1c0] sm:$0xff] }
 0x532   : > { %v2483_v22 = vsel %vm840_vm1, %v7959_v61, %v2236_v15  ;;  %v2487_v2 = vsel %vm840_vm1, %v7980_v5, %v2237_v58  ;;  %v6295_v5 = vld [vmem:[%s10013_s1 + $0x1f8] sm:$0xff]  ;;  %v6305_v10 = vld [vmem:[%s10013_s1 + $0x1e8] sm:$0xff] }
 0x533   : > { %2790 = vmatprep.subr.bf16.mxu1 %v2483_v22  ;;  %v6321_v40 = vld [vmem:[%s10013_s1 + $0x1c8] sm:$0xff]  ;;  %v6332_v58 = vld [vmem:[%s10013_s1 + $0x18] sm:$0xff] }
 0x534   : > { %v2286_v34 = vpop.permute.xlu0 %2285  ;;  %2791 = vmatpush1.bf16.msra.mxu1 %v2479_v30  ;;  %v6322_v15 = vld [vmem:[%s10013_s1 + $0xa8] sm:$0xff] }
 0x535   : > { %v2295_v9 = vsel %vm668_vm7, %v2284_v49, %v2286_v34  ;;  %v2531_v41 = vsel %vm840_vm1, %v2257_v31, %v2286_v34  ;;  %5889 = vmatprep.subr.mxu1 %v6289_v43  ;;  %v6307_v49 = vld [vmem:[%s10013_s1 + $0x168] sm:$0xff]  ;;  %v6318_v31 = vld [vmem:[%s10013_s1 + $0xb0] sm:$0xff]  ;;  %v6326_v34 = vld [vmem:[%s10013_s1 + $0xa0] sm:$0xff] }
 0x536   : > { %2829 = vmatprep.subr.bf16.mxu0 %v2531_v41  ;;  %v2527_v61 = vsel %vm840_vm1, %v2266_v50, %v2295_v9  ;;  %v6323_v22 = vld [vmem:[%s10013_s1 + $0x148] sm:$0xff]  ;;  %v6327_v50 = vld [vmem:[%s10013_s1 + $0x140] sm:$0xff]  ;;  %v6329_v41 = vld [vmem:[%s10013_s1 + $0x1b8] sm:$0xff] }
 0x537   : > { %5630 = vmatmul.mubr.msk.bf16.vlgmr.msra.gmra.mxu1 %vm10029_vm9, %v8090_v19  ;;  %2830 = vmatpush1.bf16.msra.mxu0 %v2527_v61  ;;  %v6324_v30 = vld [vmem:[%s10013_s1 + $0x28] sm:$0xff]  ;;  %v6328_v9 = vld [vmem:[%s10013_s1 + $0x20] sm:$0xff]  ;;  %v6330_v43 = vld [vmem:[%s10013_s1 + $0x98] sm:$0xff] }
 0x538   : > { %2831 = vmatprep.subr.bf16.mxu0 %v2491_v12  ;;  %5890 = vmatpush3.msra.mxu1 %v6290_v8  ;;  %v6331_v61 = vld [vmem:[%s10013_s1 + $0x138] sm:$0xff]  ;;  %v6333_v12 = vld [vmem:[%s10013_s1 + $0x1b0] sm:$0xff] }
 0x539   : > { %5891 = vmatprep.subr.mxu1 %v6291_v55  ;;  %v6334_v8 = vld [vmem:[%s10013_s1 + $0x90] sm:$0xff] }
 0x53a   : > { %5892 = vmatpush3.msra.mxu1 %v6292_v42  ;;  %v6335_v55 = vld [vmem:[%s10013_s1 + $0x130] sm:$0xff]  ;;  %v6337_v42 = vld [vmem:[%s10013_s1 + $0x1a8] sm:$0xff] }
 0x53b   : > { %2832 = vmatpush1.bf16.msra.mxu0 %v2487_v2  ;;  %5893 = vmatprep.subr.mxu1 %v6293_v17  ;;  %v6336_v2 = vld [vmem:[%s10013_s1 + $0x10] sm:$0xff]  ;;  %v6338_v17 = vld [vmem:[%s10013_s1 + $0x88] sm:$0xff] }
 0x53c   : > { %5894 = vmatpush3.msra.mxu1 %v6294_v57  ;;  %5927 = vmatprep.subr.mxu0 %v6295_v5  ;;  %v6339_v57 = vld [vmem:[%s10013_s1 + $0x128] sm:$0xff] }
 0x53d   : > { %5895 = vmatprep.subr.mxu1 %v6296_v16  ;;  %v6340_v5 = vld [vmem:[%s10013_s1 + $0x8] sm:$0xff]  ;;  %v6341_v16 = vld [vmem:[%s10013_s1 + $0x1a0] sm:$0xff] }
 0x53e   : > { %5632 = vmatmul.mubr.msk.bf16.vlgmr.msra.gmra.mxu0 %vm10029_vm9, %v8090_v19  ;;  %5896 = vmatpush3.msra.mxu1 %v6297_v37  ;;  %v6301_v19 = vld [vmem:[%s10013_s1 + $0x1f0] sm:$0xff]  ;;  %v6342_v37 = vld [vmem:[%s10013_s1 + $0x80] sm:$0xff] }
 0x53f   : > { %5897 = vmatprep.subr.mxu1 %v6298_v54  ;;  %5928 = vmatpush3.msra.mxu0 %v6299_v36  ;;  %v6343_v54 = vld [vmem:[%s10013_s1 + $0x120] sm:$0xff] }
 0x540   : > { %5898 = vmatpush3.msra.mxu1 %v6300_v63  ;;  %5929 = vmatprep.subr.mxu0 %v6301_v19  ;;  %v6344_v36 = vld [vmem:[%s10013_s1] sm:$0xff]  ;;  %v6345_v63 = vld [vmem:[%s10013_s1 + $0x198] sm:$0xff] }
 0x541   : > { %5899 = vmatprep.subr.mxu1 %v6302_v51  ;;  %5930 = vmatpush3.msra.mxu0 %v6303_v47  ;;  %v6346_v19 = vld [vmem:[%s10013_s1 + $0x2f8] sm:$0xff]  ;;  %v6348_v47 = vld [vmem:[%s10013_s1 + $0x190] sm:$0xff] }
 0x542   : > { %5900 = vmatpush3.msra.mxu1 %v6304_v60  ;;  %5931 = vmatprep.subr.mxu0 %v6305_v10  ;;  %v6347_v51 = vld [vmem:[%s10013_s1 + $0x118] sm:$0xff]  ;;  %v6349_v60 = vld [vmem:[%s10013_s1 + $0x110] sm:$0xff]  ;;  %v6350_v10 = vld [vmem:[%s10013_s1 + $0x188] sm:$0xff] }
 0x543   : > { %5901 = vmatprep.subr.mxu1 %v6306_v45  ;;  %5932 = vmatpush3.msra.mxu0 %v6307_v49  ;;  %v6351_v45 = vld [vmem:[%s10013_s1 + $0x108] sm:$0xff]  ;;  %v6352_v49 = vld [vmem:[%s10013_s1 + $0x180] sm:$0xff] }
 0x544   : > { %5902 = vmatpush3.msra.mxu1 %v6308_v26  ;;  %5933 = vmatprep.subr.mxu0 %v6309_v33  ;;  %v6353_v26 = vld [vmem:[%s10013_s1 + $0x100] sm:$0xff]  ;;  %v6354_v33 = vld [vmem:[%s10013_s1 + $0x3f8] sm:$0xff] }
 0x545   : > { %5903 = vmatprep.subr.mxu1 %v6310_v24  ;;  %5934 = vmatpush3.msra.mxu0 %v6311_v4  ;;  %v8456_v24 = vpop.permute.xlu0 %2617 }
 0x546   : > { %5904 = vmatpush3.msra.mxu1 %v6312_v56  ;;  %5935 = vmatprep.subr.mxu0 %v6313_v21 }
 0x547   : > { %5905 = vmatprep.subr.mxu1 %v6314_v62  ;;  %5936 = vmatpush3.msra.mxu0 %v6315_v59 }
 0x548   : > { %5906 = vmatpush3.msra.mxu1 %v6316_v0  ;;  %5937 = vmatprep.subr.mxu0 %v6317_v11 }
 0x549   : > { %5907 = vmatprep.subr.mxu1 %v6318_v31  ;;  %5938 = vmatpush3.msra.mxu0 %v6319_v25 }
 0x54a   : > { %5908 = vmatpush3.msra.mxu1 %v6320_v39  ;;  %5939 = vmatprep.subr.mxu0 %v6321_v40  ;;  %v6355_v40 = vld [vmem:[%s10013_s1 + $0x278] sm:$0xff] }
 0x54b   : > { %5909 = vmatprep.subr.mxu1 %v6322_v15  ;;  %5940 = vmatpush3.msra.mxu0 %v6323_v22  ;;  %v6356_v15 = vld [vmem:[%s10013_s1 + $0x2f0] sm:$0xff] }
 0x54c   : > { %5910 = vmatpush3.msra.mxu1 %v6324_v30  ;;  %5941 = vmatprep.subr.mxu0 %v6325_v18  ;;  %v6357_v22 = vld [vmem:[%s10013_s1 + $0x270] sm:$0xff]  ;;  %v6358_v30 = vld [vmem:[%s10013_s1 + $0x2e8] sm:$0xff] }
 0x54d   : > { %5911 = vmatprep.subr.mxu1 %v6326_v34  ;;  %5942 = vmatpush3.msra.mxu0 %v6327_v50  ;;  %v6359_v18 = vld [vmem:[%s10013_s1 + $0x268] sm:$0xff]  ;;  %v6360_v34 = vld [vmem:[%s10013_s1 + $0x2e0] sm:$0xff] }
 0x54e   : > { %5912 = vmatpush3.msra.mxu1 %v6328_v9  ;;  %5943 = vmatprep.subr.mxu0 %v6329_v41  ;;  %v6361_v50 = vld [vmem:[%s10013_s1 + $0x260] sm:$0xff]  ;;  %v6362_v9 = vld [vmem:[%s10013_s1 + $0x2d8] sm:$0xff] }
 0x54f   : > { %5913 = vmatprep.subr.mxu1 %v6330_v43  ;;  %5944 = vmatpush3.msra.mxu0 %v6331_v61  ;;  %v6363_v41 = vld [vmem:[%s10013_s1 + $0x258] sm:$0xff]  ;;  %v6364_v43 = vld [vmem:[%s10013_s1 + $0x2d0] sm:$0xff] }
 0x550   : > { %5914 = vmatpush3.msra.mxu1 %v6332_v58  ;;  %5945 = vmatprep.subr.mxu0 %v6333_v12  ;;  %v6365_v61 = vld [vmem:[%s10013_s1 + $0x250] sm:$0xff]  ;;  %v6366_v58 = vld [vmem:[%s10013_s1 + $0x2c8] sm:$0xff] }
 0x551   : > { %5915 = vmatprep.subr.mxu1 %v6334_v8  ;;  %5946 = vmatpush3.msra.mxu0 %v6335_v55  ;;  %v6367_v12 = vld [vmem:[%s10013_s1 + $0x248] sm:$0xff]  ;;  %v6368_v8 = vld [vmem:[%s10013_s1 + $0x2c0] sm:$0xff] }
 0x552   : > { %5916 = vmatpush3.msra.mxu1 %v6336_v2  ;;  %5947 = vmatprep.subr.mxu0 %v6337_v42  ;;  %v6369_v55 = vld [vmem:[%s10013_s1 + $0x240] sm:$0xff]  ;;  %v6370_v2 = vld [vmem:[%s10013_s1 + $0x2b8] sm:$0xff] }
 0x553   : > { %5917 = vmatprep.subr.mxu1 %v6338_v17  ;;  %5948 = vmatpush3.msra.mxu0 %v6339_v57  ;;  %v6371_v42 = vld [vmem:[%s10013_s1 + $0x238] sm:$0xff]  ;;  %v6372_v17 = vld [vmem:[%s10013_s1 + $0x2b0] sm:$0xff] }
 0x554   : > { %5918 = vmatpush3.msra.mxu1 %v6340_v5  ;;  %5949 = vmatprep.subr.mxu0 %v6341_v16  ;;  %v6373_v57 = vld [vmem:[%s10013_s1 + $0x230] sm:$0xff]  ;;  %v6374_v5 = vld [vmem:[%s10013_s1 + $0x2a8] sm:$0xff] }
 0x555   : > { %5919 = vmatprep.subr.mxu1 %v6342_v37  ;;  %5950 = vmatpush3.msra.mxu0 %v6343_v54  ;;  %v6375_v16 = vld [vmem:[%s10013_s1 + $0x228] sm:$0xff]  ;;  %v6376_v37 = vld [vmem:[%s10013_s1 + $0x2a0] sm:$0xff] }
 0x556   : > { %5920 = vmatpush3.msra.mxu1 %v6344_v36  ;;  %5951 = vmatprep.subr.mxu0 %v6345_v63  ;;  %v6377_v54 = vld [vmem:[%s10013_s1 + $0x220] sm:$0xff]  ;;  %v6378_v36 = vld [vmem:[%s10013_s1 + $0x298] sm:$0xff] }
 0x557   : > { %5965 = vmatprep.subr.mxu1 %v6346_v19  ;;  %5952 = vmatpush3.msra.mxu0 %v6347_v51  ;;  %v6379_v63 = vld [vmem:[%s10013_s1 + $0x218] sm:$0xff]  ;;  %v6380_v19 = vld [vmem:[%s10013_s1 + $0x290] sm:$0xff] }
 0x558   : > { %5953 = vmatprep.subr.mxu0 %v6348_v47  ;;  %v6381_v51 = vld [vmem:[%s10013_s1 + $0x210] sm:$0xff]  ;;  %v6382_v47 = vld [vmem:[%s10013_s1 + $0x288] sm:$0xff] }
 0x559   : > { %5954 = vmatpush3.msra.mxu0 %v6349_v60  ;;  %v6383_v60 = vld [vmem:[%s10013_s1 + $0x208] sm:$0xff] }
 0x55a   : > { %5955 = vmatprep.subr.mxu0 %v6350_v10  ;;  %v6384_v10 = vld [vmem:[%s10013_s1 + $0x280] sm:$0xff] }
 0x55b   : > { %5956 = vmatpush3.msra.mxu0 %v6351_v45  ;;  %v6385_v45 = vld [vmem:[%s10013_s1 + $0x200] sm:$0xff] }
 0x55c   : > { %5957 = vmatprep.subr.mxu0 %v6352_v49 }
 0x55d   : > { %5958 = vmatpush3.msra.mxu0 %v6353_v26 }
 0x55e   : > { %6003 = vmatprep.subr.mxu0 %v6354_v33 }
 0x58b   : > { %v2687_v4 = vpop.f32.mrf.mxu0 }
 0x58c   : > { %v2688_v56 = vadd.f32 %v2687_v4, %v8456_v24 }
 0x58d   : > { %v2689_v21 = vpop.f32.mrf.mxu0 }
 0x58e   : > { %v2690_v62 = vadd.f32 %v2689_v21, %v8456_v24  ;;  %v8460_v0 = vmax.f32 %v2688_v56, 0.0 }
 0x58f   : > { %v2691_v59 = vpop.f32.mrf.mxu0 }
 0x590   : > { %v8462_v11 = vmax.f32 %v2690_v62, 0.0  ;;  %v2868_v39 = vmul.f32 %v8460_v0, %v8460_v0 }
 0x591   : > { %v2692_v31 = vpop.f32.mrf.mxu0 }
 0x592   : > { %2948 = vmatprep.mubr.f32.mxu1 %v8462_v11  ;;  %v2869_v25 = vmul.f32 %v8462_v11, %v8462_v11 }
 0x593   : > { %2949 = vmatmul.mubr.f32.vlgmr.msra.gmra.mxu1 %v8460_v0 }
 0x594   : > { %2953 = vmatprep.mubr.f32.mxu1 %v2869_v25  ;;  %5966 = vmatpush3.msra.mxu1 %v6355_v40 }
 0x595   : > { %5967 = vmatprep.subr.mxu1 %v6356_v15 }
 0x596   : > { %5968 = vmatpush3.msra.mxu1 %v6357_v22  ;;  %v6386_v22 = vld [vmem:[%s10013_s1 + $0x478] sm:$0xff] }
 0x597   : > { %2954 = vmatmul.mubr.f32.gmra.mxu1 %v2868_v39  ;;  %5969 = vmatprep.subr.mxu1 %v6358_v30 }
 0x598   : > { %5970 = vmatpush3.msra.mxu1 %v6359_v18 }
 0x599   : > { %5971 = vmatprep.subr.mxu1 %v6360_v34 }
 0x59a   : > { %5972 = vmatpush3.msra.mxu1 %v6361_v50 }
 0x59b   : > { %5973 = vmatprep.subr.mxu1 %v6362_v9  ;;  %v6387_v9 = vld [vmem:[%s10013_s1 + $0x470] sm:$0xff] }
 0x59c   : > { %5974 = vmatpush3.msra.mxu1 %v6363_v41 }
 0x59d   : > { %5975 = vmatprep.subr.mxu1 %v6364_v43 }
 0x59e   : > { %5976 = vmatpush3.msra.mxu1 %v6365_v61  ;;  %v6388_v61 = vld [vmem:[%s10013_s1 + $0x468] sm:$0xff] }
 0x59f   : > { %5977 = vmatprep.subr.mxu1 %v6366_v58 }
 0x5a0   : > { %5978 = vmatpush3.msra.mxu1 %v6367_v12  ;;  %v6389_v12 = vld [vmem:[%s10013_s1 + $0x378] sm:$0xff] }
 0x5a1   : > { %5979 = vmatprep.subr.mxu1 %v6368_v8  ;;  %v6390_v8 = vld [vmem:[%s10013_s1 + $0x460] sm:$0xff] }
 0x5a2   : > { %5980 = vmatpush3.msra.mxu1 %v6369_v55  ;;  %v6391_v55 = vld [vmem:[%s10013_s1 + $0x3f0] sm:$0xff] }
 0x5a3   : > { %5981 = vmatprep.subr.mxu1 %v6370_v2  ;;  %v6392_v2 = vld [vmem:[%s10013_s1 + $0x458] sm:$0xff] }
 0x5a4   : > { %5982 = vmatpush3.msra.mxu1 %v6371_v42  ;;  %v6393_v42 = vld [vmem:[%s10013_s1 + $0x370] sm:$0xff] }
 0x5a5   : > { %5983 = vmatprep.subr.mxu1 %v6372_v17  ;;  %v6394_v17 = vld [vmem:[%s10013_s1 + $0x3e8] sm:$0xff] }
 0x5a6   : > { %5984 = vmatpush3.msra.mxu1 %v6373_v57  ;;  %v6395_v57 = vld [vmem:[%s10013_s1 + $0x450] sm:$0xff] }
 0x5a7   : > { %5985 = vmatprep.subr.mxu1 %v6374_v5  ;;  %v6396_v5 = vld [vmem:[%s10013_s1 + $0x368] sm:$0xff] }
 0x5a8   : > { %5986 = vmatpush3.msra.mxu1 %v6375_v16  ;;  %v6397_v16 = vld [vmem:[%s10013_s1 + $0x3e0] sm:$0xff] }
 0x5a9   : > { %5987 = vmatprep.subr.mxu1 %v6376_v37  ;;  %v6398_v37 = vld [vmem:[%s10013_s1 + $0x448] sm:$0xff] }
 0x5aa   : > { %5988 = vmatpush3.msra.mxu1 %v6377_v54  ;;  %v6399_v54 = vld [vmem:[%s10013_s1 + $0x360] sm:$0xff] }
 0x5ab   : > { %5989 = vmatprep.subr.mxu1 %v6378_v36  ;;  %v6400_v36 = vld [vmem:[%s10013_s1 + $0x3d8] sm:$0xff] }
 0x5ac   : > { %5990 = vmatpush3.msra.mxu1 %v6379_v63  ;;  %v6401_v63 = vld [vmem:[%s10013_s1 + $0x440] sm:$0xff] }
 0x5ad   : > { %5991 = vmatprep.subr.mxu1 %v6380_v19  ;;  %v6402_v19 = vld [vmem:[%s10013_s1 + $0x358] sm:$0xff] }
 0x5ae   : > { %5992 = vmatpush3.msra.mxu1 %v6381_v51  ;;  %v6403_v51 = vld [vmem:[%s10013_s1 + $0x3d0] sm:$0xff] }
 0x5af   : > { %5993 = vmatprep.subr.mxu1 %v6382_v47  ;;  %v6404_v47 = vld [vmem:[%s10013_s1 + $0x438] sm:$0xff] }
 0x5b0   : > { %5994 = vmatpush3.msra.mxu1 %v6383_v60  ;;  %v6405_v60 = vld [vmem:[%s10013_s1 + $0x350] sm:$0xff] }
 0x5b1   : > { %5995 = vmatprep.subr.mxu1 %v6384_v10  ;;  %v6406_v10 = vld [vmem:[%s10013_s1 + $0x3c8] sm:$0xff] }
 0x5b2   : > { %5996 = vmatpush3.msra.mxu1 %v6385_v45  ;;  %v6407_v45 = vld [vmem:[%s10013_s1 + $0x430] sm:$0xff] }
 0x5b3   : > { %3184 = vmatprep.subr.mxu1 %v6632_v53 }
 0x5c2   : > { %v2769_v49 = vpop.f32.mrf.mxu0 }
 0x5c3   : > { %v2770_v26 = vadd.f32 %v2769_v49, %v8456_v24  ;;  %v6408_v49 = vld [vmem:[%s10013_s1 + $0x348] sm:$0xff] }
 0x5c4   : > { %v2771_v33 = vpop.f32.mrf.mxu0 }
 0x5c5   : > { %v2772_v4 = vadd.f32 %v2771_v33, %v8456_v24  ;;  %v8568_v59 = vmax.f32 %v2770_v26, 0.0  ;;  %v6409_v26 = vld [vmem:[%s10013_s1 + $0x3c0] sm:$0xff]  ;;  %v6410_v33 = vld [vmem:[%s10013_s1 + $0x428] sm:$0xff] }
 0x5c6   : > { %v2773_v56 = vpop.f32.mrf.mxu0 }
 0x5c7   : > { %v8566_v21 = vmax.f32 %v2772_v4, 0.0  ;;  %v2728_v62 = vpop.f32.mrf.mxu1  ;;  %v2872_v34 = vmul.f32 %v8568_v59, %v8568_v59  ;;  %v6411_v4 = vld [vmem:[%s10013_s1 + $0x340] sm:$0xff]  ;;  %v6412_v56 = vld [vmem:[%s10013_s1 + $0x3b8] sm:$0xff] }
 0x5c8   : > { %v2774_v31 = vpop.f32.mrf.mxu0  ;;  %v2729_v25 = vadd.f32 %v2728_v62, %v8456_v24  ;;  %v6413_v62 = vld [vmem:[%s10013_s1 + $0x420] sm:$0xff] }
 0x5c9   : > { %v2730_v39 = vpop.f32.mrf.mxu1  ;;  %3098 = vmatprep.mubr.f32.mxu1 %v8566_v21  ;;  %v2873_v40 = vmul.f32 %v8566_v21, %v8566_v21  ;;  %v6414_v31 = vld [vmem:[%s10013_s1 + $0x338] sm:$0xff] }
 0x5ca   : > { %v2731_v15 = vadd.f32 %v2730_v39, %v8456_v24  ;;  %3099 = vmatmul.mubr.f32.vlgmr.msra.gmra.mxu1 %v8568_v59  ;;  %v8584_v50 = vmax.f32 %v2729_v25, 0.0  ;;  %v6415_v25 = vld [vmem:[%s10013_s1 + $0x3b0] sm:$0xff]  ;;  %v6416_v39 = vld [vmem:[%s10013_s1 + $0x418] sm:$0xff] }
 0x5cb   : > { %3103 = vmatprep.mubr.f32.mxu1 %v2873_v40  ;;  %3185 = vmatpush1.msra.mxu1 %v6386_v22  ;;  %v2732_v30 = vpop.f32.mrf.mxu1  ;;  %v6417_v40 = vld [vmem:[%s10013_s1 + $0x330] sm:$0xff] }
 0x5cc   : > { %v8579_v18 = vmax.f32 %v2731_v15, 0.0  ;;  %3186 = vmatprep.subr.mxu1 %v6632_v53  ;;  %v2870_v58 = vmul.f32 %v8584_v50, %v8584_v50  ;;  %v6418_v15 = vld [vmem:[%s10013_s1 + $0x3a8] sm:$0xff]  ;;  %v6419_v22 = vld [vmem:[%s10013_s1 + $0x410] sm:$0xff] }
 0x5cd   : > { %3187 = vmatpush1.msra.mxu1 %v6387_v9  ;;  %v2733_v41 = vpop.f32.mrf.mxu1  ;;  %v6420_v30 = vld [vmem:[%s10013_s1 + $0x328] sm:$0xff] }
 0x5ce   : > { %3023 = vmatprep.mubr.f32.mxu0 %v8579_v18  ;;  %3104 = vmatmul.mubr.f32.gmra.mxu1 %v2872_v34  ;;  %v2871_v43 = vmul.f32 %v8579_v18, %v8579_v18  ;;  %v6421_v34 = vld [vmem:[%s10013_s1 + $0x3a0] sm:$0xff]  ;;  %v6422_v9 = vld [vmem:[%s10013_s1 + $0x408] sm:$0xff] }
 0x5cf   : > { %3188 = vmatprep.subr.mxu1 %v6632_v53  ;;  %3024 = vmatmul.mubr.f32.vlgmr.msra.gmra.mxu0 %v8584_v50  ;;  %v6423_v41 = vld [vmem:[%s10013_s1 + $0x320] sm:$0xff] }
 0x5d0   : > { %3189 = vmatpush1.msra.mxu1 %v6388_v61  ;;  %3028 = vmatprep.mubr.f32.mxu0 %v2871_v43  ;;  %v6424_v43 = vld [vmem:[%s10013_s1 + $0x398] sm:$0xff]  ;;  %v6425_v61 = vld [vmem:[%s10013_s1 + $0x400] sm:$0xff] }
 0x5d1   : > { %3190 = vmatprep.subr.mxu1 %v6632_v53  ;;  %6004 = vmatpush3.msra.mxu0 %v6389_v12  ;;  %v6427_v12 = vld [vmem:[%s10013_s1 + $0x390] sm:$0xff] }
 0x5d2   : > { %3191 = vmatpush1.msra.mxu1 %v6390_v8  ;;  %6005 = vmatprep.subr.mxu0 %v6391_v55  ;;  %v6428_v8 = vld [vmem:[%s10013_s1 + $0x4e8] sm:$0x3]  ;;  %v6429_v55 = vld [vmem:[%s10013_s1 + $0x310] sm:$0xff] }
 0x5d3   : > { %3192 = vmatprep.subr.mxu1 %v6632_v53  ;;  %3029 = vmatmul.mubr.f32.gmra.mxu0 %v2870_v58  ;;  %v6426_v58 = vld [vmem:[%s10013_s1 + $0x318] sm:$0xff] }
 0x5d4   : > { %3193 = vmatpush1.msra.mxu1 %v6392_v2  ;;  %6006 = vmatpush3.msra.mxu0 %v6393_v42  ;;  %v6430_v2 = vld [vmem:[%s10013_s1 + $0x388] sm:$0xff]  ;;  %v6431_v42 = vld [vmem:[%s10013_s1 + $0x4e0] sm:$0xff] }
 0x5d5   : > { %3194 = vmatprep.subr.mxu1 %v6632_v53  ;;  %6007 = vmatprep.subr.mxu0 %v6394_v17  ;;  %v6432_v17 = vld [vmem:[%s10013_s1 + $0x308] sm:$0xff] }
 0x5d6   : > { %3195 = vmatpush1.msra.mxu1 %v6395_v57  ;;  %6008 = vmatpush3.msra.mxu0 %v6396_v5  ;;  %v6433_v57 = vld [vmem:[%s10013_s1 + $0x380] sm:$0xff]  ;;  %v6434_v5 = vld [vmem:[%s10013_s1 + $0x4d8] sm:$0xff] }
 0x5d7   : > { %3196 = vmatprep.subr.mxu1 %v6632_v53  ;;  %6009 = vmatprep.subr.mxu0 %v6397_v16  ;;  %v6435_v16 = vld [vmem:[%s10013_s1 + $0x300] sm:$0xff] }
 0x5d8   : > { %3197 = vmatpush1.msra.mxu1 %v6398_v37  ;;  %6010 = vmatpush3.msra.mxu0 %v6399_v54  ;;  %v6436_v37 = vld [vmem:[%s10013_s1 + $0x4d0] sm:$0xff]  ;;  %v6437_v54 = vld [vmem:[%s10013_s1 + $0x4c8] sm:$0xff] }
 0x5d9   : > { %3198 = vmatprep.subr.mxu1 %v6632_v53  ;;  %6011 = vmatprep.subr.mxu0 %v6400_v36  ;;  %v6438_v36 = vld [vmem:[%s10013_s1 + $0x4c0] sm:$0xff] }
 0x5da   : > { %3199 = vmatpush1.msra.mxu1 %v6401_v63  ;;  %6012 = vmatpush3.msra.mxu0 %v6402_v19  ;;  %v6439_v19 = vld [vmem:[%s10013_s1 + $0x4b8] sm:$0xff] }
 0x5db   : > { %3200 = vmatprep.subr.mxu1 %v6632_v53  ;;  %6013 = vmatprep.subr.mxu0 %v6403_v51 }
 0x5dc   : > { %3201 = vmatpush1.msra.mxu1 %v6404_v47  ;;  %6014 = vmatpush3.msra.mxu0 %v6405_v60 }
 0x5dd   : > { %3202 = vmatprep.subr.mxu1 %v6632_v53  ;;  %6015 = vmatprep.subr.mxu0 %v6406_v10  ;;  %v6440_v10 = vld [vmem:[%s10013_s1 + $0x4b0] sm:$0xff] }
 0x5de   : > { %3203 = vmatpush1.msra.mxu1 %v6407_v45  ;;  %6016 = vmatpush3.msra.mxu0 %v6408_v49 }
 0x5df   : > { %3204 = vmatprep.subr.mxu1 %v6632_v53  ;;  %6017 = vmatprep.subr.mxu0 %v6409_v26  ;;  %v6441_v26 = vld [vmem:[%s10013_s1 + $0x4a8] sm:$0xff] }
 0x5e0   : > { %3205 = vmatpush1.msra.mxu1 %v6410_v33  ;;  %6018 = vmatpush3.msra.mxu0 %v6411_v4 }
 0x5e1   : > { %3206 = vmatprep.subr.mxu1 %v6632_v53  ;;  %6019 = vmatprep.subr.mxu0 %v6412_v56  ;;  %v6442_v56 = vld [vmem:[%s10013_s1 + $0x4a0] sm:$0xff] }
 0x5e2   : > { %3207 = vmatpush1.msra.mxu1 %v6413_v62  ;;  %6020 = vmatpush3.msra.mxu0 %v6414_v31 }
 0x5e3   : > { %3208 = vmatprep.subr.mxu1 %v6632_v53  ;;  %6021 = vmatprep.subr.mxu0 %v6415_v25  ;;  %v6443_v25 = vld [vmem:[%s10013_s1 + $0x498] sm:$0xff] }
 0x5e4   : > { %3209 = vmatpush1.msra.mxu1 %v6416_v39  ;;  %6022 = vmatpush3.msra.mxu0 %v6417_v40 }
 0x5e5   : > { %3210 = vmatprep.subr.mxu1 %v6632_v53  ;;  %6023 = vmatprep.subr.mxu0 %v6418_v15 }
 0x5e6   : > { %3211 = vmatpush1.msra.mxu1 %v6419_v22  ;;  %6024 = vmatpush3.msra.mxu0 %v6420_v30  ;;  %v6444_v30 = vld [vmem:[%s10014_s2] sm:$0xff] }
 0x5e7   : > { %3212 = vmatprep.subr.mxu1 %v6632_v53  ;;  %6025 = vmatprep.subr.mxu0 %v6421_v34  ;;  %v6445_v34 = vld [vmem:[%s10013_s1 + $0x490] sm:$0xff] }
 0x5e8   : > { %3213 = vmatpush1.msra.mxu1 %v6422_v9  ;;  %6026 = vmatpush3.msra.mxu0 %v6423_v41  ;;  %v6446_v41 = vld [vmem:[%s10013_s1 + $0x488] sm:$0xff] }
 0x5e9   : > { %3214 = vmatprep.subr.mxu1 %v6632_v53  ;;  %6027 = vmatprep.subr.mxu0 %v6424_v43 }
 0x5ea   : > { %3215 = vmatpush1.msra.mxu1 %v6425_v61  ;;  %6028 = vmatpush3.msra.mxu0 %v6426_v58 }
 0x5eb   : > { %3220 = vmatprep.subr.mxu1 %v6632_v53  ;;  %6029 = vmatprep.subr.mxu0 %v6427_v12  ;;  %v6447_v12 = vld [vmem:[%s10013_s1 + $0x480] sm:$0xff] }
 0x5ec   : > { %5633 = vmatpush2.msk.msra.mxu1 %vm10028_vm10, %v6428_v8  ;;  %6030 = vmatpush3.msra.mxu0 %v6429_v55 }
 0x5ed   : > { %3222 = vmatprep.subr.mxu1 %v6632_v53  ;;  %6031 = vmatprep.subr.mxu0 %v6430_v2 }
 0x5ee   : > { %3223 = vmatpush2.msra.mxu1 %v6431_v42  ;;  %6032 = vmatpush3.msra.mxu0 %v6432_v17 }
 0x5ef   : > { %3224 = vmatprep.subr.mxu1 %v6632_v53  ;;  %6033 = vmatprep.subr.mxu0 %v6433_v57 }
 0x5f0   : > { %3225 = vmatpush2.msra.mxu1 %v6434_v5  ;;  %6034 = vmatpush3.msra.mxu0 %v6435_v16 }
 0x5f1   : > { %3226 = vmatprep.subr.mxu1 %v6632_v53  ;;  %5636 = vmatprep.subr.msk.mxu0 %vm840_vm1, %v7711_v32 }
 0x5f2   : > { %3227 = vmatpush2.msra.mxu1 %v6436_v37 }
 0x5f3   : > { %3228 = vmatprep.subr.mxu1 %v6632_v53 }
 0x5f4   : > { %3229 = vmatpush2.msra.mxu1 %v6437_v54 }
 0x5f5   : > { %3230 = vmatprep.subr.mxu1 %v6632_v53 }
 0x5f6   : > { %3231 = vmatpush2.msra.mxu1 %v6438_v36 }
 0x5f7   : > { %3232 = vmatprep.subr.mxu1 %v6632_v53  ;;  %v2810_v63 = vpop.f32.mrf.mxu1 }
 0x5f8   : > { %3233 = vmatpush2.msra.mxu1 %v6439_v19  ;;  %v2811_v51 = vadd.f32 %v2810_v63, %v8456_v24 }
 0x5f9   : > { %3234 = vmatprep.subr.mxu1 %v6632_v53  ;;  %v2812_v47 = vpop.f32.mrf.mxu1 }
 0x5fa   : > { %v2813_v60 = vadd.f32 %v2812_v47, %v8456_v24  ;;  %3235 = vmatpush2.msra.mxu1 %v6440_v10  ;;  %v8787_v33 = vmax.f32 %v2811_v51, 0.0 }
 0x5fb   : > { %3236 = vmatprep.subr.mxu1 %v6632_v53  ;;  %v2814_v45 = vpop.f32.mrf.mxu1 }
 0x5fc   : > { %v8782_v49 = vmax.f32 %v2813_v60, 0.0  ;;  %3237 = vmatpush2.msra.mxu1 %v6441_v26  ;;  %v2874_v22 = vmul.f32 %v8787_v33, %v8787_v33 }
 0x5fd   : > { %3238 = vmatprep.subr.mxu1 %v6632_v53  ;;  %v2815_v4 = vpop.f32.mrf.mxu1 }
 0x5fe   : > { %3239 = vmatpush2.msra.mxu1 %v6442_v56  ;;  %v2851_v62 = vpop.f32.mrf.mxu0  ;;  %3173 = vmatprep.mubr.f32.mxu0 %v8782_v49  ;;  %v2875_v31 = vmul.f32 %v8782_v49, %v8782_v49 }
 0x5ff   : > { %3240 = vmatprep.subr.mxu1 %v6632_v53  ;;  %3174 = vmatmul.mubr.f32.vlgmr.msra.gmra.mxu0 %v8787_v33  ;;  %v2852_v40 = vadd.f32 %v2851_v62, %v8456_v24 }
 0x600   : > { %3241 = vmatpush2.msra.mxu1 %v6443_v25  ;;  %v2853_v39 = vpop.f32.mrf.mxu0  ;;  %3178 = vmatprep.mubr.f32.mxu0 %v2875_v31 }
 0x601   : > { %v2854_v15 = vadd.f32 %v2853_v39, %v8456_v24  ;;  %3242 = vmatprep.subr.mxu1 %v6632_v53  ;;  %5637 = vmatpush1.msk.msra.mxu0 %vm840_vm1, %v6444_v30  ;;  %v8822_v61 = vmax.f32 %v2852_v40, 0.0 }
 0x602   : > { %3243 = vmatpush2.msra.mxu1 %v6445_v34  ;;  %v2855_v9 = vpop.f32.mrf.mxu0  ;;  %5640 = vmatprep.subr.msk.mxu0 %vm840_vm1, %v7719_v44 }
 0x603   : > { %v8815_v24 = vmax.f32 %v2854_v15, 0.0  ;;  %3244 = vmatprep.subr.mxu1 %v6632_v53  ;;  %3179 = vmatmul.mubr.f32.gmra.mxu0 %v2874_v22  ;;  %v2876_v8 = vmul.f32 %v8822_v61, %v8822_v61 }
 0x604   : > { %3245 = vmatpush2.msra.mxu1 %v6446_v41  ;;  %v2856_v43 = vpop.f32.mrf.mxu0  ;;  %3336 = vmatprep.mubr.f32.mxu0 %v6632_v53 }
 0x605   : > { %v2877_v58 = vmul.f32 %v8815_v24, %v8815_v24  ;;  %3246 = vmatprep.subr.mxu1 %v6632_v53  ;;  %5634 = vmatprep.mubr.msk.f32.mxu1 %vm10027_vm11, %v8815_v24 }
 0x606   : > { %3247 = vmatpush2.msra.mxu1 %v6447_v12 }
 0x607   : > { %3249 = vmatmul.mubr.f32.vlgmr.msra.gmra.mxu1 %v8822_v61 }
 0x608   : > { %5635 = vmatprep.mubr.msk.f32.mxu1 %vm10027_vm11, %v2877_v58  ;;  %vm10035_vm11 = vmmov %vm10034_vm14 }
 0x609   : > { %vm10036_vm10 = vmmov %vm10035_vm11 }
 0x60a   : > { %vm10041_vm9 = vmmov %vm10036_vm10 }
 0x60b   : > { %3254 = vmatmul.mubr.f32.gmra.mxu1 %v2876_v8 }
 0x60c   : > { %4294 = vmatprep.mubr.bf16.mxu1 %v6630_v6 }
 0x653   : > { %v5921_v55 = vpop.f32.mrf.mxu1 }
 0x655   : > { %v5922_v2 = vpop.f32.mrf.mxu1 }
 0x656   : > { %v5923_v19 = vadd.f32 %v5922_v2, %v5921_v55 }
 0x657   : > { %v5924_v42 = vpop.f32.mrf.mxu1 }
 0x659   : > { %v5925_v57 = vpop.f32.mrf.mxu1 }
 0x65a   : > { %v5926_v45 = vadd.f32 %v5925_v57, %v5924_v42 }
 0x68a   : > { %v5997_v16 = vpop.f32.mrf.mxu1 }
 0x68c   : > { %v5998_v54 = vpop.f32.mrf.mxu1 }
 0x68d   : > { %v5999_v26 = vadd.f32 %v5998_v54, %v5997_v16 }
 0x68e   : > { %v6000_v51 = vpop.f32.mrf.mxu1 }
 0x68f   : > { %v5959_v17 = vpop.f32.mrf.mxu0 }
 0x690   : > { %v6001_v4 = vpop.f32.mrf.mxu1 }
 0x691   : > { %v5960_v5 = vpop.f32.mrf.mxu0  ;;  %v6002_v40 = vadd.f32 %v6001_v4, %v6000_v51 }
 0x692   : > { %v5961_v36 = vadd.f32 %v5960_v5, %v5959_v17 }
 0x693   : > { %v5962_v37 = vpop.f32.mrf.mxu0 }
 0x694   : > { %v3026_v47 = vadd.f32 %v5961_v36, %v5923_v19  ;;  %v6449_v36 = vld [vmem:[%s10014_s2 + $0x10] sm:$0xff]  ;;  %v6451_v19 = vld [vmem:[%s10014_s2 + $0x20] sm:$0xff] }
 0x695   : > { %v5963_v63 = vpop.f32.mrf.mxu0 }
 0x696   : > { %v5964_v60 = vadd.f32 %v5963_v63, %v5962_v37  ;;  %v3101_v25 = vadd.f32 %v5999_v26, %v3026_v47  ;;  %v6448_v37 = vld [vmem:[%s10014_s2 + $0x8] sm:$0xff]  ;;  %v6450_v63 = vld [vmem:[%s10014_s2 + $0x18] sm:$0xff] }
 0x698   : > { %v3031_v62 = vadd.f32 %v5964_v60, %v5926_v45 }
 0x69a   : > { %v3106_v34 = vadd.f32 %v6002_v40, %v3031_v62 }
 0x6bf   : > { %v6035_v10 = vpop.f32.mrf.mxu0 }
 0x6c1   : > { %v6036_v56 = vpop.f32.mrf.mxu0 }
 0x6c2   : > { %v6037_v31 = vadd.f32 %v6036_v56, %v6035_v10 }
 0x6c3   : > { %v6038_v39 = vpop.f32.mrf.mxu0 }
 0x6c4   : > { %v3176_v15 = vadd.f32 %v6037_v31, %v3101_v25 }
 0x6c5   : > { %v6039_v22 = vpop.f32.mrf.mxu0 }
 0x6c6   : > { %v6040_v30 = vadd.f32 %v6039_v22, %v6038_v39 }
 0x6c7   : > { %v3250_v9 = vpop.f32.mrf.mxu1 }
 0x6c8   : > { %v3251_v41 = vadd.f32 %v3250_v9, %v3176_v15  ;;  %v3181_v43 = vadd.f32 %v6040_v30, %v3106_v34 }
 0x6c9   : > { %v3252_v58 = vpop.f32.mrf.mxu1 }
 0x6ca   : > { %v3259_v12 = vmul.f32 0.00390625, %v3251_v41 }
 0x6cb   : > { %v3255_v8 = vpop.f32.mrf.mxu1 }
 0x6cc   : > { %v3256_v55 = vadd.f32 %v3255_v8, %v3181_v43  ;;  %v3261_v42 = vmul.f32 %v3259_v12, %v3259_v12 }
 0x6cd   : > { %v3257_v2 = vpop.f32.mrf.mxu1 }
 0x6ce   : > { %v3260_v17 = vmul.f32 0.00390625, %v3256_v55 }
 0x6d0   : > { %v3262_v57 = vsub.f32 %v3260_v17, %v3261_v42 }
 0x6d2   : > { %v3263_v5 = vadd.f32 1e-05, %v3262_v57 }
 0x6d4   : > { %6245 = vrsqrt.f32 %v3263_v5 }
 0x6e1   : > { %v6246_v16 = vpop.eup %6245 }
 0x6e2   : > { %5638 = vmatmul.mubr.msk.f32.vlgmr.msra.gmra.mxu0 %vm10034_vm14, %v6246_v16  ;;  %v3265_v54 = vmul.f32 %v6246_v16, %v3259_v12  ;;  %vm10037_vm14 = vmmov %vm10036_vm10 }
 0x6e3   : > { %3342 = vmatprep.mubr.f32.mxu0 %v6632_v53  ;;  %5641 = vmatpush1.msk.msra.mxu0 %vm840_vm1, %v6448_v37 }
 0x6e4   : > { %5644 = vmatprep.subr.msk.mxu0 %vm840_vm1, %v7726_v35 }
 0x6e6   : > { %5639 = vmatmul.mubr.msk.f32.gmra.mxu0 %vm10035_vm11, %v3265_v54  ;;  %vm10038_vm11 = vmmov %vm10036_vm10 }
 0x6e7   : > { %3413 = vmatprep.mubr.f32.mxu0 %v6632_v53 }
 0x6ea   : > { %5642 = vmatmul.mubr.msk.f32.vlgmr.msra.gmra.mxu0 %vm10036_vm10, %v6246_v16 }
 0x6eb   : > { %3419 = vmatprep.mubr.f32.mxu0 %v6632_v53  ;;  %5645 = vmatpush1.msk.msra.mxu0 %vm840_vm1, %v6449_v36 }
 0x6ec   : > { %5648 = vmatprep.subr.msk.mxu0 %vm840_vm1, %v7738_v23 }
 0x6ee   : > { %5643 = vmatmul.mubr.msk.f32.gmra.mxu0 %vm10037_vm14, %v3265_v54  ;;  %vm10039_vm14 = vmmov %vm10036_vm10 }
 0x6ef   : > { %3490 = vmatprep.mubr.f32.mxu0 %v6632_v53 }
 0x6f2   : > { %5646 = vmatmul.mubr.msk.f32.vlgmr.msra.gmra.mxu0 %vm10038_vm11, %v6246_v16  ;;  %vm10040_vm11 = vmmov %vm10036_vm10 }
 0x6f3   : > { %3496 = vmatprep.mubr.f32.mxu0 %v6632_v53  ;;  %5649 = vmatpush1.msk.msra.mxu0 %vm840_vm1, %v6450_v63 }
 0x6f4   : > { %5652 = vmatprep.subr.msk.mxu0 %vm840_vm1, %v7750_v28 }
 0x6f6   : > { %5647 = vmatmul.mubr.msk.f32.gmra.mxu0 %vm10036_vm10, %v3265_v54  ;;  %vm10042_vm10 = vmmov %vm10041_vm9 }
 0x6f7   : > { %3567 = vmatprep.mubr.f32.mxu0 %v6632_v53 }
 0x6fa   : > { %5650 = vmatmul.mubr.msk.f32.vlgmr.msra.gmra.mxu0 %vm10039_vm14, %v6246_v16 }
 0x6fb   : > { %3573 = vmatprep.mubr.f32.mxu0 %v6632_v53  ;;  %5653 = vmatpush1.msk.msra.mxu0 %vm840_vm1, %v6451_v19 }
 0x6fe   : > { %5651 = vmatmul.mubr.msk.f32.gmra.mxu0 %vm10040_vm11, %v3265_v54 }
 0x6ff   : > { %3644 = vmatprep.mubr.f32.mxu0 %v6632_v53 }
 0x702   : > { %5654 = vmatmul.mubr.msk.f32.vlgmr.msra.gmra.mxu0 %vm10041_vm9, %v6246_v16  ;;  %vm10044_vm9 = vcmask 588800  }
 0x703   : > { %3650 = vmatprep.mubr.f32.mxu0 %v6632_v53 }
 0x706   : > { %5655 = vmatmul.mubr.msk.f32.gmra.mxu0 %vm10042_vm10, %v3265_v54 }
 0x707   : > { %4253 = vmatprep.mubr.bf16.mxu0 %v6630_v6 }
 0x7a2   : > { %v3338_v51 = vpop.f32.mrf.mxu0 }
 0x7a3   : > { %v3657_v10 = vmul.f32 %v3338_v51, %v8460_v0 }
 0x7a4   : > { %v3340_v47 = vpop.f32.mrf.mxu0 }
 0x7a5   : > { %v3658_v45 = vmul.f32 %v3340_v47, %v8462_v11 }
 0x7a6   : > { %v3344_v60 = vpop.f32.mrf.mxu0 }
 0x7a7   : > { %v3667_v4 = vsub.f32 %v3657_v10, %v3344_v60 }
 0x7a8   : > { %v3346_v26 = vpop.f32.mrf.mxu0 }
 0x7a9   : > { %v3668_v56 = vsub.f32 %v3658_v45, %v3346_v26 }
 0x7aa   : > { %v3415_v62 = vpop.f32.mrf.mxu0 }
 0x7ab   : > { %v5732_v31 = vpack.c.bf16 %v3668_v56, %v3667_v4  ;;  %v3659_v40 = vmul.f32 %v3415_v62, %v8584_v50 }
 0x7ac   : > { %v3417_v25 = vpop.f32.mrf.mxu0 }
 0x7ad   : > { %3712 = vrot.lane.b32.xlu1 %v5732_v31, %s6633_s13  ;;  %v3660_v15 = vmul.f32 %v3417_v25, %v8579_v18 }
 0x7ae   : > { %v3421_v39 = vpop.f32.mrf.mxu0 }
 0x7af   : > { %v3669_v30 = vsub.f32 %v3659_v40, %v3421_v39 }
 0x7b0   : > { %v3423_v22 = vpop.f32.mrf.mxu0 }
 0x7b1   : > { %v3670_v34 = vsub.f32 %v3660_v15, %v3423_v22 }
 0x7b2   : > { %v3492_v9 = vpop.f32.mrf.mxu0 }
 0x7b3   : > { %v5733_v0 = vpack.c.bf16 %v3670_v34, %v3669_v30  ;;  %v3661_v43 = vmul.f32 %v3492_v9, %v8568_v59 }
 0x7b4   : > { %v3494_v41 = vpop.f32.mrf.mxu0 }
 0x7b5   : > { %3714 = vrot.lane.b32.xlu1 %v5733_v0, %s6633_s13  ;;  %v3662_v58 = vmul.f32 %v3494_v41, %v8566_v21 }
 0x7b6   : > { %v3498_v11 = vpop.f32.mrf.mxu0 }
 0x7b7   : > { %v3671_v8 = vsub.f32 %v3661_v43, %v3498_v11 }
 0x7b8   : > { %v3500_v12 = vpop.f32.mrf.mxu0 }
 0x7b9   : > { %v3672_v55 = vsub.f32 %v3662_v58, %v3500_v12 }
 0x7ba   : > { %v3569_v2 = vpop.f32.mrf.mxu0 }
 0x7bb   : > { %v5734_v50 = vpack.c.bf16 %v3672_v55, %v3671_v8  ;;  %v3663_v17 = vmul.f32 %v3569_v2, %v8787_v33  ;;  %v6242_v2 = vld [vmem:[#allocation2 + $0x28] ss:$0 sps:$4 sm:$0xff]  }
 0x7bc   : > { %v3571_v42 = vpop.f32.mrf.mxu0 }
 0x7bd   : > { %3716 = vrot.lane.b32.xlu0 %v5734_v50, %s6633_s13  ;;  %v3664_v57 = vmul.f32 %v3571_v42, %v8782_v49 }
 0x7be   : > { %v3575_v18 = vpop.f32.mrf.mxu0 }
 0x7bf   : > { %v3673_v16 = vsub.f32 %v3663_v17, %v3575_v18 }
 0x7c0   : > { %v3577_v5 = vpop.f32.mrf.mxu0 }
 0x7c1   : > { %v3674_v37 = vsub.f32 %v3664_v57, %v3577_v5 }
 0x7c2   : > { %v3646_v54 = vpop.f32.mrf.mxu0 }
 0x7c3   : > { %v5735_v59 = vpack.c.bf16 %v3674_v37, %v3673_v16  ;;  %v3665_v63 = vmul.f32 %v3646_v54, %v8822_v61 }
 0x7c4   : > { %v3648_v36 = vpop.f32.mrf.mxu0 }
 0x7c5   : > { %3718 = vrot.lane.b32.xlu1 %v5735_v59, %s6633_s13  ;;  %v3666_v19 = vmul.f32 %v3648_v36, %v8815_v24 }
 0x7c6   : > { %v3652_v21 = vpop.f32.mrf.mxu0 }
 0x7c7   : > { %v3675_v47 = vsub.f32 %v3665_v63, %v3652_v21 }
 0x7c8   : > { %v3654_v51 = vpop.f32.mrf.mxu0 }
 0x7c9   : > { %v3676_v60 = vsub.f32 %v3666_v19, %v3654_v51 }
 0x7cb   : > { %v5736_v10 = vpack.c.bf16 %v3676_v60, %v3675_v47 }
 0x7cd   : > { %3720 = vrot.lane.b32.xlu1 %v5736_v10, %s6633_s13  ;;  %s10043_s13 = smov 126  }
 0x81f   : > { %v3713_v49 = vpop.permute.xlu1 %3712 }
 0x820   : > { %v3722_v33 = vrot.slane %v3713_v49, 4 }
 0x822   : > { %v3727_v45 = vsel %vm2152_vm13, %v3722_v33, %v3713_v49 }
 0x823   : > { %3741 = vst.msk [vmem:[#allocation2] sm:$0xff] %vm7815_vm12, %v3727_v45  ;;  %vm10045_vm12 = vmmov %vm10044_vm9 }
 0x827   : > { %v3715_v26 = vpop.permute.xlu1 %3714 }
 0x828   : > { %v3723_v4 = vrot.slane %v3715_v26, 4 }
 0x82a   : > { %v3746_v56 = vld [vmem:[#allocation2] sm:$0xff]  ;;  %v3728_v61 = vsel %vm840_vm1, %v3722_v33, %v3723_v4 }
 0x82b   : > { %v8898_v62 = vcombine.low %v3746_v56, %v3746_v56  ;;  %v8900_v24 = vcombine.high %v3746_v56, %v3746_v56  ;;  %v3729_v31 = vsel %vm2152_vm13, %v3728_v61, %v3715_v26 }
 0x82c   : > { %v8932_v11 = vcombine.low %v3729_v31, %v3729_v31  ;;  %v8957_v38 = vcombine.high %v3729_v31, %v3729_v31 }
 0x82d   : > { %3989 = vrot.lane.b32.xlu0 %v8898_v62, %s6623_s24  ;;  %3991 = vrot.lane.b32.xlu1 %v8900_v24, %s6623_s24 }
 0x82f   : > { %v3717_v25 = vpop.permute.xlu0 %3716 }
 0x830   : > { %v3724_v13 = vrot.slane %v3717_v25, 4 }
 0x831   : > { %3957 = vrot.lane.b32.xlu0 %v8898_v62, %s6625_s26  ;;  %3927 = vrot.lane.b32.xlu1 %v8900_v24, %s6624_s25 }
 0x832   : > { %v3730_v39 = vsel %vm840_vm1, %v3723_v4, %v3724_v13 }
 0x833   : > { %v3731_v40 = vsel %vm2152_vm13, %v3730_v39, %v3717_v25 }
 0x834   : > { %v8971_v58 = vcombine.low %v3731_v40, %v3731_v40  ;;  %v8981_v12 = vcombine.high %v3731_v40, %v3731_v40 }
 0x835   : > { %3893 = vrot.lane.b32.xlu0 %v8898_v62, %s6627_s28  ;;  %3959 = vrot.lane.b32.xlu1 %v8900_v24, %s6625_s26 }
 0x837   : > { %v3719_v15 = vpop.permute.xlu1 %3718 }
 0x838   : > { %v3725_v22 = vrot.slane %v3719_v15, 4 }
 0x839   : > { %3835 = vrot.lane.b32.xlu0 %v8898_v62, %s6629_s30  ;;  %3925 = vrot.lane.b32.xlu1 %v8898_v62, %s6624_s25 }
 0x83a   : > { %v3732_v30 = vsel %vm840_vm1, %v3724_v13, %v3725_v22 }
 0x83b   : > { %v3733_v34 = vsel %vm2152_vm13, %v3732_v30, %v3719_v15 }
 0x83c   : > { %v8991_v8 = vcombine.low %v3733_v34, %v3733_v34  ;;  %v9029_v55 = vcombine.high %v3733_v34, %v3733_v34 }
 0x83d   : > { %3779 = vrot.lane.b32.xlu0 %v8900_v24, %s6631_s12  ;;  %3866 = vrot.lane.b32.xlu1 %v8900_v24, %s6626_s27 }
 0x83f   : > { %v3721_v9 = vpop.permute.xlu1 %3720 }
 0x840   : > { %v3726_v0 = vrot.slane %v3721_v9, 4 }
 0x841   : > { %3777 = vrot.lane.b32.xlu0 %v8898_v62, %s6631_s12  ;;  %3895 = vrot.lane.b32.xlu1 %v8900_v24, %s6627_s28 }
 0x842   : > { %v3734_v41 = vsel %vm840_vm1, %v3725_v22, %v3726_v0 }
 0x843   : > { %v3735_v43 = vsel %vm2152_vm13, %v3734_v41, %v3721_v9  ;;  %vm10046_vm13 = vmmov %vm10044_vm9 }
 0x844   : > { %3745 = vst.msk [vmem:[#allocation2 + $0x20] sm:$0xff] %vm7849_vm15, %v3735_v43 }
 0x845   : > { %3993 = vrot.lane.b32.xlu0 %v8932_v11, %s6623_s24  ;;  %3864 = vrot.lane.b32.xlu1 %v8898_v62, %s6626_s27 }
 0x849   : > { %3929 = vrot.lane.b32.xlu0 %v8932_v11, %s6624_s25  ;;  %3808 = vrot.lane.b32.xlu1 %v8900_v24, %s10043_s13 }
 0x84b   : > { %v3750_v16 = vld [vmem:[#allocation2 + $0x20] sm:$0xff] }
 0x84c   : > { %v9048_v37 = vcombine.low %v3750_v16, %v3750_v16  ;;  %v9062_v63 = vcombine.high %v3750_v16, %v3750_v16 }
 0x84d   : > { %3961 = vrot.lane.b32.xlu0 %v8932_v11, %s6625_s26  ;;  %3837 = vrot.lane.b32.xlu1 %v8900_v24, %s6629_s30 }
 0x851   : > { %3868 = vrot.lane.b32.xlu0 %v8932_v11, %s6626_s27  ;;  %3806 = vrot.lane.b32.xlu1 %v8898_v62, %s10043_s13 }
 0x855   : > { %3897 = vrot.lane.b32.xlu0 %v8932_v11, %s6627_s28  ;;  %3781 = vrot.lane.b32.xlu1 %v8932_v11, %s6631_s12 }
 0x859   : > { %3810 = vrot.lane.b32.xlu0 %v8932_v11, %s10043_s13  ;;  %3995 = vrot.lane.b32.xlu1 %v8957_v38, %s6623_s24 }
 0x85d   : > { %3839 = vrot.lane.b32.xlu0 %v8932_v11, %s6629_s30  ;;  %3963 = vrot.lane.b32.xlu1 %v8957_v38, %s6625_s26 }
 0x861   : > { %3931 = vrot.lane.b32.xlu0 %v8957_v38, %s6624_s25  ;;  %3899 = vrot.lane.b32.xlu1 %v8957_v38, %s6627_s28 }
 0x865   : > { %3870 = vrot.lane.b32.xlu0 %v8957_v38, %s6626_s27  ;;  %3997 = vrot.lane.b32.xlu1 %v8971_v58, %s6623_s24 }
 0x869   : > { %3812 = vrot.lane.b32.xlu0 %v8957_v38, %s10043_s13  ;;  %3965 = vrot.lane.b32.xlu1 %v8971_v58, %s6625_s26 }
 0x86d   : > { %3999 = vrot.lane.b32.xlu0 %v8981_v12, %s6623_s24  ;;  %3901 = vrot.lane.b32.xlu1 %v8971_v58, %s6627_s28 }
 0x871   : > { %3935 = vrot.lane.b32.xlu0 %v8981_v12, %s6624_s25  ;;  %3843 = vrot.lane.b32.xlu1 %v8971_v58, %s6629_s30 }
 0x875   : > { %3967 = vrot.lane.b32.xlu0 %v8981_v12, %s6625_s26  ;;  %4001 = vrot.lane.b32.xlu1 %v8991_v8, %s6623_s24 }
 0x879   : > { %3933 = vrot.lane.b32.xlu0 %v8971_v58, %s6624_s25  ;;  %3937 = vrot.lane.b32.xlu1 %v8991_v8, %s6624_s25 }
 0x87d   : > { %3874 = vrot.lane.b32.xlu0 %v8981_v12, %s6626_s27  ;;  %3969 = vrot.lane.b32.xlu1 %v8991_v8, %s6625_s26 }
 0x881   : > { %3903 = vrot.lane.b32.xlu0 %v8981_v12, %s6627_s28  ;;  %3876 = vrot.lane.b32.xlu1 %v8991_v8, %s6626_s27 }
 0x885   : > { %3872 = vrot.lane.b32.xlu0 %v8971_v58, %s6626_s27  ;;  %3905 = vrot.lane.b32.xlu1 %v8991_v8, %s6627_s28 }
 0x889   : > { %3816 = vrot.lane.b32.xlu0 %v8981_v12, %s10043_s13  ;;  %3818 = vrot.lane.b32.xlu1 %v8991_v8, %s10043_s13 }
 0x88d   : > { %3845 = vrot.lane.b32.xlu0 %v8981_v12, %s6629_s30  ;;  %3847 = vrot.lane.b32.xlu1 %v8991_v8, %s6629_s30 }
 0x891   : > { %3814 = vrot.lane.b32.xlu0 %v8971_v58, %s10043_s13  ;;  %3789 = vrot.lane.b32.xlu1 %v8991_v8, %s6631_s12 }
 0x895   : > { %3787 = vrot.lane.b32.xlu0 %v8981_v12, %s6631_s12  ;;  %3841 = vrot.lane.b32.xlu1 %v8957_v38, %s6629_s30 }
 0x899   : > { %3785 = vrot.lane.b32.xlu0 %v8971_v58, %s6631_s12  ;;  %4003 = vrot.lane.b32.xlu1 %v9029_v55, %s6623_s24 }
 0x89d   : > { %3783 = vrot.lane.b32.xlu0 %v8957_v38, %s6631_s12  ;;  %3939 = vrot.lane.b32.xlu1 %v9029_v55, %s6624_s25 }
 0x89f   : > { %v3990_v50 = vpop.permute.xlu0 %3989  ;;  %v3992_v42 = vpop.permute.xlu1 %3991 }
 0x8a0   : > { %v4011_v47 = vsel %vm829_vm0, %v3990_v50, %v3992_v42 }
 0x8a1   : > { %4009 = vrot.lane.b32.xlu0 %v6242_v2, %s6623_s24  ;;  %3971 = vrot.lane.b32.xlu1 %v9029_v55, %s6625_s26  ;;  %v4192_v33 = vsel %vm840_vm1, %v4011_v47, 0 }
 0x8a3   : > { %v3958_v18 = vpop.permute.xlu0 %3957  ;;  %v3928_v17 = vpop.permute.xlu1 %3927 }
 0x8a5   : > { %3945 = vrot.lane.b32.xlu0 %v6242_v2, %s6624_s25  ;;  %3878 = vrot.lane.b32.xlu1 %v9029_v55, %s6626_s27 }
 0x8a7   : > { %v3894_v57 = vpop.permute.xlu0 %3893  ;;  %v3960_v5 = vpop.permute.xlu1 %3959 }
 0x8a8   : > { %v3979_v13 = vsel %vm796_vm3, %v3958_v18, %v3960_v5 }
 0x8a9   : > { %3977 = vrot.lane.b32.xlu0 %v6242_v2, %s6625_s26  ;;  %3907 = vrot.lane.b32.xlu1 %v9029_v55, %s6627_s28 }
 0x8ab   : > { %v9050_v54 = vpop.permute.xlu0 %3835  ;;  %v3926_v59 = vpop.permute.xlu1 %3925 }
 0x8ac   : > { %v3947_v4 = vsel %vm763_vm2, %v3926_v59, %v3928_v17 }
 0x8ad   : > { %3820 = vrot.lane.b32.xlu1 %v9029_v55, %s10043_s13  ;;  %4005 = vrot.lane.b32.xlu0 %v9048_v37, %s6623_s24  ;;  %v4143_v40 = vsel %vm840_vm1, %v3947_v4, %v3979_v13  ;;  %v5332_v13 = vld [vmem:[#allocation3] sm:$0x1] }
 0x8af   : > { %v9056_v36 = vpop.permute.xlu0 %3779  ;;  %v3867_v21 = vpop.permute.xlu1 %3866 }
 0x8b1   : > { %3849 = vrot.lane.b32.xlu1 %v9029_v55, %s6629_s30  ;;  %3941 = vrot.lane.b32.xlu0 %v9048_v37, %s6624_s25 }
 0x8b3   : > { %v9064_v19 = vpop.permute.xlu0 %3777  ;;  %v3896_v51 = vpop.permute.xlu1 %3895 }
 0x8b4   : > { %v3913_v43 = vsel %vm728_vm5, %v3894_v57, %v3896_v51 }
 0x8b5   : > { %4007 = vrot.lane.b32.xlu1 %v9062_v63, %s6623_s24  ;;  %3973 = vrot.lane.b32.xlu0 %v9048_v37, %s6625_s26 }
 0x8b7   : > { %v9071_v60 = vpop.permute.xlu0 %3993  ;;  %v3865_v10 = vpop.permute.xlu1 %3864 }
 0x8b8   : > { %v4012_v49 = vsel %vm829_vm0, %v3992_v42, %v9071_v60  ;;  %v3884_v30 = vsel %vm698_vm4, %v3865_v10, %v3867_v21 }
 0x8b9   : > { %3943 = vrot.lane.b32.xlu1 %v9062_v63, %s6624_s25  ;;  %3880 = vrot.lane.b32.xlu0 %v9048_v37, %s6626_s27  ;;  %v4103_v50 = vsel %vm840_vm1, %v3884_v30, %v3913_v43 }
 0x8ba   : > { %5672 = vmatprep.subr.msk.bf16.mxu0 %vm840_vm1, %v4012_v49 }
 0x8bb   : > { %4228 = vmatpush1.bf16.msra.mxu0 %v4192_v33  ;;  %v9081_v45 = vpop.permute.xlu0 %3929  ;;  %v3809_v26 = vpop.permute.xlu1 %3808  ;;  %v4182_v33 = vld [vmem:[%s10020_s8] sm:$0xff] }
 0x8bc   : > { %v3948_v31 = vsel %vm763_vm2, %v3928_v17, %v9081_v45  ;;  %v5255_v17 = vld [vmem:[%s10021_s9] sm:$0xff] }
 0x8bd   : > { %3975 = vrot.lane.b32.xlu1 %v9062_v63, %s6625_s26  ;;  %3909 = vrot.lane.b32.xlu0 %v9048_v37, %s6627_s28 }
 0x8bf   : > { %v9088_v56 = vpop.permute.xlu0 %3961  ;;  %v3838_v61 = vpop.permute.xlu1 %3837 }
 0x8c0   : > { %v3980_v25 = vsel %vm796_vm3, %v3960_v5, %v9088_v56  ;;  %v3855_v47 = vsel %vm668_vm7, %v9050_v54, %v3838_v61 }
 0x8c1   : > { %3791 = vrot.lane.b32.xlu1 %v9029_v55, %s6631_s12  ;;  %3822 = vrot.lane.b32.xlu0 %v9048_v37, %s10043_s13  ;;  %v4147_v39 = vsel %vm840_vm1, %v3948_v31, %v3980_v25 }
 0x8c2   : > { %4229 = vmatprep.subr.bf16.mxu0 %v4147_v39 }
 0x8c3   : > { %v9101_v15 = vpop.permute.xlu0 %3868  ;;  %4230 = vmatpush1.bf16.msra.mxu0 %v4143_v40  ;;  %v3807_v22 = vpop.permute.xlu1 %3806 }
 0x8c4   : > { %v3885_v0 = vsel %vm698_vm4, %v3867_v21, %v9101_v15  ;;  %v3826_v57 = vsel %vm638_vm6, %v3807_v22, %v3809_v26 }
 0x8c5   : > { %3882 = vrot.lane.b32.xlu1 %v9062_v63, %s6626_s27  ;;  %3851 = vrot.lane.b32.xlu0 %v9048_v37, %s6629_s30  ;;  %v4063_v49 = vsel %vm840_vm1, %v3826_v57, %v3855_v47 }
 0x8c7   : > { %v9108_v34 = vpop.permute.xlu0 %3897  ;;  %v9110_v9 = vpop.permute.xlu1 %3781 }
 0x8c8   : > { %v3914_v41 = vsel %vm728_vm5, %v3896_v51, %v9108_v34  ;;  %v3798_v59 = vsel %vm608_vm8, %v9056_v36, %v9110_v9 }
 0x8c9   : > { %3824 = vrot.lane.b32.xlu1 %v9062_v63, %s10043_s13  ;;  %3911 = vrot.lane.b32.xlu0 %v9062_v63, %s6627_s28  ;;  %v4107_v2 = vsel %vm840_vm1, %v3885_v0, %v3914_v41 }
 0x8ca   : > { %4231 = vmatprep.subr.bf16.mxu0 %v4107_v2 }
 0x8cb   : > { %v9123_v42 = vpop.permute.xlu0 %3810  ;;  %4232 = vmatpush1.bf16.msra.mxu0 %v4103_v50  ;;  %v3996_v18 = vpop.permute.xlu1 %3995 }
 0x8cc   : > { %v3827_v21 = vsel %vm638_vm6, %v3809_v26, %v9123_v42  ;;  %v3797_v26 = vsel %vm608_vm8, %v9064_v19, %v9056_v36  ;;  %v4013_v31 = vsel %vm829_vm0, %v9071_v60, %v3996_v18  ;;  %v9165_v36 = vld [vmem:[%s10019_s7] sm:$0xf] }
 0x8cd   : > { %3795 = vrot.lane.b32.xlu1 %v9062_v63, %s6631_s12  ;;  %3793 = vrot.lane.b32.xlu0 %v9048_v37, %s6631_s12  ;;  %v4023_v25 = vsel %vm840_vm1, %v8898_v62, %v3797_v26 }
 0x8cf   : > { %v9133_v5 = vpop.permute.xlu0 %3839  ;;  %v3964_v16 = vpop.permute.xlu1 %3963 }
 0x8d0   : > { %v3856_v51 = vsel %vm668_vm7, %v3838_v61, %v9133_v5  ;;  %v4027_v61 = vsel %vm840_vm1, %v8900_v24, %v3798_v59  ;;  %v4198_v24 = vsel %vm840_vm1, %v4013_v31, 0 }
 0x8d1   : > { %5258 = vperm.xlu1 %6215, %v5255_v17   ;;  %3853 = vrot.lane.b32.xlu0 %v9062_v63, %s6629_s30  ;;  %v4067_v10 = vsel %vm840_vm1, %v3827_v21, %v3856_v51 }
 0x8d2   : > { %4233 = vmatprep.subr.bf16.mxu0 %v4067_v10  ;;  %v3981_v10 = vsel %vm796_vm3, %v9088_v56, %v3964_v16 }
 0x8d3   : > { %v3932_v4 = vpop.permute.xlu0 %3931  ;;  %4234 = vmatpush1.bf16.msra.mxu0 %v4063_v49  ;;  %v9154_v54 = vpop.permute.xlu1 %3899 }
 0x8d4   : > { %4235 = vmatprep.subr.bf16.mxu0 %v4027_v61  ;;  %v3949_v57 = vsel %vm763_vm2, %v9081_v45, %v3932_v4 }
 0x8d5   : > { %4185 = vperm.xlu0 %6216, %v4182_v33   ;;  %v4151_v33 = vsel %vm840_vm1, %v3949_v57, %v3981_v10 }
 0x8d7   : > { %v3871_v39 = vpop.permute.xlu0 %3870  ;;  %4236 = vmatpush1.bf16.msra.mxu0 %v4023_v25  ;;  %v3998_v40 = vpop.permute.xlu1 %3997 }
 0x8d8   : > { %v4014_v19 = vsel %vm829_vm0, %v3996_v18, %v3998_v40 }
 0x8d9   : > { %5335 = vperm.xlu0 %6216, %v5332_v13   ;;  %5674 = vmatprep.subr.msk.bf16.mxu1 %vm840_vm1, %v4014_v19  ;;  %v3886_v19 = vsel %vm698_vm4, %v9101_v15, %v3871_v39  ;;  %v3915_v15 = vsel %vm728_vm5, %v9108_v34, %v9154_v54 }
 0x8da   : > { %5673 = vmatmul.mubr.msk.bf16.vlgmr.msra.gmra.mxu0 %vm10044_vm9, %v9165_v36  ;;  %4269 = vmatpush1.bf16.msra.mxu1 %v4198_v24 }
 0x8db   : > { %v9172_v62 = vpop.permute.xlu0 %3812  ;;  %v3966_v60 = vpop.permute.xlu1 %3965  ;;  %4335 = vmatprep.mubr.bf16.mxu0 %v6630_v6 }
 0x8dc   : > { %v3982_v51 = vsel %vm796_vm3, %v3964_v16, %v3966_v60 }
 0x8df   : > { %v4000_v22 = vpop.permute.xlu0 %3999  ;;  %v3902_v30 = vpop.permute.xlu1 %3901 }
 0x8e0   : > { %v4015_v43 = vsel %vm829_vm0, %v3998_v40, %v4000_v22  ;;  %v3916_v24 = vsel %vm728_vm5, %v9154_v54, %v3902_v30 }
 0x8e1   : > { %v4204_v17 = vsel %vm840_vm1, %v4015_v43, 0 }
 0x8e3   : > { %v3936_v0 = vpop.permute.xlu0 %3935  ;;  %v9175_v41 = vpop.permute.xlu1 %3843 }
 0x8e7   : > { %v3968_v2 = vpop.permute.xlu0 %3967  ;;  %v9178_v50 = vpop.permute.xlu1 %4001 }
 0x8e8   : > { %v4016_v18 = vsel %vm829_vm0, %v4000_v22, %v9178_v50  ;;  %v3983_v25 = vsel %vm796_vm3, %v3966_v60, %v3968_v2 }
 0x8e9   : > { %5676 = vmatprep.subr.msk.bf16.mxu0 %vm840_vm1, %v4016_v18 }
 0x8ea   : > { %4310 = vmatpush1.bf16.msra.mxu0 %v4204_v17 }
 0x8eb   : > { %v3934_v59 = vpop.permute.xlu0 %3933  ;;  %v9186_v21 = vpop.permute.xlu1 %3937 }
 0x8ec   : > { %v3950_v47 = vsel %vm763_vm2, %v3932_v4, %v3934_v59  ;;  %v3951_v26 = vsel %vm763_vm2, %v3934_v59, %v3936_v0  ;;  %v3952_v31 = vsel %vm763_vm2, %v3936_v0, %v9186_v21 }
 0x8ed   : > { %v4155_v49 = vsel %vm840_vm1, %v3950_v47, %v3982_v51  ;;  %v4159_v16 = vsel %vm840_vm1, %v3951_v26, %v3983_v25  ;;  %v4111_v51 = vsel %vm840_vm1, %v3886_v19, %v3915_v15 }
 0x8ee   : > { %4270 = vmatprep.subr.bf16.mxu1 %v4155_v49 }
 0x8ef   : > { %v3875_v61 = vpop.permute.xlu0 %3874  ;;  %4271 = vmatpush1.bf16.msra.mxu1 %v4151_v33  ;;  %v9195_v45 = vpop.permute.xlu1 %3969 }
 0x8f0   : > { %v3984_v4 = vsel %vm796_vm3, %v3968_v2, %v9195_v45 }
 0x8f1   : > { %v4163_v56 = vsel %vm840_vm1, %v3952_v31, %v3984_v4 }
 0x8f2   : > { %4311 = vmatprep.subr.bf16.mxu0 %v4163_v56  ;;  %v3828_v56 = vsel %vm638_vm6, %v9123_v42, %v9172_v62 }
 0x8f3   : > { %v3904_v13 = vpop.permute.xlu0 %3903  ;;  %4312 = vmatpush1.bf16.msra.mxu0 %v4159_v16  ;;  %v9204_v40 = vpop.permute.xlu1 %3876 }
 0x8f4   : > { %v3917_v22 = vsel %vm728_vm5, %v3902_v30, %v3904_v13  ;;  %v3889_v60 = vsel %vm698_vm4, %v3875_v61, %v9204_v40 }
 0x8f7   : > { %v3873_v0 = vpop.permute.xlu0 %3872  ;;  %v9211_v43 = vpop.permute.xlu1 %3905 }
 0x8f8   : > { %v3887_v2 = vsel %vm698_vm4, %v3871_v39, %v3873_v0  ;;  %v3888_v18 = vsel %vm698_vm4, %v3873_v0, %v3875_v61  ;;  %v3918_v17 = vsel %vm728_vm5, %v3904_v13, %v9211_v43 }
 0x8f9   : > { %v4115_v57 = vsel %vm840_vm1, %v3887_v2, %v3916_v24  ;;  %v4123_v30 = vsel %vm840_vm1, %v3889_v60, %v3918_v17  ;;  %v4119_v59 = vsel %vm840_vm1, %v3888_v18, %v3917_v22 }
 0x8fa   : > { %4272 = vmatprep.subr.bf16.mxu1 %v4115_v57  ;;  %4313 = vmatprep.subr.bf16.mxu0 %v4123_v30 }
 0x8fb   : > { %v3817_v39 = vpop.permute.xlu0 %3816  ;;  %4273 = vmatpush1.bf16.msra.mxu1 %v4111_v51  ;;  %4314 = vmatpush1.bf16.msra.mxu0 %v4119_v59  ;;  %v9226_v47 = vpop.permute.xlu1 %3818 }
 0x8fc   : > { %v3831_v34 = vsel %vm638_vm6, %v3817_v39, %v9226_v47 }
 0x8ff   : > { %v3846_v10 = vpop.permute.xlu0 %3845  ;;  %v9228_v49 = vpop.permute.xlu1 %3847 }
 0x900   : > { %v3860_v54 = vsel %vm668_vm7, %v3846_v10, %v9228_v49  ;;  %v3859_v31 = vsel %vm668_vm7, %v9175_v41, %v3846_v10 }
 0x901   : > { %v4083_v33 = vsel %vm840_vm1, %v3831_v34, %v3860_v54 }
 0x902   : > { %4315 = vmatprep.subr.bf16.mxu0 %v4083_v33 }
 0x903   : > { %v3815_v26 = vpop.permute.xlu0 %3814  ;;  %v9235_v61 = vpop.permute.xlu1 %3789 }
 0x904   : > { %v3830_v4 = vsel %vm638_vm6, %v3815_v26, %v3817_v39  ;;  %v3829_v19 = vsel %vm638_vm6, %v9172_v62, %v3815_v26 }
 0x905   : > { %v4079_v25 = vsel %vm840_vm1, %v3830_v4, %v3859_v31 }
 0x906   : > { %4316 = vmatpush1.bf16.msra.mxu0 %v4079_v25 }
 0x907   : > { %v3788_v16 = vpop.permute.xlu0 %3787  ;;  %v3842_v13 = vpop.permute.xlu1 %3841 }
 0x908   : > { %v3802_v24 = vsel %vm608_vm8, %v3788_v16, %v9235_v61  ;;  %v3857_v22 = vsel %vm668_vm7, %v9133_v5, %v3842_v13  ;;  %v3858_v0 = vsel %vm668_vm7, %v3842_v13, %v9175_v41 }
 0x909   : > { %v4075_v60 = vsel %vm840_vm1, %v3829_v19, %v3858_v0  ;;  %v4043_v2 = vsel %vm840_vm1, %v8981_v12, %v3802_v24  ;;  %v4071_v42 = vsel %vm840_vm1, %v3828_v56, %v3857_v22 }
 0x90a   : > { %4274 = vmatprep.subr.bf16.mxu1 %v4075_v60  ;;  %4317 = vmatprep.subr.bf16.mxu0 %v4043_v2 }
 0x90b   : > { %v3786_v18 = vpop.permute.xlu0 %3785  ;;  %4275 = vmatpush1.bf16.msra.mxu1 %v4071_v42  ;;  %v4004_v62 = vpop.permute.xlu1 %4003 }
 0x90c   : > { %v3801_v17 = vsel %vm608_vm8, %v3786_v18, %v3788_v16 }
 0x90d   : > { %v4039_v5 = vsel %vm840_vm1, %v8971_v58, %v3801_v17 }
 0x90e   : > { %4318 = vmatpush1.bf16.msra.mxu0 %v4039_v5 }
 0x90f   : > { %v3784_v15 = vpop.permute.xlu0 %3783  ;;  %v3940_v41 = vpop.permute.xlu1 %3939 }
 0x910   : > { %v3799_v57 = vsel %vm608_vm8, %v9110_v9, %v3784_v15  ;;  %v3800_v12 = vsel %vm608_vm8, %v3784_v15, %v3786_v18  ;;  %v3953_v24 = vsel %vm763_vm2, %v9186_v21, %v3940_v41 }
 0x911   : > { %5677 = vmatmul.mubr.msk.bf16.vlgmr.msra.gmra.mxu0 %vm10045_vm12, %v9165_v36  ;;  %v4035_v30 = vsel %vm840_vm1, %v8957_v38, %v3800_v12  ;;  %v4031_v59 = vsel %vm840_vm1, %v8932_v11, %v3799_v57  ;;  %v4017_v38 = vsel %vm829_vm0, %v9178_v50, %v4004_v62 }
 0x912   : > { %4276 = vmatprep.subr.bf16.mxu1 %v4035_v30  ;;  %4417 = vmatprep.mubr.bf16.mxu0 %v6630_v6  ;;  %v4210_v26 = vsel %vm840_vm1, %v4017_v38, 0 }
 0x913   : > { %v4010_v58 = vpop.permute.xlu0 %4009  ;;  %4277 = vmatpush1.bf16.msra.mxu1 %v4031_v59  ;;  %v3972_v51 = vpop.permute.xlu1 %3971 }
 0x914   : > { %v3985_v25 = vsel %vm796_vm3, %v9195_v45, %v3972_v51 }
 0x915   : > { %v4167_v45 = vsel %vm840_vm1, %v3953_v24, %v3985_v25 }
 0x916   : > { %5675 = vmatmul.mubr.msk.bf16.vlgmr.msra.gmra.mxu1 %vm10046_vm13, %v9165_v36 }
 0x917   : > { %v3946_v9 = vpop.permute.xlu0 %3945  ;;  %v3879_v39 = vpop.permute.xlu1 %3878  ;;  %4376 = vmatprep.mubr.bf16.mxu1 %v6630_v6 }
 0x918   : > { %v3890_v12 = vsel %vm698_vm4, %v9204_v40, %v3879_v39 }
 0x91b   : > { %v3978_v10 = vpop.permute.xlu0 %3977  ;;  %v3908_v34 = vpop.permute.xlu1 %3907 }
 0x91c   : > { %v3919_v42 = vsel %vm728_vm5, %v9211_v43, %v3908_v34 }
 0x91f   : > { %v4006_v54 = vpop.permute.xlu0 %4005  ;;  %v3821_v11 = vpop.permute.xlu1 %3820 }
 0x920   : > { %v4018_v33 = vsel %vm829_vm0, %v4004_v62, %v4006_v54 }
 0x921   : > { %5678 = vmatprep.subr.msk.bf16.mxu1 %vm840_vm1, %v4018_v33 }
 0x922   : > { %4351 = vmatpush1.bf16.msra.mxu1 %v4210_v26 }
 0x923   : > { %v3942_v31 = vpop.permute.xlu0 %3941  ;;  %v3850_v4 = vpop.permute.xlu1 %3849 }
 0x924   : > { %v3954_v16 = vsel %vm763_vm2, %v3940_v41, %v3942_v31 }
 0x927   : > { %v3974_v6 = vpop.permute.xlu0 %3973  ;;  %v4008_v56 = vpop.permute.xlu1 %4007 }
 0x928   : > { %v3986_v50 = vsel %vm796_vm3, %v3972_v51, %v3974_v6  ;;  %v4019_v13 = vsel %vm829_vm0, %v4006_v54, %v4008_v56  ;;  %v4020_v19 = vsel %vm829_vm0, %v4008_v56, %v4010_v58  ;;  %v4127_v58 = vsel %vm840_vm1, %v3890_v12, %v3919_v42  ;;  %vm10047_vm0 = vmmov %vm10044_vm9  ;;  %v6454_v42 = vld [vmem:[%s10013_s1 + $0xf0] sm:$0xff] }
 0x929   : > { %v4216_v22 = vsel %vm840_vm1, %v4019_v13, 0  ;;  %5680 = vmatprep.subr.msk.bf16.mxu0 %vm840_vm1, %v4020_v19  ;;  %v4171_v0 = vsel %vm840_vm1, %v3954_v16, %v3986_v50  ;;  %v3832_v54 = vsel %vm638_vm6, %v9226_v47, %v3821_v11  ;;  %v6465_v12 = vld [vmem:[%s10013_s1 + $0xd0] sm:$0xff] }
 0x92a   : > { %4352 = vmatprep.subr.bf16.mxu1 %v4171_v0  ;;  %4392 = vmatpush1.bf16.msra.mxu0 %v4216_v22 }
 0x92b   : > { %v3881_v60 = vpop.permute.xlu0 %3880  ;;  %4353 = vmatpush1.bf16.msra.mxu1 %v4167_v45  ;;  %v3944_v2 = vpop.permute.xlu1 %3943 }
 0x92c   : > { %v3891_v18 = vsel %vm698_vm4, %v3879_v39, %v3881_v60  ;;  %v3955_v21 = vsel %vm763_vm2, %v3942_v31, %v3944_v2  ;;  %v3956_v5 = vsel %vm763_vm2, %v3944_v2, %v3946_v9  ;;  %v6453_v2 = vld [vmem:[%s10013_s1 + $0x78] sm:$0xff]  ;;  %vm10048_vm2 = vmmov %vm10047_vm0 }
 0x92f   : > { %v3910_v62 = vpop.permute.xlu0 %3909  ;;  %v3976_v17 = vpop.permute.xlu1 %3975 }
 0x930   : > { %v3920_v15 = vsel %vm728_vm5, %v3908_v34, %v3910_v62  ;;  %v3987_v41 = vsel %vm796_vm3, %v3974_v6, %v3976_v17  ;;  %v3988_v57 = vsel %vm796_vm3, %v3976_v17, %v3978_v10  ;;  %v3861_v10 = vsel %vm668_vm7, %v9228_v49, %v3850_v4  ;;  %v6459_v17 = vld [vmem:[%s10013_s1 + $0xe0] sm:$0xff] }
 0x931   : > { %v4131_v30 = vsel %vm840_vm1, %v3891_v18, %v3920_v15  ;;  %v4179_v43 = vsel %vm840_vm1, %v3956_v5, %v3988_v57  ;;  %v4175_v59 = vsel %vm840_vm1, %v3955_v21, %v3987_v41  ;;  %v4087_v26 = vsel %vm840_vm1, %v3832_v54, %v3861_v10  ;;  %v6455_v21 = vld [vmem:[%s10013_s1 + $0x70] sm:$0xff]  ;;  %v6460_v5 = vld [vmem:[%s10013_s1 + $0x60] sm:$0xff]  ;;  %v6461_v15 = vld [vmem:[%s10013_s1 + $0xd8] sm:$0xff] }
 0x932   : > { %4354 = vmatprep.subr.bf16.mxu1 %v4131_v30  ;;  %4393 = vmatprep.subr.bf16.mxu0 %v4179_v43  ;;  %v6462_v41 = vld [vmem:[%s10013_s1 + $0x178] sm:$0xff]  ;;  %v6466_v30 = vld [vmem:[%s10013_s1 + $0x170] sm:$0xff]  ;;  %v6472_v10 = vld [vmem:[%s10013_s1 + $0x1e0] sm:$0xff]  ;;  %vm10049_vm3 = vcmask 1041408  }
 0x933   : > { %v3823_v51 = vpop.permute.xlu0 %3822  ;;  %4355 = vmatpush1.bf16.msra.mxu1 %v4127_v58  ;;  %4394 = vmatpush1.bf16.msra.mxu0 %v4175_v59  ;;  %v3792_v9 = vpop.permute.xlu1 %3791  ;;  %v6463_v57 = vld [vmem:[%s10013_s1 + $0x58] sm:$0xff]  ;;  %v6467_v43 = vld [vmem:[%s10013_s1 + $0x50] sm:$0xff]  ;;  %v6468_v59 = vld [vmem:[%s10013_s1 + $0x1e8] sm:$0xff] }
 0x934   : > { %v3833_v40 = vsel %vm638_vm6, %v3821_v11, %v3823_v51  ;;  %v3803_v47 = vsel %vm608_vm8, %v9235_v61, %v3792_v9  ;;  %v6452_v61 = vld [vmem:[%s10013_s1 + $0xf8] sm:$0xff]  ;;  %v6469_v58 = vld [vmem:[%s10013_s1 + $0xc8] sm:$0xff] }
 0x935   : > { %v4047_v13 = vsel %vm840_vm1, %v8991_v8, %v3803_v47  ;;  %v6477_v54 = vld [vmem:[%s10013_s1 + $0xb8] sm:$0xff]  ;;  %v6486_v47 = vld [vmem:[%s10013_s1 + $0x148] sm:$0xff] }
 0x937   : > { %v3852_v34 = vpop.permute.xlu0 %3851  ;;  %v3883_v38 = vpop.permute.xlu1 %3882 }
 0x938   : > { %v3862_v39 = vsel %vm668_vm7, %v3850_v4, %v3852_v34  ;;  %v3892_v25 = vsel %vm698_vm4, %v3881_v60, %v3883_v38  ;;  %vm10050_vm4 = vcmask 867328  }
 0x939   : > { %v4091_v33 = vsel %vm840_vm1, %v3833_v40, %v3862_v39  ;;  %v6475_v40 = vld [vmem:[%s10013_s1 + $0x40] sm:$0xff]  ;;  %v6476_v39 = vld [vmem:[%s10013_s1 + $0x1d8] sm:$0xff] }
 0x93a   : > { %4356 = vmatprep.subr.bf16.mxu1 %v4091_v33  ;;  %v6478_v33 = vld [vmem:[%s10013_s1 + $0x158] sm:$0xff] }
 0x93b   : > { %v3912_v31 = vpop.permute.xlu0 %3911  ;;  %4357 = vmatpush1.bf16.msra.mxu1 %v4087_v26  ;;  %v3825_v56 = vpop.permute.xlu1 %3824  ;;  %v6479_v26 = vld [vmem:[%s10013_s1 + $0x38] sm:$0xff] }
 0x93c   : > { %v3921_v49 = vsel %vm728_vm5, %v3910_v62, %v3912_v31  ;;  %v4139_v6 = vsel %vm840_vm1, %v3883_v38, %v3912_v31  ;;  %v3834_v22 = vsel %vm638_vm6, %v3823_v51, %v3825_v56  ;;  %v6457_v62 = vld [vmem:[%s10013_s1 + $0x68] sm:$0xff]  ;;  %v6474_v38 = vld [vmem:[%s10013_s1 + $0x160] sm:$0xff]  ;;  %v6480_v31 = vld [vmem:[%s10013_s1 + $0x1d0] sm:$0xff] }
 0x93d   : > { %4395 = vmatprep.subr.bf16.mxu0 %v4139_v6  ;;  %v4135_v4 = vsel %vm840_vm1, %v3892_v25, %v3921_v49  ;;  %v6470_v51 = vld [vmem:[%s10013_s1 + $0x168] sm:$0xff]  ;;  %v6481_v25 = vld [vmem:[%s10013_s1 + $0xb0] sm:$0xff]  ;;  %vm10051_vm5 = vmmov %vm10050_vm4 }
 0x93e   : > { %4396 = vmatpush1.bf16.msra.mxu0 %v4135_v4  ;;  %v6482_v49 = vld [vmem:[%s10013_s1 + $0x150] sm:$0xff]  ;;  %v6485_v4 = vld [vmem:[%s10013_s1 + $0xa8] sm:$0xff]  ;;  %vm10052_vm6 = vmmov %vm10042_vm10 }
 0x93f   : > { %v3794_v11 = vpop.permute.xlu0 %3793  ;;  %v3796_v19 = vpop.permute.xlu1 %3795  ;;  %v6483_v6 = vld [vmem:[%s10013_s1 + $0x30] sm:$0xff]  ;;  %vm10055_vm15 = vmmov %vm10052_vm6 }
 0x940   : > { %v3804_v16 = vsel %vm608_vm8, %v3792_v9, %v3794_v11  ;;  %v3805_v60 = vsel %vm608_vm8, %v3794_v11, %v3796_v19  ;;  %v4059_v8 = vsel %vm840_vm1, %v9062_v63, %v3796_v19  ;;  %v6456_v63 = vld [vmem:[%s10013_s1 + $0xe8] sm:$0xff]  ;;  %v6491_v19 = vld [vmem:[%s10013_s1 + $0x20] sm:$0xff]  ;;  %vm10054_vm8 = vmmov %vm10052_vm6 }
 0x941   : > { %v4051_v50 = vsel %vm840_vm1, %v9029_v55, %v3804_v16  ;;  %v4055_v18 = vsel %vm840_vm1, %v9048_v37, %v3805_v60  ;;  %v6458_v37 = vld [vmem:[%s10013_s1 + $0x1f8] sm:$0xff]  ;;  %v6471_v9 = vld [vmem:[%s10013_s1 + $0x48] sm:$0xff]  ;;  %v6488_v16 = vld [vmem:[%s10013_s1 + $0x1c0] sm:$0xff] }
 0x942   : > { %4358 = vmatprep.subr.bf16.mxu1 %v4051_v50  ;;  %v6487_v11 = vld [vmem:[%s10013_s1 + $0x28] sm:$0xff]  ;;  %v6489_v50 = vld [vmem:[%s10013_s1 + $0xa0] sm:$0xff]  ;;  %v6498_v60 = vld [vmem:[%s10013_s1 + $0x130] sm:$0xff] }
 0x943   : > { %v3854_v24 = vpop.permute.xlu0 %3853  ;;  %4359 = vmatpush1.bf16.msra.mxu1 %v4047_v13  ;;  %v6490_v13 = vld [vmem:[%s10013_s1 + $0x140] sm:$0xff]  ;;  %vm10056_vm14 = vmmov %vm10052_vm6 }
 0x944   : > { %v3863_v0 = vsel %vm668_vm7, %v3852_v34, %v3854_v24  ;;  %v4099_v45 = vsel %vm840_vm1, %v3825_v56, %v3854_v24  ;;  %6041 = vmatprep.subr.mxu1 %v6452_v61  ;;  %v6473_v34 = vld [vmem:[%s10013_s1 + $0xc0] sm:$0xff]  ;;  %v6484_v56 = vld [vmem:[%s10013_s1 + $0x1c8] sm:$0xff]  ;;  %v6492_v24 = vld [vmem:[%s10013_s1 + $0x1b8] sm:$0xff] }
 0x945   : > { %4397 = vmatprep.subr.bf16.mxu0 %v4099_v45  ;;  %v4095_v55 = vsel %vm840_vm1, %v3834_v22, %v3863_v0  ;;  %v6493_v22 = vld [vmem:[%s10013_s1 + $0x98] sm:$0xff]  ;;  %v6496_v61 = vld [vmem:[%s10013_s1 + $0x1b0] sm:$0xff]  ;;  %vm10053_vm7 = vmmov %vm10052_vm6 }
 0x946   : > { %5679 = vmatmul.mubr.msk.bf16.vlgmr.msra.gmra.mxu1 %vm10047_vm0, %v9165_v36  ;;  %4398 = vmatpush1.bf16.msra.mxu0 %v4095_v55  ;;  %v6494_v0 = vld [vmem:[%s10013_s1 + $0x138] sm:$0xff]  ;;  %v6497_v55 = vld [vmem:[%s10013_s1 + $0x90] sm:$0xff]  ;;  %vm10057_vm11 = vmmov %vm10052_vm6 }
 0x947   : > { %4399 = vmatprep.subr.bf16.mxu0 %v4059_v8  ;;  %6042 = vmatpush3.msra.mxu1 %v6453_v2  ;;  %v6495_v45 = vld [vmem:[%s10013_s1 + $0x18] sm:$0xff]  ;;  %v6499_v8 = vld [vmem:[%s10013_s1 + $0x10] sm:$0xff]  ;;  %v6500_v2 = vld [vmem:[%s10013_s1 + $0x1a8] sm:$0xff] }
 0x948   : > { %6043 = vmatprep.subr.mxu1 %v6454_v42  ;;  %v6501_v42 = vld [vmem:[%s10013_s1 + $0x88] sm:$0xff]  ;;  %vm10058_vm10 = vmmov %vm10052_vm6 }
 0x949   : > { %6044 = vmatpush3.msra.mxu1 %v6455_v21  ;;  %v6503_v21 = vld [vmem:[%s10013_s1 + $0x8] sm:$0xff]  ;;  %vm10059_vm9 = vmmov %vm10052_vm6 }
 0x94a   : > { %4400 = vmatpush1.bf16.msra.mxu0 %v4055_v18  ;;  %6045 = vmatprep.subr.mxu1 %v6456_v63  ;;  %v6502_v18 = vld [vmem:[%s10013_s1 + $0x128] sm:$0xff]  ;;  %v6504_v63 = vld [vmem:[%s10013_s1 + $0x1a0] sm:$0xff]  ;;  %vm10060_vm12 = vmmov %vm10052_vm6 }
 0x94b   : > { %6046 = vmatpush3.msra.mxu1 %v6457_v62  ;;  %6079 = vmatprep.subr.mxu0 %v6458_v37  ;;  %v6505_v62 = vld [vmem:[%s10013_s1 + $0x80] sm:$0xff]  ;;  %vm10061_vm13 = vmmov %vm10052_vm6 }
 0x94c   : > { %6047 = vmatprep.subr.mxu1 %v6459_v17  ;;  %v6506_v37 = vld [vmem:[%s10013_s1 + $0x120] sm:$0xff] }
 0x94d   : > { %5681 = vmatmul.mubr.msk.bf16.vlgmr.msra.gmra.mxu0 %vm10048_vm2, %v9165_v36  ;;  %6048 = vmatpush3.msra.mxu1 %v6460_v5  ;;  %v6464_v36 = vld [vmem:[%s10013_s1 + $0x1f0] sm:$0xff]  ;;  %v6507_v17 = vld [vmem:[%s10013_s1] sm:$0xff]  ;;  %v6508_v5 = vld [vmem:[%s10013_s1 + $0x198] sm:$0xff] }
 0x94e   : > { %6049 = vmatprep.subr.mxu1 %v6461_v15  ;;  %6080 = vmatpush3.msra.mxu0 %v6462_v41  ;;  %v6509_v15 = vld [vmem:[%s10013_s1 + $0x2f8] sm:$0xff] }
 0x94f   : > { %6050 = vmatpush3.msra.mxu1 %v6463_v57  ;;  %6081 = vmatprep.subr.mxu0 %v6464_v36  ;;  %v6510_v41 = vld [vmem:[%s10013_s1 + $0x118] sm:$0xff]  ;;  %v6511_v57 = vld [vmem:[%s10013_s1 + $0x190] sm:$0xff] }
 0x950   : > { %6051 = vmatprep.subr.mxu1 %v6465_v12  ;;  %6082 = vmatpush3.msra.mxu0 %v6466_v30  ;;  %v6512_v36 = vld [vmem:[%s10013_s1 + $0x110] sm:$0xff]  ;;  %v6513_v12 = vld [vmem:[%s10013_s1 + $0x188] sm:$0xff] }
 0x951   : > { %6052 = vmatpush3.msra.mxu1 %v6467_v43  ;;  %6083 = vmatprep.subr.mxu0 %v6468_v59  ;;  %v6514_v30 = vld [vmem:[%s10013_s1 + $0x108] sm:$0xff]  ;;  %v6515_v43 = vld [vmem:[%s10013_s1 + $0x180] sm:$0xff] }
 0x952   : > { %6053 = vmatprep.subr.mxu1 %v6469_v58  ;;  %6084 = vmatpush3.msra.mxu0 %v6470_v51  ;;  %v6516_v59 = vld [vmem:[%s10013_s1 + $0x100] sm:$0xff]  ;;  %v6517_v58 = vld [vmem:[%s10013_s1 + $0x3f8] sm:$0xff] }
 0x953   : > { %6054 = vmatpush3.msra.mxu1 %v6471_v9  ;;  %6085 = vmatprep.subr.mxu0 %v6472_v10  ;;  %v9533_v9 = vpop.permute.xlu0 %4185 }
 0x954   : > { %6055 = vmatprep.subr.mxu1 %v6473_v34  ;;  %6086 = vmatpush3.msra.mxu0 %v6474_v38 }
 0x955   : > { %6056 = vmatpush3.msra.mxu1 %v6475_v40  ;;  %6087 = vmatprep.subr.mxu0 %v6476_v39 }
 0x956   : > { %6057 = vmatprep.subr.mxu1 %v6477_v54  ;;  %6088 = vmatpush3.msra.mxu0 %v6478_v33 }
 0x957   : > { %6058 = vmatpush3.msra.mxu1 %v6479_v26  ;;  %6089 = vmatprep.subr.mxu0 %v6480_v31  ;;  %v6518_v31 = vld [vmem:[%s10013_s1 + $0x278] sm:$0xff] }
 0x958   : > { %6059 = vmatprep.subr.mxu1 %v6481_v25  ;;  %6090 = vmatpush3.msra.mxu0 %v6482_v49  ;;  %v6519_v49 = vld [vmem:[%s10013_s1 + $0x2f0] sm:$0xff] }
 0x959   : > { %6060 = vmatpush3.msra.mxu1 %v6483_v6  ;;  %6091 = vmatprep.subr.mxu0 %v6484_v56  ;;  %v6520_v6 = vld [vmem:[%s10013_s1 + $0x270] sm:$0xff]  ;;  %v6521_v56 = vld [vmem:[%s10013_s1 + $0x2e8] sm:$0xff] }
 0x95a   : > { %6061 = vmatprep.subr.mxu1 %v6485_v4  ;;  %6092 = vmatpush3.msra.mxu0 %v6486_v47  ;;  %v6522_v4 = vld [vmem:[%s10013_s1 + $0x268] sm:$0xff]  ;;  %v6523_v47 = vld [vmem:[%s10013_s1 + $0x2e0] sm:$0xff] }
 0x95b   : > { %6062 = vmatpush3.msra.mxu1 %v6487_v11  ;;  %6093 = vmatprep.subr.mxu0 %v6488_v16  ;;  %v6524_v11 = vld [vmem:[%s10013_s1 + $0x260] sm:$0xff]  ;;  %v6525_v16 = vld [vmem:[%s10013_s1 + $0x2d8] sm:$0xff] }
 0x95c   : > { %6063 = vmatprep.subr.mxu1 %v6489_v50  ;;  %6094 = vmatpush3.msra.mxu0 %v6490_v13  ;;  %v6526_v50 = vld [vmem:[%s10013_s1 + $0x258] sm:$0xff]  ;;  %v6527_v13 = vld [vmem:[%s10013_s1 + $0x2d0] sm:$0xff] }
 0x95d   : > { %6064 = vmatpush3.msra.mxu1 %v6491_v19  ;;  %6095 = vmatprep.subr.mxu0 %v6492_v24  ;;  %v6528_v19 = vld [vmem:[%s10013_s1 + $0x250] sm:$0xff]  ;;  %v6529_v24 = vld [vmem:[%s10013_s1 + $0x2c8] sm:$0xff] }
 0x95e   : > { %6065 = vmatprep.subr.mxu1 %v6493_v22  ;;  %6096 = vmatpush3.msra.mxu0 %v6494_v0  ;;  %v6530_v22 = vld [vmem:[%s10013_s1 + $0x248] sm:$0xff]  ;;  %v6531_v0 = vld [vmem:[%s10013_s1 + $0x2c0] sm:$0xff] }
 0x95f   : > { %6066 = vmatpush3.msra.mxu1 %v6495_v45  ;;  %6097 = vmatprep.subr.mxu0 %v6496_v61  ;;  %v6532_v45 = vld [vmem:[%s10013_s1 + $0x240] sm:$0xff]  ;;  %v6533_v61 = vld [vmem:[%s10013_s1 + $0x2b8] sm:$0xff] }
 0x960   : > { %6067 = vmatprep.subr.mxu1 %v6497_v55  ;;  %6098 = vmatpush3.msra.mxu0 %v6498_v60  ;;  %v6534_v55 = vld [vmem:[%s10013_s1 + $0x238] sm:$0xff]  ;;  %v6535_v60 = vld [vmem:[%s10013_s1 + $0x2b0] sm:$0xff] }
 0x961   : > { %6068 = vmatpush3.msra.mxu1 %v6499_v8  ;;  %6099 = vmatprep.subr.mxu0 %v6500_v2  ;;  %v6536_v8 = vld [vmem:[%s10013_s1 + $0x230] sm:$0xff]  ;;  %v6537_v2 = vld [vmem:[%s10013_s1 + $0x2a8] sm:$0xff] }
 0x962   : > { %6069 = vmatprep.subr.mxu1 %v6501_v42  ;;  %6100 = vmatpush3.msra.mxu0 %v6502_v18  ;;  %v6538_v42 = vld [vmem:[%s10013_s1 + $0x228] sm:$0xff]  ;;  %v6539_v18 = vld [vmem:[%s10013_s1 + $0x2a0] sm:$0xff] }
 0x963   : > { %6070 = vmatpush3.msra.mxu1 %v6503_v21  ;;  %6101 = vmatprep.subr.mxu0 %v6504_v63  ;;  %v6540_v21 = vld [vmem:[%s10013_s1 + $0x220] sm:$0xff]  ;;  %v6541_v63 = vld [vmem:[%s10013_s1 + $0x298] sm:$0xff] }
 0x964   : > { %6071 = vmatprep.subr.mxu1 %v6505_v62  ;;  %6102 = vmatpush3.msra.mxu0 %v6506_v37  ;;  %v6542_v62 = vld [vmem:[%s10013_s1 + $0x218] sm:$0xff]  ;;  %v6543_v37 = vld [vmem:[%s10013_s1 + $0x290] sm:$0xff] }
 0x965   : > { %6072 = vmatpush3.msra.mxu1 %v6507_v17  ;;  %6103 = vmatprep.subr.mxu0 %v6508_v5  ;;  %v6544_v17 = vld [vmem:[%s10013_s1 + $0x210] sm:$0xff]  ;;  %v6545_v5 = vld [vmem:[%s10013_s1 + $0x288] sm:$0xff] }
 0x966   : > { %6117 = vmatprep.subr.mxu1 %v6509_v15  ;;  %6104 = vmatpush3.msra.mxu0 %v6510_v41  ;;  %v6546_v15 = vld [vmem:[%s10013_s1 + $0x208] sm:$0xff]  ;;  %v6547_v41 = vld [vmem:[%s10013_s1 + $0x280] sm:$0xff] }
 0x967   : > { %6105 = vmatprep.subr.mxu0 %v6511_v57  ;;  %v6548_v57 = vld [vmem:[%s10013_s1 + $0x200] sm:$0xff] }
 0x968   : > { %6106 = vmatpush3.msra.mxu0 %v6512_v36 }
 0x969   : > { %6107 = vmatprep.subr.mxu0 %v6513_v12 }
 0x96a   : > { %6108 = vmatpush3.msra.mxu0 %v6514_v30 }
 0x96b   : > { %6109 = vmatprep.subr.mxu0 %v6515_v43 }
 0x96c   : > { %6110 = vmatpush3.msra.mxu0 %v6516_v59 }
 0x96d   : > { %6155 = vmatprep.subr.mxu0 %v6517_v58 }
 0x99a   : > { %v4255_v51 = vpop.f32.mrf.mxu0 }
 0x99b   : > { %v4256_v10 = vadd.f32 %v4255_v51, %v9533_v9 }
 0x99c   : > { %v4257_v34 = vpop.f32.mrf.mxu0 }
 0x99d   : > { %v4258_v38 = vadd.f32 %v4257_v34, %v9533_v9  ;;  %v9539_v54 = vmax.f32 %v4256_v10, 0.0 }
 0x99e   : > { %v4259_v40 = vpop.f32.mrf.mxu0 }
 0x99f   : > { %v9537_v39 = vmax.f32 %v4258_v38, 0.0  ;;  %v4436_v25 = vmul.f32 %v9539_v54, %v9539_v54 }
 0x9a0   : > { %v4260_v33 = vpop.f32.mrf.mxu0 }
 0x9a1   : > { %4516 = vmatprep.mubr.f32.mxu1 %v9537_v39  ;;  %v4437_v26 = vmul.f32 %v9537_v39, %v9537_v39 }
 0x9a2   : > { %4517 = vmatmul.mubr.f32.vlgmr.msra.gmra.mxu1 %v9539_v54 }
 0x9a3   : > { %4521 = vmatprep.mubr.f32.mxu1 %v4437_v26  ;;  %6118 = vmatpush3.msra.mxu1 %v6518_v31  ;;  %v6549_v31 = vld [vmem:[%s10013_s1 + $0x478] sm:$0xff] }
 0x9a4   : > { %6119 = vmatprep.subr.mxu1 %v6519_v49 }
 0x9a5   : > { %6120 = vmatpush3.msra.mxu1 %v6520_v6 }
 0x9a6   : > { %4522 = vmatmul.mubr.f32.gmra.mxu1 %v4436_v25  ;;  %6121 = vmatprep.subr.mxu1 %v6521_v56 }
 0x9a7   : > { %6122 = vmatpush3.msra.mxu1 %v6522_v4  ;;  %v6550_v4 = vld [vmem:[%s10013_s1 + $0x470] sm:$0xff] }
 0x9a8   : > { %6123 = vmatprep.subr.mxu1 %v6523_v47 }
 0x9a9   : > { %6124 = vmatpush3.msra.mxu1 %v6524_v11 }
 0x9aa   : > { %6125 = vmatprep.subr.mxu1 %v6525_v16  ;;  %v6551_v16 = vld [vmem:[%s10013_s1 + $0x468] sm:$0xff] }
 0x9ab   : > { %6126 = vmatpush3.msra.mxu1 %v6526_v50 }
 0x9ac   : > { %6127 = vmatprep.subr.mxu1 %v6527_v13  ;;  %v6552_v13 = vld [vmem:[%s10013_s1 + $0x378] sm:$0xff] }
 0x9ad   : > { %6128 = vmatpush3.msra.mxu1 %v6528_v19  ;;  %v6553_v19 = vld [vmem:[%s10013_s1 + $0x460] sm:$0xff] }
 0x9ae   : > { %6129 = vmatprep.subr.mxu1 %v6529_v24  ;;  %v6554_v24 = vld [vmem:[%s10013_s1 + $0x3f0] sm:$0xff] }
 0x9af   : > { %6130 = vmatpush3.msra.mxu1 %v6530_v22  ;;  %v6555_v22 = vld [vmem:[%s10013_s1 + $0x458] sm:$0xff] }
 0x9b0   : > { %6131 = vmatprep.subr.mxu1 %v6531_v0  ;;  %v6556_v0 = vld [vmem:[%s10013_s1 + $0x370] sm:$0xff] }
 0x9b1   : > { %6132 = vmatpush3.msra.mxu1 %v6532_v45  ;;  %v6557_v45 = vld [vmem:[%s10013_s1 + $0x3e8] sm:$0xff] }
 0x9b2   : > { %6133 = vmatprep.subr.mxu1 %v6533_v61  ;;  %v6558_v61 = vld [vmem:[%s10013_s1 + $0x450] sm:$0xff] }
 0x9b3   : > { %6134 = vmatpush3.msra.mxu1 %v6534_v55  ;;  %v6559_v55 = vld [vmem:[%s10013_s1 + $0x368] sm:$0xff] }
 0x9b4   : > { %6135 = vmatprep.subr.mxu1 %v6535_v60  ;;  %v6560_v60 = vld [vmem:[%s10013_s1 + $0x3e0] sm:$0xff] }
 0x9b5   : > { %6136 = vmatpush3.msra.mxu1 %v6536_v8  ;;  %v6561_v8 = vld [vmem:[%s10013_s1 + $0x448] sm:$0xff] }
 0x9b6   : > { %6137 = vmatprep.subr.mxu1 %v6537_v2  ;;  %v6562_v2 = vld [vmem:[%s10013_s1 + $0x360] sm:$0xff] }
 0x9b7   : > { %6138 = vmatpush3.msra.mxu1 %v6538_v42  ;;  %v6563_v42 = vld [vmem:[%s10013_s1 + $0x3d8] sm:$0xff] }
 0x9b8   : > { %6139 = vmatprep.subr.mxu1 %v6539_v18  ;;  %v6564_v18 = vld [vmem:[%s10013_s1 + $0x440] sm:$0xff] }
 0x9b9   : > { %6140 = vmatpush3.msra.mxu1 %v6540_v21  ;;  %v6565_v21 = vld [vmem:[%s10013_s1 + $0x358] sm:$0xff] }
 0x9ba   : > { %6141 = vmatprep.subr.mxu1 %v6541_v63  ;;  %v6566_v63 = vld [vmem:[%s10013_s1 + $0x3d0] sm:$0xff] }
 0x9bb   : > { %6142 = vmatpush3.msra.mxu1 %v6542_v62  ;;  %v6567_v62 = vld [vmem:[%s10013_s1 + $0x438] sm:$0xff] }
 0x9bc   : > { %6143 = vmatprep.subr.mxu1 %v6543_v37  ;;  %v6568_v37 = vld [vmem:[%s10013_s1 + $0x350] sm:$0xff] }
 0x9bd   : > { %6144 = vmatpush3.msra.mxu1 %v6544_v17  ;;  %v6569_v17 = vld [vmem:[%s10013_s1 + $0x3c8] sm:$0xff] }
 0x9be   : > { %6145 = vmatprep.subr.mxu1 %v6545_v5  ;;  %v6570_v5 = vld [vmem:[%s10013_s1 + $0x430] sm:$0xff] }
 0x9bf   : > { %6146 = vmatpush3.msra.mxu1 %v6546_v15  ;;  %v6571_v15 = vld [vmem:[%s10013_s1 + $0x348] sm:$0xff] }
 0x9c0   : > { %6147 = vmatprep.subr.mxu1 %v6547_v41  ;;  %v6572_v41 = vld [vmem:[%s10013_s1 + $0x3c0] sm:$0xff] }
 0x9c1   : > { %6148 = vmatpush3.msra.mxu1 %v6548_v57  ;;  %v6573_v57 = vld [vmem:[%s10013_s1 + $0x428] sm:$0xff] }
 0x9c2   : > { %4752 = vmatprep.subr.mxu1 %v6632_v53 }
 0x9d1   : > { %v4337_v36 = vpop.f32.mrf.mxu0 }
 0x9d2   : > { %v4338_v12 = vadd.f32 %v4337_v36, %v9533_v9  ;;  %v6574_v36 = vld [vmem:[%s10013_s1 + $0x340] sm:$0xff] }
 0x9d3   : > { %v4339_v30 = vpop.f32.mrf.mxu0 }
 0x9d4   : > { %v4340_v43 = vadd.f32 %v4339_v30, %v9533_v9  ;;  %v9645_v10 = vmax.f32 %v4338_v12, 0.0  ;;  %v6575_v12 = vld [vmem:[%s10013_s1 + $0x3b8] sm:$0xff]  ;;  %v6576_v30 = vld [vmem:[%s10013_s1 + $0x420] sm:$0xff] }
 0x9d5   : > { %v4341_v59 = vpop.f32.mrf.mxu0 }
 0x9d6   : > { %v9643_v58 = vmax.f32 %v4340_v43, 0.0  ;;  %v4296_v51 = vpop.f32.mrf.mxu1  ;;  %v4440_v6 = vmul.f32 %v9645_v10, %v9645_v10  ;;  %v6577_v43 = vld [vmem:[%s10013_s1 + $0x338] sm:$0xff]  ;;  %v6578_v59 = vld [vmem:[%s10013_s1 + $0x3b0] sm:$0xff] }
 0x9d7   : > { %v4342_v34 = vpop.f32.mrf.mxu0  ;;  %v4297_v38 = vadd.f32 %v4296_v51, %v9533_v9  ;;  %v6579_v51 = vld [vmem:[%s10013_s1 + $0x418] sm:$0xff] }
 0x9d8   : > { %v4298_v40 = vpop.f32.mrf.mxu1  ;;  %4666 = vmatprep.mubr.f32.mxu1 %v9643_v58  ;;  %v4441_v33 = vmul.f32 %v9643_v58, %v9643_v58  ;;  %v6580_v34 = vld [vmem:[%s10013_s1 + $0x330] sm:$0xff] }
 0x9d9   : > { %v4299_v26 = vadd.f32 %v4298_v40, %v9533_v9  ;;  %4667 = vmatmul.mubr.f32.vlgmr.msra.gmra.mxu1 %v9645_v10  ;;  %v9661_v56 = vmax.f32 %v4297_v38, 0.0  ;;  %v6581_v38 = vld [vmem:[%s10013_s1 + $0x3a8] sm:$0xff]  ;;  %v6582_v40 = vld [vmem:[%s10013_s1 + $0x410] sm:$0xff] }
 0x9da   : > { %4671 = vmatprep.mubr.f32.mxu1 %v4441_v33  ;;  %4753 = vmatpush1.msra.mxu1 %v6549_v31  ;;  %v4300_v25 = vpop.f32.mrf.mxu1  ;;  %v6583_v33 = vld [vmem:[%s10013_s1 + $0x328] sm:$0xff] }
 0x9db   : > { %v9656_v49 = vmax.f32 %v4299_v26, 0.0  ;;  %4754 = vmatprep.subr.mxu1 %v6632_v53  ;;  %v4438_v50 = vmul.f32 %v9661_v56, %v9661_v56  ;;  %v6584_v26 = vld [vmem:[%s10013_s1 + $0x3a0] sm:$0xff]  ;;  %v6585_v31 = vld [vmem:[%s10013_s1 + $0x408] sm:$0xff] }
 0x9dc   : > { %4755 = vmatpush1.msra.mxu1 %v6550_v4  ;;  %v4301_v47 = vpop.f32.mrf.mxu1  ;;  %v6586_v25 = vld [vmem:[%s10013_s1 + $0x320] sm:$0xff] }
 0x9dd   : > { %4591 = vmatprep.mubr.f32.mxu0 %v9656_v49  ;;  %4672 = vmatmul.mubr.f32.gmra.mxu1 %v4440_v6  ;;  %v4439_v11 = vmul.f32 %v9656_v49, %v9656_v49  ;;  %v6587_v6 = vld [vmem:[%s10013_s1 + $0x398] sm:$0xff]  ;;  %v6588_v4 = vld [vmem:[%s10013_s1 + $0x400] sm:$0xff] }
 0x9de   : > { %4756 = vmatprep.subr.mxu1 %v6632_v53  ;;  %4592 = vmatmul.mubr.f32.vlgmr.msra.gmra.mxu0 %v9661_v56  ;;  %v6589_v47 = vld [vmem:[%s10013_s1 + $0x318] sm:$0xff] }
 0x9df   : > { %4757 = vmatpush1.msra.mxu1 %v6551_v16  ;;  %4596 = vmatprep.mubr.f32.mxu0 %v4439_v11  ;;  %v6590_v11 = vld [vmem:[%s10013_s1 + $0x390] sm:$0xff]  ;;  %v6591_v16 = vld [vmem:[%s10013_s1 + $0x4e8] sm:$0x3] }
 0x9e0   : > { %4758 = vmatprep.subr.mxu1 %v6632_v53  ;;  %6156 = vmatpush3.msra.mxu0 %v6552_v13  ;;  %v6593_v13 = vld [vmem:[%s10013_s1 + $0x388] sm:$0xff] }
 0x9e1   : > { %4759 = vmatpush1.msra.mxu1 %v6553_v19  ;;  %6157 = vmatprep.subr.mxu0 %v6554_v24  ;;  %v6594_v19 = vld [vmem:[%s10013_s1 + $0x4e0] sm:$0xff]  ;;  %v6595_v24 = vld [vmem:[%s10013_s1 + $0x308] sm:$0xff] }
 0x9e2   : > { %4760 = vmatprep.subr.mxu1 %v6632_v53  ;;  %4597 = vmatmul.mubr.f32.gmra.mxu0 %v4438_v50  ;;  %v6592_v50 = vld [vmem:[%s10013_s1 + $0x310] sm:$0xff] }
 0x9e3   : > { %4761 = vmatpush1.msra.mxu1 %v6555_v22  ;;  %6158 = vmatpush3.msra.mxu0 %v6556_v0  ;;  %v6596_v22 = vld [vmem:[%s10013_s1 + $0x380] sm:$0xff]  ;;  %v6597_v0 = vld [vmem:[%s10013_s1 + $0x4d8] sm:$0xff] }
 0x9e4   : > { %4762 = vmatprep.subr.mxu1 %v6632_v53  ;;  %6159 = vmatprep.subr.mxu0 %v6557_v45  ;;  %v6598_v45 = vld [vmem:[%s10013_s1 + $0x300] sm:$0xff] }
 0x9e5   : > { %4763 = vmatpush1.msra.mxu1 %v6558_v61  ;;  %6160 = vmatpush3.msra.mxu0 %v6559_v55  ;;  %v6599_v61 = vld [vmem:[%s10013_s1 + $0x4d0] sm:$0xff]  ;;  %v6600_v55 = vld [vmem:[%s10013_s1 + $0x4c8] sm:$0xff] }
 0x9e6   : > { %4764 = vmatprep.subr.mxu1 %v6632_v53  ;;  %6161 = vmatprep.subr.mxu0 %v6560_v60  ;;  %v6601_v60 = vld [vmem:[%s10013_s1 + $0x4c0] sm:$0xff] }
 0x9e7   : > { %4765 = vmatpush1.msra.mxu1 %v6561_v8  ;;  %6162 = vmatpush3.msra.mxu0 %v6562_v2  ;;  %v6602_v8 = vld [vmem:[%s10013_s1 + $0x4b8] sm:$0xff] }
 0x9e8   : > { %4766 = vmatprep.subr.mxu1 %v6632_v53  ;;  %6163 = vmatprep.subr.mxu0 %v6563_v42 }
 0x9e9   : > { %4767 = vmatpush1.msra.mxu1 %v6564_v18  ;;  %6164 = vmatpush3.msra.mxu0 %v6565_v21  ;;  %v6603_v21 = vld [vmem:[%s10013_s1 + $0x4b0] sm:$0xff] }
 0x9ea   : > { %4768 = vmatprep.subr.mxu1 %v6632_v53  ;;  %6165 = vmatprep.subr.mxu0 %v6566_v63 }
 0x9eb   : > { %4769 = vmatpush1.msra.mxu1 %v6567_v62  ;;  %6166 = vmatpush3.msra.mxu0 %v6568_v37  ;;  %v6604_v37 = vld [vmem:[%s10013_s1 + $0x4a8] sm:$0xff] }
 0x9ec   : > { %4770 = vmatprep.subr.mxu1 %v6632_v53  ;;  %6167 = vmatprep.subr.mxu0 %v6569_v17 }
 0x9ed   : > { %4771 = vmatpush1.msra.mxu1 %v6570_v5  ;;  %6168 = vmatpush3.msra.mxu0 %v6571_v15  ;;  %v6605_v15 = vld [vmem:[%s10013_s1 + $0x4a0] sm:$0xff] }
 0x9ee   : > { %4772 = vmatprep.subr.mxu1 %v6632_v53  ;;  %6169 = vmatprep.subr.mxu0 %v6572_v41 }
 0x9ef   : > { %4773 = vmatpush1.msra.mxu1 %v6573_v57  ;;  %6170 = vmatpush3.msra.mxu0 %v6574_v36  ;;  %v6606_v36 = vld [vmem:[%s10013_s1 + $0x498] sm:$0xff] }
 0x9f0   : > { %4774 = vmatprep.subr.mxu1 %v6632_v53  ;;  %6171 = vmatprep.subr.mxu0 %v6575_v12 }
 0x9f1   : > { %4775 = vmatpush1.msra.mxu1 %v6576_v30  ;;  %6172 = vmatpush3.msra.mxu0 %v6577_v43 }
 0x9f2   : > { %4776 = vmatprep.subr.mxu1 %v6632_v53  ;;  %6173 = vmatprep.subr.mxu0 %v6578_v59 }
 0x9f3   : > { %4777 = vmatpush1.msra.mxu1 %v6579_v51  ;;  %6174 = vmatpush3.msra.mxu0 %v6580_v34  ;;  %v6607_v51 = vld [vmem:[%s10014_s2] sm:$0xff]  ;;  %v6608_v34 = vld [vmem:[%s10013_s1 + $0x490] sm:$0xff] }
 0x9f4   : > { %4778 = vmatprep.subr.mxu1 %v6632_v53  ;;  %6175 = vmatprep.subr.mxu0 %v6581_v38 }
 0x9f5   : > { %4779 = vmatpush1.msra.mxu1 %v6582_v40  ;;  %6176 = vmatpush3.msra.mxu0 %v6583_v33  ;;  %v6609_v40 = vld [vmem:[%s10013_s1 + $0x488] sm:$0xff] }
 0x9f6   : > { %4780 = vmatprep.subr.mxu1 %v6632_v53  ;;  %6177 = vmatprep.subr.mxu0 %v6584_v26 }
 0x9f7   : > { %4781 = vmatpush1.msra.mxu1 %v6585_v31  ;;  %6178 = vmatpush3.msra.mxu0 %v6586_v25 }
 0x9f8   : > { %4782 = vmatprep.subr.mxu1 %v6632_v53  ;;  %6179 = vmatprep.subr.mxu0 %v6587_v6 }
 0x9f9   : > { %4783 = vmatpush1.msra.mxu1 %v6588_v4  ;;  %6180 = vmatpush3.msra.mxu0 %v6589_v47 }
 0x9fa   : > { %4788 = vmatprep.subr.mxu1 %v6632_v53  ;;  %6181 = vmatprep.subr.mxu0 %v6590_v11 }
 0x9fb   : > { %5682 = vmatpush2.msk.msra.mxu1 %vm10049_vm3, %v6591_v16  ;;  %6182 = vmatpush3.msra.mxu0 %v6592_v50 }
 0x9fc   : > { %4790 = vmatprep.subr.mxu1 %v6632_v53  ;;  %6183 = vmatprep.subr.mxu0 %v6593_v13 }
 0x9fd   : > { %4791 = vmatpush2.msra.mxu1 %v6594_v19  ;;  %6184 = vmatpush3.msra.mxu0 %v6595_v24 }
 0x9fe   : > { %4792 = vmatprep.subr.mxu1 %v6632_v53  ;;  %6185 = vmatprep.subr.mxu0 %v6596_v22 }
 0x9ff   : > { %4793 = vmatpush2.msra.mxu1 %v6597_v0  ;;  %6186 = vmatpush3.msra.mxu0 %v6598_v45 }
 0xa00   : > { %4794 = vmatprep.subr.mxu1 %v6632_v53  ;;  %5685 = vmatprep.subr.msk.mxu0 %vm840_vm1, %v7711_v32 }
 0xa01   : > { %4795 = vmatpush2.msra.mxu1 %v6599_v61 }
 0xa02   : > { %4796 = vmatprep.subr.mxu1 %v6632_v53 }
 0xa03   : > { %4797 = vmatpush2.msra.mxu1 %v6600_v55 }
 0xa04   : > { %4798 = vmatprep.subr.mxu1 %v6632_v53 }
 0xa05   : > { %4799 = vmatpush2.msra.mxu1 %v6601_v60 }
 0xa06   : > { %4800 = vmatprep.subr.mxu1 %v6632_v53  ;;  %v4378_v32 = vpop.f32.mrf.mxu1 }
 0xa07   : > { %4801 = vmatpush2.msra.mxu1 %v6602_v8  ;;  %v4379_v2 = vadd.f32 %v4378_v32, %v9533_v9 }
 0xa08   : > { %4802 = vmatprep.subr.mxu1 %v6632_v53  ;;  %v4380_v42 = vpop.f32.mrf.mxu1 }
 0xa09   : > { %v4381_v18 = vadd.f32 %v4380_v42, %v9533_v9  ;;  %4803 = vmatpush2.msra.mxu1 %v6603_v21  ;;  %v9864_v17 = vmax.f32 %v4379_v2, 0.0 }
 0xa0a   : > { %4804 = vmatprep.subr.mxu1 %v6632_v53  ;;  %v4382_v63 = vpop.f32.mrf.mxu1 }
 0xa0b   : > { %v9859_v62 = vmax.f32 %v4381_v18, 0.0  ;;  %4805 = vmatpush2.msra.mxu1 %v6604_v37  ;;  %v4442_v59 = vmul.f32 %v9864_v17, %v9864_v17 }
 0xa0c   : > { %4806 = vmatprep.subr.mxu1 %v6632_v53  ;;  %v4383_v5 = vpop.f32.mrf.mxu1 }
 0xa0d   : > { %4807 = vmatpush2.msra.mxu1 %v6605_v15  ;;  %v4419_v41 = vpop.f32.mrf.mxu0  ;;  %4741 = vmatprep.mubr.f32.mxu0 %v9859_v62  ;;  %v4443_v57 = vmul.f32 %v9859_v62, %v9859_v62 }
 0xa0e   : > { %4808 = vmatprep.subr.mxu1 %v6632_v53  ;;  %4742 = vmatmul.mubr.f32.vlgmr.msra.gmra.mxu0 %v9864_v17  ;;  %v4420_v30 = vadd.f32 %v4419_v41, %v9533_v9 }
 0xa0f   : > { %4809 = vmatpush2.msra.mxu1 %v6606_v36  ;;  %v4421_v12 = vpop.f32.mrf.mxu0  ;;  %4746 = vmatprep.mubr.f32.mxu0 %v4443_v57 }
 0xa10   : > { %v4422_v43 = vadd.f32 %v4421_v12, %v9533_v9  ;;  %4810 = vmatprep.subr.mxu1 %v6632_v53  ;;  %5686 = vmatpush1.msk.msra.mxu0 %vm840_vm1, %v6607_v51  ;;  %v9899_v26 = vmax.f32 %v4420_v30, 0.0 }
 0xa11   : > { %4811 = vmatpush2.msra.mxu1 %v6608_v34  ;;  %v4423_v38 = vpop.f32.mrf.mxu0  ;;  %5689 = vmatprep.subr.msk.mxu0 %vm840_vm1, %v7719_v44  ;;  %v6610_v44 = vld [vmem:[%s10013_s1 + $0x480] sm:$0xff] }
 0xa12   : > { %v9892_v9 = vmax.f32 %v4422_v43, 0.0  ;;  %4812 = vmatprep.subr.mxu1 %v6632_v53  ;;  %4747 = vmatmul.mubr.f32.gmra.mxu0 %v4442_v59  ;;  %v4444_v25 = vmul.f32 %v9899_v26, %v9899_v26 }
 0xa13   : > { %4813 = vmatpush2.msra.mxu1 %v6609_v40  ;;  %v4424_v33 = vpop.f32.mrf.mxu0  ;;  %4904 = vmatprep.mubr.f32.mxu0 %v6632_v53 }
 0xa14   : > { %v4445_v31 = vmul.f32 %v9892_v9, %v9892_v9  ;;  %4814 = vmatprep.subr.mxu1 %v6632_v53  ;;  %5683 = vmatprep.mubr.msk.f32.mxu1 %vm10050_vm4, %v9892_v9 }
 0xa15   : > { %4815 = vmatpush2.msra.mxu1 %v6610_v44 }
 0xa16   : > { %4817 = vmatmul.mubr.f32.vlgmr.msra.gmra.mxu1 %v9899_v26 }
 0xa17   : > { %5684 = vmatprep.mubr.msk.f32.mxu1 %vm10051_vm5, %v4445_v31 }
 0xa1a   : > { %4822 = vmatmul.mubr.f32.gmra.mxu1 %v4444_v25 }
 0xa62   : > { %v6073_v6 = vpop.f32.mrf.mxu1 }
 0xa64   : > { %v6074_v4 = vpop.f32.mrf.mxu1 }
 0xa65   : > { %v6075_v45 = vadd.f32 %v6074_v4, %v6073_v6 }
 0xa66   : > { %v6076_v47 = vpop.f32.mrf.mxu1 }
 0xa68   : > { %v6077_v16 = vpop.f32.mrf.mxu1 }
 0xa69   : > { %v6078_v8 = vadd.f32 %v6077_v16, %v6076_v47  ;;  %v6611_v47 = vld [vmem:[%s10014_s2 + $0x8] sm:$0xff]  ;;  %v6612_v16 = vld [vmem:[%s10014_s2 + $0x10] sm:$0xff] }
 0xa99   : > { %v6149_v13 = vpop.f32.mrf.mxu1 }
 0xa9b   : > { %v6150_v24 = vpop.f32.mrf.mxu1 }
 0xa9c   : > { %v6151_v2 = vadd.f32 %v6150_v24, %v6149_v13 }
 0xa9d   : > { %v6152_v61 = vpop.f32.mrf.mxu1 }
 0xa9e   : > { %v6111_v11 = vpop.f32.mrf.mxu0 }
 0xa9f   : > { %v6153_v42 = vpop.f32.mrf.mxu1 }
 0xaa0   : > { %v6112_v50 = vpop.f32.mrf.mxu0  ;;  %v6154_v15 = vadd.f32 %v6153_v42, %v6152_v61 }
 0xaa1   : > { %v6113_v22 = vadd.f32 %v6112_v50, %v6111_v11 }
 0xaa2   : > { %v6114_v19 = vpop.f32.mrf.mxu0 }
 0xaa3   : > { %v4594_v55 = vadd.f32 %v6113_v22, %v6075_v45 }
 0xaa4   : > { %v6115_v0 = vpop.f32.mrf.mxu0 }
 0xaa5   : > { %v6116_v60 = vadd.f32 %v6115_v0, %v6114_v19  ;;  %v4669_v37 = vadd.f32 %v6151_v2, %v4594_v55  ;;  %v9957_v55 = vpop.permute.xlu1 %5258 }
 0xaa7   : > { %v4599_v21 = vadd.f32 %v6116_v60, %v6078_v8 }
 0xaa9   : > { %v4674_v12 = vadd.f32 %v6154_v15, %v4599_v21 }
 0xace   : > { %v6187_v32 = vpop.f32.mrf.mxu0 }
 0xad0   : > { %v6188_v18 = vpop.f32.mrf.mxu0 }
 0xad1   : > { %v6189_v63 = vadd.f32 %v6188_v18, %v6187_v32 }
 0xad2   : > { %v6190_v5 = vpop.f32.mrf.mxu0 }
 0xad3   : > { %v4744_v41 = vadd.f32 %v6189_v63, %v4669_v37 }
 0xad4   : > { %v6191_v57 = vpop.f32.mrf.mxu0 }
 0xad5   : > { %v6192_v36 = vadd.f32 %v6191_v57, %v6190_v5 }
 0xad6   : > { %v4818_v30 = vpop.f32.mrf.mxu1 }
 0xad7   : > { %v4819_v43 = vadd.f32 %v4818_v30, %v4744_v41  ;;  %v4749_v59 = vadd.f32 %v6192_v36, %v4674_v12  ;;  %v5338_v36 = vlaneseq }
 0xad8   : > { %v4820_v51 = vpop.f32.mrf.mxu1 }
 0xad9   : > { %v4827_v34 = vmul.f32 0.00390625, %v4819_v43  ;;  %vm5501_vm0 = vcmp.lt.s32.totalorder %v5338_v36, 234 }
 0xada   : > { %v4823_v38 = vpop.f32.mrf.mxu1 }
 0xadb   : > { %v4824_v40 = vadd.f32 %v4823_v38, %v4749_v59  ;;  %v4829_v31 = vmul.f32 %v4827_v34, %v4827_v34 }
 0xadc   : > { %v4825_v33 = vpop.f32.mrf.mxu1 }
 0xadd   : > { %v4828_v44 = vmul.f32 0.00390625, %v4824_v40  ;;  %v9970_v40 = vshrl.u32 %v5338_v36, 7 }
 0xadf   : > { %v4830_v25 = vsub.f32 %v4828_v44, %v4829_v31 }
 0xae1   : > { %v4831_v6 = vadd.f32 1e-05, %v4830_v25 }
 0xae3   : > { %6247 = vrsqrt.f32 %v4831_v6 }
 0xaf0   : > { %v6248_v4 = vpop.eup %6247 }
 0xaf1   : > { %5687 = vmatmul.mubr.msk.f32.vlgmr.msra.gmra.mxu0 %vm10052_vm6, %v6248_v4  ;;  %v4833_v11 = vmul.f32 %v6248_v4, %v4827_v34 }
 0xaf2   : > { %5690 = vmatpush1.msk.msra.mxu0 %vm840_vm1, %v6611_v47  ;;  %4910 = vmatprep.mubr.f32.mxu0 %v6632_v53 }
 0xaf3   : > { %5693 = vmatprep.subr.msk.mxu0 %vm840_vm1, %v7726_v35  ;;  %v6613_v35 = vld [vmem:[%s10014_s2 + $0x18] sm:$0xff] }
 0xaf5   : > { %5688 = vmatmul.mubr.msk.f32.gmra.mxu0 %vm10053_vm7, %v4833_v11 }
 0xaf6   : > { %4981 = vmatprep.mubr.f32.mxu0 %v6632_v53 }
 0xaf9   : > { %5691 = vmatmul.mubr.msk.f32.vlgmr.msra.gmra.mxu0 %vm10054_vm8, %v6248_v4 }
 0xafa   : > { %5694 = vmatpush1.msk.msra.mxu0 %vm840_vm1, %v6612_v16  ;;  %4987 = vmatprep.mubr.f32.mxu0 %v6632_v53 }
 0xafb   : > { %5697 = vmatprep.subr.msk.mxu0 %vm840_vm1, %v7738_v23  ;;  %v6614_v23 = vld [vmem:[%s10014_s2 + $0x20] sm:$0xff] }
 0xafd   : > { %5692 = vmatmul.mubr.msk.f32.gmra.mxu0 %vm10055_vm15, %v4833_v11 }
 0xafe   : > { %5058 = vmatprep.mubr.f32.mxu0 %v6632_v53 }
 0xb01   : > { %5695 = vmatmul.mubr.msk.f32.vlgmr.msra.gmra.mxu0 %vm10056_vm14, %v6248_v4 }
 0xb02   : > { %5698 = vmatpush1.msk.msra.mxu0 %vm840_vm1, %v6613_v35  ;;  %5064 = vmatprep.mubr.f32.mxu0 %v6632_v53 }
 0xb03   : > { %5701 = vmatprep.subr.msk.mxu0 %vm840_vm1, %v7750_v28 }
 0xb05   : > { %5696 = vmatmul.mubr.msk.f32.gmra.mxu0 %vm10057_vm11, %v4833_v11 }
 0xb06   : > { %5135 = vmatprep.mubr.f32.mxu0 %v6632_v53 }
 0xb09   : > { %5699 = vmatmul.mubr.msk.f32.vlgmr.msra.gmra.mxu0 %vm10058_vm10, %v6248_v4 }
 0xb0a   : > { %5702 = vmatpush1.msk.msra.mxu0 %vm840_vm1, %v6614_v23  ;;  %5141 = vmatprep.mubr.f32.mxu0 %v6632_v53  ;;  %vm10062_vm1 = vmmov %vm10050_vm4 }
 0xb0d   : > { %5700 = vmatmul.mubr.msk.f32.gmra.mxu0 %vm10059_vm9, %v4833_v11 }
 0xb0e   : > { %5212 = vmatprep.mubr.f32.mxu0 %v6632_v53 }
 0xb11   : > { %5703 = vmatmul.mubr.msk.f32.vlgmr.msra.gmra.mxu0 %vm10060_vm12, %v6248_v4 }
 0xb12   : > { %5218 = vmatprep.mubr.f32.mxu0 %v6632_v53 }
 0xb15   : > { %5704 = vmatmul.mubr.msk.f32.gmra.mxu0 %vm10061_vm13, %v4833_v11 }
 0xbb1   : > { %v4906_v28 = vpop.f32.mrf.mxu0 }
 0xbb2   : > { %v5225_v13 = vmul.f32 %v4906_v28, %v9539_v54 }
 0xbb3   : > { %v4908_v50 = vpop.f32.mrf.mxu0 }
 0xbb4   : > { %v5226_v24 = vmul.f32 %v4908_v50, %v9537_v39  ;;  %v5336_v50 = vpop.permute.xlu0 %5335 }
 0xbb5   : > { %v4912_v19 = vpop.f32.mrf.mxu0 }
 0xbb6   : > { %v5235_v22 = vsub.f32 %v5225_v13, %v4912_v19 }
 0xbb7   : > { %v4914_v0 = vpop.f32.mrf.mxu0 }
 0xbb8   : > { %v5245_v45 = vadd.f32 %v5235_v22, %v7771_v46  ;;  %v5236_v61 = vsub.f32 %v5226_v24, %v4914_v0 }
 0xbb9   : > { %v4983_v60 = vpop.f32.mrf.mxu0 }
 0xbba   : > { %v5261_v32 = vmul.f32 %v9957_v55, %v5245_v45  ;;  %v5246_v53 = vadd.f32 %v5236_v61, %v7773_v48  ;;  %v5227_v54 = vmul.f32 %v4983_v60, %v9661_v56 }
 0xbbb   : > { %v4985_v8 = vpop.f32.mrf.mxu0 }
 0xbbc   : > { %v5271_v2 = vrot.slane %v5261_v32, 4  ;;  %v5262_v42 = vmul.f32 %v9957_v55, %v5246_v53  ;;  %v5228_v21 = vmul.f32 %v4985_v8, %v9656_v49 }
 0xbbd   : > { %v4989_v18 = vpop.f32.mrf.mxu0 }
 0xbbe   : > { %v5277_v39 = vrot.slane %v5262_v42, 4  ;;  %v5237_v63 = vsub.f32 %v5227_v54, %v4989_v18  ;;  %v5272_v46 = vadd.f32 %v5271_v2, %v5261_v32 }
 0xbbf   : > { %v4991_v37 = vpop.f32.mrf.mxu0 }
 0xbc0   : > { %v5278_v5 = vadd.f32 %v5277_v39, %v5262_v42  ;;  %v5247_v15 = vadd.f32 %v5237_v63, %v7780_v14  ;;  %v5238_v41 = vsub.f32 %v5228_v21, %v4991_v37  ;;  %v5273_v43 = vrot.slane %v5272_v46, 2 }
 0xbc1   : > { %v5060_v57 = vpop.f32.mrf.mxu0 }
 0xbc2   : > { %v5279_v48 = vrot.slane %v5278_v5, 2  ;;  %v5263_v12 = vmul.f32 %v9957_v55, %v5247_v15  ;;  %v5248_v30 = vadd.f32 %v5238_v41, %v7782_v52  ;;  %v5229_v34 = vmul.f32 %v5060_v57, %v9645_v10 }
 0xbc3   : > { %v5062_v56 = vpop.f32.mrf.mxu0  ;;  %v5274_v31 = vadd.f32 %v5273_v43, %v5272_v46  ;;  %v5340_v10 = vsub.s32 0, %v9970_v40 }
 0xbc4   : > { %v5280_v59 = vadd.f32 %v5279_v48, %v5278_v5  ;;  %v5283_v51 = vrot.slane %v5263_v12, 4  ;;  %v5264_v49 = vmul.f32 %v9957_v55, %v5248_v30  ;;  %v5230_v44 = vmul.f32 %v5062_v56, %v9643_v58 }
 0xbc5   : > { %v5066_v38 = vpop.f32.mrf.mxu0  ;;  %v5275_v13 = vrot.slane %v5274_v31, 1  ;;  %v9979_v53 = vrot.slane %v5336_v50, %v5340_v10 }
 0xbc6   : > { %v5284_v14 = vadd.f32 %v5283_v51, %v5263_v12  ;;  %v5289_v33 = vrot.slane %v5264_v49, 4  ;;  %v5239_v25 = vsub.f32 %v5229_v34, %v5066_v38  ;;  %v5281_v52 = vrot.slane %v5280_v59, 1 }
 0xbc7   : > { %v5068_v6 = vpop.f32.mrf.mxu0  ;;  %v5276_v54 = vadd.f32 %v5275_v13, %v5274_v31 }
 0xbc8   : > { %v5285_v4 = vrot.slane %v5284_v14, 2  ;;  %v5290_v47 = vadd.f32 %v5289_v33, %v5264_v49  ;;  %v5249_v11 = vadd.f32 %v5239_v25, %v7789_v3  ;;  %v5240_v16 = vsub.f32 %v5230_v44, %v5068_v6 }
 0xbc9   : > { %v5137_v35 = vpop.f32.mrf.mxu0  ;;  %v5282_v22 = vadd.f32 %v5281_v52, %v5280_v59  ;;  %v5342_v12 = vadd.f32 %v9979_v53, %v5276_v54 }
 0xbca   : > { %v5286_v23 = vadd.f32 %v5285_v4, %v5284_v14  ;;  %v5291_v28 = vrot.slane %v5290_v47, 2  ;;  %v5265_v19 = vmul.f32 %v9957_v55, %v5249_v11  ;;  %v5250_v24 = vadd.f32 %v5240_v16, %v7791_v20 }
 0xbcb   : > { %v5139_v58 = vpop.f32.mrf.mxu0  ;;  %v5231_v3 = vmul.f32 %v5137_v35, %v9864_v17  ;;  %v5343_v63 = vadd.f32 %v9979_v53, %v5282_v22  ;;  %v5705_v52 = vadd.f32 -0.25, %v5342_v12 }
 0xbcc   : > { %v5287_v0 = vrot.slane %v5286_v23, 1  ;;  %v5292_v45 = vadd.f32 %v5291_v28, %v5290_v47  ;;  %v5295_v61 = vrot.slane %v5265_v19, 4  ;;  %v5266_v60 = vmul.f32 %v9957_v55, %v5250_v24 }
 0xbcd   : > { %v5143_v32 = vpop.f32.mrf.mxu0  ;;  %v5232_v42 = vmul.f32 %v5139_v58, %v9859_v62  ;;  %v5706_v51 = vadd.f32 -0.25, %v5343_v63 }
 0xbce   : > { %v5288_v8 = vadd.f32 %v5287_v0, %v5286_v23  ;;  %v5293_v2 = vrot.slane %v5292_v45, 1  ;;  %v5296_v18 = vadd.f32 %v5295_v61, %v5265_v19  ;;  %v5301_v39 = vrot.slane %v5266_v60, 4 }
 0xbcf   : > { %v5241_v20 = vsub.f32 %v5231_v3, %v5143_v32  ;;  %v5145_v21 = vpop.f32.mrf.mxu0  ;;  %v5716_v35 = vmul.f32 -1.442695, %v5706_v51  ;;  %v5715_v0 = vmul.f32 -1.442695, %v5705_v52 }
 0xbd0   : > { %v5294_v46 = vadd.f32 %v5293_v2, %v5292_v45  ;;  %v5242_v37 = vsub.f32 %v5232_v42, %v5145_v21  ;;  %v5297_v5 = vrot.slane %v5296_v18, 2  ;;  %v5302_v15 = vadd.f32 %v5301_v39, %v5266_v60 }
 0xbd1   : > { %v5251_v17 = vadd.f32 %v5241_v20, %v7799_v1  ;;  %v5214_v41 = vpop.f32.mrf.mxu0  ;;  %v5344_v57 = vadd.f32 %v9979_v53, %v5288_v8  ;;  %6249 = vpow2.f32 %v5716_v35 }
 0xbd2   : > { %v5345_v48 = vadd.f32 %v9979_v53, %v5294_v46  ;;  %v5252_v62 = vadd.f32 %v5242_v37, %v7801_v7  ;;  %v5298_v30 = vadd.f32 %v5297_v5, %v5296_v18  ;;  %v5303_v43 = vrot.slane %v5302_v15, 2 }
 0xbd3   : > { %v5267_v56 = vmul.f32 %v9957_v55, %v5251_v17  ;;  %v5216_v59 = vpop.f32.mrf.mxu0  ;;  %v5233_v34 = vmul.f32 %v5214_v41, %v9899_v26  ;;  %v5707_v44 = vadd.f32 -0.25, %v5344_v57 }
 0xbd4   : > { %v5268_v49 = vmul.f32 %v9957_v55, %v5252_v62  ;;  %v5708_v1 = vadd.f32 -0.25, %v5345_v48  ;;  %v5299_v38 = vrot.slane %v5298_v30, 1  ;;  %v5304_v14 = vadd.f32 %v5303_v43, %v5302_v15 }
 0xbd5   : > { %v5307_v33 = vrot.slane %v5267_v56, 4  ;;  %v5220_v31 = vpop.f32.mrf.mxu0  ;;  %v5234_v7 = vmul.f32 %v5216_v59, %v9892_v9  ;;  %v5717_v24 = vmul.f32 -1.442695, %v5707_v44 }
 0xbd6   : > { %v5313_v25 = vrot.slane %v5268_v49, 4  ;;  %v5243_v6 = vsub.f32 %v5233_v34, %v5220_v31  ;;  %v5300_v4 = vadd.f32 %v5299_v38, %v5298_v30  ;;  %v5305_v47 = vrot.slane %v5304_v14, 1 }
 0xbd7   : > { %v5308_v11 = vadd.f32 %v5307_v33, %v5267_v56  ;;  %v5222_v16 = vpop.f32.mrf.mxu0  ;;  %v5718_v28 = vmul.f32 -1.442695, %v5708_v1 }
 0xbd8   : > { %v5314_v10 = vadd.f32 %v5313_v25, %v5268_v49  ;;  %v5253_v23 = vadd.f32 %v5243_v6, %v7808_v27  ;;  %v5244_v26 = vsub.f32 %v5234_v7, %v5222_v16  ;;  %v5346_v50 = vadd.f32 %v9979_v53, %v5300_v4 }
 0xbd9   : > { %v5306_v13 = vadd.f32 %v5305_v47, %v5304_v14  ;;  %v5309_v19 = vrot.slane %v5308_v11, 2  ;;  %6251 = vpow2.f32 %v5718_v28 }
 0xbda   : > { %v5315_v58 = vrot.slane %v5314_v10, 2  ;;  %v5269_v9 = vmul.f32 %v9957_v55, %v5253_v23  ;;  %v5254_v22 = vadd.f32 %v5244_v26, %v7810_v29  ;;  %v5709_v45 = vadd.f32 -0.25, %v5346_v50 }
 0xbdb   : > { %v5347_v61 = vadd.f32 %v9979_v53, %v5306_v13  ;;  %v5310_v60 = vadd.f32 %v5309_v19, %v5308_v11  ;;  %6253 = vpow2.f32 %v5717_v24  ;;  %v6634_v50 = vmov 1966171168  }
 0xbdc   : > { %v5316_v3 = vadd.f32 %v5315_v58, %v5314_v10  ;;  %v5319_v27 = vrot.slane %v5269_v9, 4  ;;  %v5270_v32 = vmul.f32 %v9957_v55, %v5254_v22  ;;  %v5719_v18 = vmul.f32 -1.442695, %v5709_v45 }
 0xbdd   : > { %v5710_v8 = vadd.f32 -0.25, %v5347_v61  ;;  %v5311_v2 = vrot.slane %v5310_v60, 1  ;;  %6255 = vpow2.f32 %v5715_v0  ;;  %v5437_v13 = vunpack.c.l.s4 %v6634_v50 }
 0xbde   : > { %v5317_v42 = vrot.slane %v5316_v3, 1  ;;  %v5320_v54 = vadd.f32 %v5319_v27, %v5269_v9  ;;  %v5325_v29 = vsel %vm10062_vm1, %v5270_v32, 0.0  ;;  %v6250_v59 = vpop.eup %6249 }
 0xbdf   : > { %v5720_v39 = vmul.f32 -1.442695, %v5710_v8  ;;  %v5312_v20 = vadd.f32 %v5311_v2, %v5310_v60  ;;  %v5326_v46 = vrot.slane %v5325_v29, 4  ;;  %v5393_v14 = vadd.f32 1.0, %v6250_v59 }
 0xbe0   : > { %v5318_v21 = vadd.f32 %v5317_v42, %v5316_v3  ;;  %v5321_v63 = vrot.slane %v5320_v54, 2  ;;  %v5438_v22 = vunpack.c.0.s8 %v5437_v13 }
 0xbe1   : > { %6257 = vpow2.f32 %v5720_v39  ;;  %v5348_v37 = vadd.f32 %v9979_v53, %v5312_v20  ;;  %v5327_v15 = vadd.f32 %v5326_v46, %v5325_v29 }
 0xbe2   : > { %v5349_v55 = vadd.f32 %v9979_v53, %v5318_v21  ;;  %v5322_v5 = vadd.f32 %v5321_v63, %v5320_v54  ;;  %6259 = vpow2.f32 %v5719_v18  ;;  %v5441_v27 = vsub.s32 %v5438_v22, %v9970_v40 }
 0xbe3   : > { %v5711_v17 = vadd.f32 -0.25, %v5348_v37  ;;  %v5328_v48 = vrot.slane %v5327_v15, 2 }
 0xbe4   : > { %v5712_v41 = vadd.f32 -0.25, %v5349_v55  ;;  %v5323_v57 = vrot.slane %v5322_v5, 1 }
 0xbe5   : > { %v5721_v62 = vmul.f32 -1.442695, %v5711_v17  ;;  %v5329_v43 = vadd.f32 %v5328_v48, %v5327_v15 }
 0xbe6   : > { %v5722_v12 = vmul.f32 -1.442695, %v5712_v41  ;;  %v5324_v30 = vadd.f32 %v5323_v57, %v5322_v5  ;;  %v6252_v49 = vpop.eup %6251 }
 0xbe7   : > { %6261 = vpow2.f32 %v5721_v62  ;;  %v5330_v51 = vrot.slane %v5329_v43, 1  ;;  %v5395_v44 = vadd.f32 1.0, %v6252_v49 }
 0xbe8   : > { %v5350_v56 = vadd.f32 %v9979_v53, %v5324_v30  ;;  %6263 = vpow2.f32 %v5722_v12  ;;  %v6254_v1 = vpop.eup %6253 }
 0xbe9   : > { %v5331_v38 = vadd.f32 %v5330_v51, %v5329_v43  ;;  %v5394_v6 = vadd.f32 1.0, %v6254_v1 }
 0xbea   : > { %v5713_v34 = vadd.f32 -0.25, %v5350_v56  ;;  %v6256_v31 = vpop.eup %6255 }
 0xbeb   : > { %v5351_v25 = vadd.f32 %v9979_v53, %v5331_v38  ;;  %v5392_v47 = vadd.f32 1.0, %v6256_v31 }
 0xbec   : > { %v5723_v33 = vmul.f32 -1.442695, %v5713_v34 }
 0xbed   : > { %v5714_v52 = vadd.f32 -0.25, %v5351_v25 }
 0xbee   : > { %v6258_v7 = vpop.eup %6257  ;;  %6265 = vpow2.f32 %v5723_v33 }
 0xbef   : > { %v6260_v4 = vpop.eup %6259  ;;  %6267 = vrcp.f32 %v5393_v14  ;;  %v5397_v11 = vadd.f32 1.0, %v6258_v7  ;;  %v5724_v16 = vmul.f32 -1.442695, %v5714_v52 }
 0xbf0   : > { %6269 = vrcp.f32 %v5395_v44  ;;  %v5396_v35 = vadd.f32 1.0, %v6260_v4 }
 0xbf1   : > { %6271 = vrcp.f32 %v5394_v6 }
 0xbf2   : > { %6273 = vpow2.f32 %v5724_v16 }
 0xbf3   : > { %6275 = vrcp.f32 %v5392_v47 }
 0xbf4   : > { %v6262_v10 = vpop.eup %6261  ;;  %6277 = vrcp.f32 %v5397_v11 }
 0xbf5   : > { %v5398_v23 = vadd.f32 1.0, %v6262_v10  ;;  %v6264_v26 = vpop.eup %6263  ;;  %6279 = vrcp.f32 %v5396_v35 }
 0xbf6   : > { %v5399_v53 = vadd.f32 1.0, %v6264_v26 }
 0xbf7   : > { %6281 = vrcp.f32 %v5398_v23 }
 0xbf8   : > { %6283 = vrcp.f32 %v5399_v53 }
 0xbfb   : > { %v6266_v28 = vpop.eup %6265 }
 0xbfc   : > { %v6268_v19 = vpop.eup %6267  ;;  %v5400_v58 = vadd.f32 1.0, %v6266_v28 }
 0xbfd   : > { %v6270_v24 = vpop.eup %6269 }
 0xbfe   : > { %v6272_v9 = vpop.eup %6271  ;;  %6285 = vrcp.f32 %v5400_v58 }
 0xbff   : > { %v6274_v0 = vpop.eup %6273  ;;  %v5433_v61 = vcombine.low %v6272_v9, %v6270_v24 }
 0xc00   : > { %v6276_v45 = vpop.eup %6275  ;;  %v5401_v60 = vadd.f32 1.0, %v6274_v0 }
 0xc01   : > { %v6278_v3 = vpop.eup %6277  ;;  %v5432_v32 = vcombine.low %v6276_v45, %v6268_v19  ;;  %v5449_v42 = vrot.slane %v5433_v61, %v5441_v27 }
 0xc02   : > { %6287 = vrcp.f32 %v5401_v60  ;;  %v6280_v8 = vpop.eup %6279 }
 0xc03   : > { %v5434_v54 = vcombine.low %v6280_v8, %v6278_v3  ;;  %v5442_v39 = vrot.slane %v5432_v32, %v5441_v27 }
 0xc04   : > { %v6282_v2 = vpop.eup %6281 }
 0xc05   : > { %v6284_v18 = vpop.eup %6283  ;;  %v5464_v29 = vcombine.low %v5442_v39, %v5449_v42  ;;  %v5456_v21 = vrot.slane %v5434_v54, %v5441_v27 }
 0xc06   : > { %v5435_v20 = vcombine.low %v6282_v2, %v6284_v18 }
 0xc07   : > { %v5472_v37 = vrot.slane %v5464_v29, %v5441_v27 }
 0xc08   : > { %v5463_v63 = vrot.slane %v5435_v20, %v5441_v27 }
 0xc0a   : > { %v5465_v46 = vcombine.low %v5456_v21, %v5463_v63 }
 0xc0b   : > { %v6286_v40 = vpop.eup %6285 }
 0xc0c   : > { %v5479_v55 = vrot.slane %v5465_v46, %v5441_v27 }
 0xc0e   : > { %v5480_v5 = vcombine.low %v5472_v37, %v5479_v55 }
 0xc0f   : > { %v6288_v15 = vpop.eup %6287 }
 0xc10   : > { %5498 = vst [vmem:[%s386_s21] sm:$0xff] %v5480_v5  ;;  %v5481_v17 = vcombine.low %v6286_v40, %v6288_v15 }
 0xc12   : > { %v5488_v41 = vrot.slane %v5481_v17, %v5441_v27 }
 0xc14   : > { %v5495_v57 = vrot.slane %v5488_v41, %v5441_v27 }
 0xc16   : > { %5503 = vst.msk [vmem:[%s386_s21 + $0x8] sm:$0x3] %vm5501_vm0, %v5495_v57 }
 0xc17 PF: > { %s23_s19 = sadd.s32 1, %s6621_s19  }
 0xc18   : > { %p20_p4 = scmp.ge.s32.totalorder %s23_s19, 4  }
 0xc1a   :  { %22 = sbr.rel (!%p20_p4) target bundleno = 3 (0x3), region = 94 }

</bundles_post_ra>
